<compile_context>
chip_gen: v5e
topology: v5e:2x2
jax: 0.10.0
libtpu: 0.0.40
codegen_flags: <defaults>
</compile_context>

<pallas_src>
import functools

import jax
import jax.numpy as jnp
from jax.experimental import pallas as pl
from jax.experimental.pallas import tpu as pltpu

EPS = 1e-5
LANES = 128


# ----------------------------------------------------------------------------
# In-kernel 3x3 conv on the MXU: 3 fused matmuls (one per kernel row), K = 3*Cp
# ----------------------------------------------------------------------------
def _conv3x3_mxu(xin, w_ref):
    """xin: (H, W, Cp) f32 values (already pre-activated if needed).
    w_ref: (3, 3*Cp, Cp) bf16 VMEM ref, laid out as [dy, dx*Cp + ci, co].
    Returns the conv output as (H*W, Cp) f32 (zero padding at borders)."""
    H, W, Cp = xin.shape
    K3 = w_ref.shape[1]
    zrow = jnp.zeros((1, W, Cp), xin.dtype)
    zcol = jnp.zeros((H, 1, Cp), xin.dtype)

    def sh(a, o):  # out[h] = a[h + o], zero outside
        if o == 0:
            return a
        if o == 1:
            return jnp.concatenate([a[1:], zrow], axis=0)
        return jnp.concatenate([zrow, a[:-1]], axis=0)

    def sw(a, o):  # out[:, w] = a[:, w + o], zero outside
        if o == 0:
            return a
        if o == 1:
            return jnp.concatenate([a[:, 1:], zcol], axis=1)
        return jnp.concatenate([zcol, a[:, :-1]], axis=1)

    acc = jnp.zeros((H * W, Cp), jnp.float32)
    for dy in range(3):
        a = sh(xin, dy - 1)
        # lhs[h, w, dx*Cp + ci] = xin[h + dy - 1, w + dx - 1, ci]
        lhs = jnp.concatenate([sw(a, -1), a, sw(a, 1)], axis=-1)  # (H, W, 3*Cp)
        acc = acc + jnp.dot(
            lhs.reshape(H * W, K3).astype(jnp.bfloat16),
            w_ref[dy],
            preferred_element_type=jnp.float32,
        )
    return acc


def _write_conv_outputs(acc, H, W, Cp, y_ref, stats_ref):
    y_ref[...] = acc.reshape(H, W, Cp)
    stats_ref[...] = jnp.concatenate(
        [jnp.sum(acc, axis=0, keepdims=True),
         jnp.sum(acc * acc, axis=0, keepdims=True)],
        axis=0,
    )


# ------------------------------- kernels ------------------------------------
def conv1_stats_kernel(x_ref, w_ref, y_ref, stats_ref):
    H, W, Cp = x_ref.shape
    acc = _conv3x3_mxu(x_ref[...], w_ref)
    _write_conv_outputs(acc, H, W, Cp, y_ref, stats_ref)


def bn_relu_conv2_stats_kernel(y1_ref, w_ref, scale_ref, shift_ref, y_ref,
                               stats_ref):
    H, W, Cp = y1_ref.shape
    # Fused BN1 affine (precomputed scale/shift from global stats) + ReLU.
    h = jnp.maximum(y1_ref[...] * scale_ref[...] + shift_ref[...], 0.0)
    acc = _conv3x3_mxu(h, w_ref)
    _write_conv_outputs(acc, H, W, Cp, y_ref, stats_ref)


def bn_add_relu_kernel(y_ref, r_ref, scale_ref, shift_ref, o_ref):
    o_ref[...] = jnp.maximum(
        y_ref[...] * scale_ref[...] + shift_ref[...] + r_ref[...], 0.0
    ).astype(o_ref.dtype)


# ------------------------------ host helpers --------------------------------
def _pack_weights(w, Cp):
    """HWIO (3,3,C,C) f32 -> (3, 3*Cp, Cp) bf16 matmul operand."""
    kh, kw, ci, co = w.shape
    w = jnp.pad(w, ((0, 0), (0, 0), (0, Cp - ci), (0, Cp - co)))
    return w.reshape(kh, kw * Cp, Cp).astype(jnp.bfloat16)


def _pad_vec(v, Cp):
    v = jnp.asarray(v, jnp.float32).reshape(-1)
    return jnp.pad(v, (0, Cp - v.shape[0])).reshape(1, Cp)


def _affine_from_stats(stats, gamma, beta, count):
    """Global BN from per-batch-tile partial (sum, sumsq): y*scale + shift."""
    s = jnp.sum(stats[:, 0, :], axis=0)
    ss = jnp.sum(stats[:, 1, :], axis=0)
    mean = s / count
    var = jnp.maximum(ss / count - mean * mean, 0.0)  # one-pass, guard cancel
    scale = gamma.reshape(-1) * jax.lax.rsqrt(var + EPS)
    shift = beta.reshape(-1) - mean * scale
    return scale.reshape(1, -1), shift.reshape(1, -1)


def _run_conv(kernel, x, w_mat, *affine):
    N, H, W, Cp = x.shape
    img_spec = pl.BlockSpec((None, H, W, Cp), lambda n: (n, 0, 0, 0))
    vec_spec = pl.BlockSpec((1, Cp), lambda n: (0, 0))
    return pl.pallas_call(
        kernel,
        out_shape=(jax.ShapeDtypeStruct((N, H, W, Cp), jnp.float32),
                   jax.ShapeDtypeStruct((N, 2, Cp), jnp.float32)),
        grid=(N,),
        in_specs=[img_spec, pl.BlockSpec(w_mat.shape, lambda n: (0, 0, 0))]
                 + [vec_spec] * len(affine),
        out_specs=(img_spec, pl.BlockSpec((None, 2, Cp), lambda n: (n, 0, 0))),
        compiler_params=pltpu.CompilerParams(
            dimension_semantics=("parallel",)),
    )(x, w_mat, *affine)


def _bn_add_relu(y, r, scale, shift):
    N, H, W, Cp = y.shape
    img_spec = pl.BlockSpec((None, H, W, Cp), lambda n: (n, 0, 0, 0))
    vec_spec = pl.BlockSpec((1, Cp), lambda n: (0, 0))
    return pl.pallas_call(
        bn_add_relu_kernel,
        out_shape=jax.ShapeDtypeStruct((N, H, W, Cp), r.dtype),
        grid=(N,),
        in_specs=[img_spec, img_spec, vec_spec, vec_spec],
        out_specs=img_spec,
        compiler_params=pltpu.CompilerParams(
            dimension_semantics=("parallel",)),
    )(y, r, scale, shift)


def basic_block(x, w1, g1, b1, w2, g2, b2):
    """x: (N, H, W, C) f32 NHWC.  downsample=None, stride=1 => Cin == Cout."""
    N, H, W, C = x.shape
    assert w1.shape[-1] == C, "BasicBlock with downsample=None needs Cin==Cout"
    Cp = ((C + LANES - 1) // LANES) * LANES

    xp = x if Cp == C else jnp.pad(x, ((0, 0), (0, 0), (0, 0), (0, Cp - C)))
    w1m, w2m = _pack_weights(w1, Cp), _pack_weights(w2, Cp)
    g1p, b1p = _pad_vec(g1, Cp), _pad_vec(b1, Cp)
    g2p, b2p = _pad_vec(g2, Cp), _pad_vec(b2, Cp)
    count = N * H * W

    # conv1 (+ partial BN1 stats), then global BN1 affine on the host side.
    y1, st1 = _run_conv(conv1_stats_kernel, xp, w1m)
    scale1, shift1 = _affine_from_stats(st1, g1p, b1p, count)
    # bn1+relu fused into conv2 (+ partial BN2 stats).
    y2, st2 = _run_conv(bn_relu_conv2_stats_kernel, y1, w2m, scale1, shift1)
    scale2, shift2 = _affine_from_stats(st2, g2p, b2p, count)
    # bn2 + residual + relu.
    out = _bn_add_relu(y2, xp, scale2, shift2)
    return out if Cp == C else out[..., :C]


# ------------------------------ reference -----------------------------------
def reference(x, w1, g1, b1, w2, g2, b2, mxu_dtype=jnp.float32):
    def conv(y, w):
        return jax.lax.conv_general_dilated(
            y.astype(mxu_dtype), w.astype(mxu_dtype),
            window_strides=(1, 1), padding="SAME",
            dimension_numbers=("NHWC", "HWIO", "NHWC"),
            preferred_element_type=jnp.float32)

    def bn(y, g, b):
        mean = jnp.mean(y, axis=(0, 1, 2), keepdims=True)
        var = jnp.mean((y - mean) ** 2, axis=(0, 1, 2), keepdims=True)
        return ((y - mean) * jax.lax.rsqrt(var + EPS) * g.reshape(1, 1, 1, -1)
                + b.reshape(1, 1, 1, -1))

    h = jax.nn.relu(bn(conv(x, w1), g1, b1))
    o = bn(conv(h, w2), g2, b2)
    return jax.nn.relu(o + x)


if __name__ == "__main__":
    N, H, W, C = 2, 16, 16, 8  # inchanel == outchanel (downsample=None)

    key = jax.random.PRNGKey(0)
    kx, k1, k2, kg1, kb1, kg2, kb2 = jax.random.split(key, 7)

    x = jax.random.normal(kx, (N, H, W, C), jnp.float32)
    w1 = jax.random.normal(k1, (3, 3, C, C), jnp.float32) * 0.1
    w2 = jax.random.normal(k2, (3, 3, C, C), jnp.float32) * 0.1
    g1 = 1.0 + 0.1 * jax.random.normal(kg1, (C,), jnp.float32)
    b1 = 0.1 * jax.random.normal(kb1, (C,), jnp.float32)
    g2 = 1.0 + 0.1 * jax.random.normal(kg2, (C,), jnp.float32)
    b2 = 0.1 * jax.random.normal(kb2, (C,), jnp.float32)

    out = jax.jit(basic_block)(x, w1, g1, b1, w2, g2, b2)
    out = jax.block_until_ready(out)
    assert out.shape == (N, H, W, C)

    # Reference with the same bf16 MXU-operand policy (tight check) and the
    # pure-f32 reference (loose check covering bf16 quantization).
    ref_bf16 = reference(x, w1, g1, b1, w2, g2, b2, mxu_dtype=jnp.bfloat16)
    ref_f32 = reference(x, w1, g1, b1, w2, g2, b2, mxu_dtype=jnp.float32)
    err_b = float(jnp.max(jnp.abs(out - ref_bf16)))
    err_f = float(jnp.max(jnp.abs(out - ref_f32)))
    assert jnp.allclose(out, ref_bf16, rtol=1e-2, atol=1e-2), err_b
    assert jnp.allclose(out, ref_f32, rtol=5e-2, atol=5e-2), err_f

    print("KERNEL_OK")
</pallas_src>

<mosaic_0001>
module attributes {stable_mosaic.version = 11 : i64} {
  func.func @conv1_stats_kernel(%arg0: i32, %arg1: memref<1x16x16x128xf32, #tpu.memory_space<vmem>>, %arg2: memref<3x384x128xbf16, #tpu.memory_space<vmem>>, %arg3: memref<1x16x16x128xf32, #tpu.memory_space<vmem>>, %arg4: memref<1x2x128xf32, #tpu.memory_space<vmem>>) attributes {dimension_semantics = [#tpu.dimension_semantics<parallel>], iteration_bounds = array<i64: 2>, scalar_prefetch = 0 : i64, scratch_operands = 0 : i64, tpu.core_type = #tpu.core_type<tc>, window_params = [{transform_indices = @transform_0, window_bounds = array<i64: 1, 16, 16, 128>}, {pipeline_mode = #tpu.pipeline_mode<synchronous>, transform_indices = @transform_1, window_bounds = array<i64: 3, 384, 128>}, {transform_indices = @transform_2, window_bounds = array<i64: 1, 16, 16, 128>}, {transform_indices = @transform_3, window_bounds = array<i64: 1, 2, 128>}]} {
    %c0 = arith.constant 0 : index
    %c0_0 = arith.constant 0 : index
    %c0_1 = arith.constant 0 : index
    %c0_2 = arith.constant 0 : index
    %0 = vector.load %arg1[%c0, %c0_0, %c0_1, %c0_2] : memref<1x16x16x128xf32, #tpu.memory_space<vmem>>, vector<1x16x16x128xf32>
    %1 = vector.shape_cast %0 : vector<1x16x16x128xf32> to vector<16x16x128xf32>
    %cst = arith.constant 0.000000e+00 : f32
    %2 = vector.broadcast %cst : f32 to vector<1x16x128xf32>
    %cst_3 = arith.constant 0.000000e+00 : f32
    %3 = vector.broadcast %cst_3 : f32 to vector<16x1x128xf32>
    %cst_4 = arith.constant 0.000000e+00 : f32
    %4 = vector.broadcast %cst_4 : f32 to vector<256x128xf32>
    %5 = vector.extract_strided_slice %1 {offsets = [0, 0, 0], sizes = [15, 16, 128], strides = [1, 1, 1]} : vector<16x16x128xf32> to vector<15x16x128xf32>
    %6 = tpu.concatenate %2, %5 in 0 : vector<1x16x128xf32>, vector<15x16x128xf32> -> vector<16x16x128xf32>
    %7 = vector.extract_strided_slice %6 {offsets = [0, 0, 0], sizes = [16, 15, 128], strides = [1, 1, 1]} : vector<16x16x128xf32> to vector<16x15x128xf32>
    %8 = tpu.concatenate %3, %7 in 1 : vector<16x1x128xf32>, vector<16x15x128xf32> -> vector<16x16x128xf32>
    %9 = vector.extract_strided_slice %6 {offsets = [0, 1, 0], sizes = [16, 15, 128], strides = [1, 1, 1]} : vector<16x16x128xf32> to vector<16x15x128xf32>
    %10 = tpu.concatenate %9, %3 in 1 : vector<16x15x128xf32>, vector<16x1x128xf32> -> vector<16x16x128xf32>
    %11 = tpu.concatenate %8, %6, %10 in 2 : vector<16x16x128xf32>, vector<16x16x128xf32>, vector<16x16x128xf32> -> vector<16x16x384xf32>
    %12 = vector.shape_cast %11 : vector<16x16x384xf32> to vector<256x384xf32>
    %13 = arith.truncf %12 : vector<256x384xf32> to vector<256x384xbf16>
    %c0_5 = arith.constant 0 : index
    %c0_6 = arith.constant 0 : index
    %c0_7 = arith.constant 0 : index
    %14 = vector.load %arg2[%c0_5, %c0_6, %c0_7] : memref<3x384x128xbf16, #tpu.memory_space<vmem>>, vector<1x384x128xbf16>
    %15 = vector.shape_cast %14 : vector<1x384x128xbf16> to vector<384x128xbf16>
    %cst_8 = arith.constant dense<0.000000e+00> : vector<256x128xf32>
    %16 = tpu.matmul %13, %15, %cst_8 {dimension_numbers = #tpu.dot_dimension_numbers<[1], [0], [0], [1], [0, 0, 1, 1], [], []>} : vector<256x384xbf16>, vector<384x128xbf16>, vector<256x128xf32> -> vector<256x128xf32>
    %17 = arith.addf %4, %16 : vector<256x128xf32>
    %18 = vector.extract_strided_slice %1 {offsets = [0, 0, 0], sizes = [16, 15, 128], strides = [1, 1, 1]} : vector<16x16x128xf32> to vector<16x15x128xf32>
    %19 = tpu.concatenate %3, %18 in 1 : vector<16x1x128xf32>, vector<16x15x128xf32> -> vector<16x16x128xf32>
    %20 = vector.extract_strided_slice %1 {offsets = [0, 1, 0], sizes = [16, 15, 128], strides = [1, 1, 1]} : vector<16x16x128xf32> to vector<16x15x128xf32>
    %21 = tpu.concatenate %20, %3 in 1 : vector<16x15x128xf32>, vector<16x1x128xf32> -> vector<16x16x128xf32>
    %22 = tpu.concatenate %19, %1, %21 in 2 : vector<16x16x128xf32>, vector<16x16x128xf32>, vector<16x16x128xf32> -> vector<16x16x384xf32>
    %23 = vector.shape_cast %22 : vector<16x16x384xf32> to vector<256x384xf32>
    %24 = arith.truncf %23 : vector<256x384xf32> to vector<256x384xbf16>
    %c1 = arith.constant 1 : index
    %c0_9 = arith.constant 0 : index
    %c0_10 = arith.constant 0 : index
    %25 = vector.load %arg2[%c1, %c0_9, %c0_10] : memref<3x384x128xbf16, #tpu.memory_space<vmem>>, vector<1x384x128xbf16>
    %26 = vector.shape_cast %25 : vector<1x384x128xbf16> to vector<384x128xbf16>
    %cst_11 = arith.constant dense<0.000000e+00> : vector<256x128xf32>
    %27 = tpu.matmul %24, %26, %cst_11 {dimension_numbers = #tpu.dot_dimension_numbers<[1], [0], [0], [1], [0, 0, 1, 1], [], []>} : vector<256x384xbf16>, vector<384x128xbf16>, vector<256x128xf32> -> vector<256x128xf32>
    %28 = arith.addf %17, %27 : vector<256x128xf32>
    %29 = vector.extract_strided_slice %1 {offsets = [1, 0, 0], sizes = [15, 16, 128], strides = [1, 1, 1]} : vector<16x16x128xf32> to vector<15x16x128xf32>
    %30 = tpu.concatenate %29, %2 in 0 : vector<15x16x128xf32>, vector<1x16x128xf32> -> vector<16x16x128xf32>
    %31 = vector.extract_strided_slice %30 {offsets = [0, 0, 0], sizes = [16, 15, 128], strides = [1, 1, 1]} : vector<16x16x128xf32> to vector<16x15x128xf32>
    %32 = tpu.concatenate %3, %31 in 1 : vector<16x1x128xf32>, vector<16x15x128xf32> -> vector<16x16x128xf32>
    %33 = vector.extract_strided_slice %30 {offsets = [0, 1, 0], sizes = [16, 15, 128], strides = [1, 1, 1]} : vector<16x16x128xf32> to vector<16x15x128xf32>
    %34 = tpu.concatenate %33, %3 in 1 : vector<16x15x128xf32>, vector<16x1x128xf32> -> vector<16x16x128xf32>
    %35 = tpu.concatenate %32, %30, %34 in 2 : vector<16x16x128xf32>, vector<16x16x128xf32>, vector<16x16x128xf32> -> vector<16x16x384xf32>
    %36 = vector.shape_cast %35 : vector<16x16x384xf32> to vector<256x384xf32>
    %37 = arith.truncf %36 : vector<256x384xf32> to vector<256x384xbf16>
    %c2 = arith.constant 2 : index
    %c0_12 = arith.constant 0 : index
    %c0_13 = arith.constant 0 : index
    %38 = vector.load %arg2[%c2, %c0_12, %c0_13] : memref<3x384x128xbf16, #tpu.memory_space<vmem>>, vector<1x384x128xbf16>
    %39 = vector.shape_cast %38 : vector<1x384x128xbf16> to vector<384x128xbf16>
    %cst_14 = arith.constant dense<0.000000e+00> : vector<256x128xf32>
    %40 = tpu.matmul %37, %39, %cst_14 {dimension_numbers = #tpu.dot_dimension_numbers<[1], [0], [0], [1], [0, 0, 1, 1], [], []>} : vector<256x384xbf16>, vector<384x128xbf16>, vector<256x128xf32> -> vector<256x128xf32>
    %41 = arith.addf %28, %40 : vector<256x128xf32>
    %42 = vector.shape_cast %41 : vector<256x128xf32> to vector<16x16x128xf32>
    %c0_15 = arith.constant 0 : index
    %c0_16 = arith.constant 0 : index
    %c0_17 = arith.constant 0 : index
    %c0_18 = arith.constant 0 : index
    %43 = vector.load %arg3[%c0_15, %c0_16, %c0_17, %c0_18] : memref<1x16x16x128xf32, #tpu.memory_space<vmem>>, vector<1x16x16x128xf32>
    %44 = vector.shape_cast %43 : vector<1x16x16x128xf32> to vector<16x16x128xf32>
    %45 = vector.shape_cast %42 : vector<16x16x128xf32> to vector<1x16x16x128xf32>
    tpu.vector_store %arg3[%c0_15, %c0_16, %c0_17, %c0_18], %45 {strides = array<i32>} : memref<1x16x16x128xf32, #tpu.memory_space<vmem>>, vector<1x16x16x128xf32>,
    %cst_19 = arith.constant dense<0.000000e+00> : vector<128xf32>
    %46 = vector.multi_reduction <add>, %41, %cst_19 [0] : vector<256x128xf32> to vector<128xf32>
    %47 = vector.shape_cast %46 : vector<128xf32> to vector<1x128xf32>
    %48 = arith.mulf %41, %41 : vector<256x128xf32>
    %cst_20 = arith.constant dense<0.000000e+00> : vector<128xf32>
    %49 = vector.multi_reduction <add>, %48, %cst_20 [0] : vector<256x128xf32> to vector<128xf32>
    %50 = vector.shape_cast %49 : vector<128xf32> to vector<1x128xf32>
    %51 = tpu.concatenate %47, %50 in 0 : vector<1x128xf32>, vector<1x128xf32> -> vector<2x128xf32>
    %c0_21 = arith.constant 0 : index
    %c0_22 = arith.constant 0 : index
    %c0_23 = arith.constant 0 : index
    %52 = vector.load %arg4[%c0_21, %c0_22, %c0_23] : memref<1x2x128xf32, #tpu.memory_space<vmem>>, vector<1x2x128xf32>
    %53 = vector.shape_cast %52 : vector<1x2x128xf32> to vector<2x128xf32>
    %54 = vector.shape_cast %51 : vector<2x128xf32> to vector<1x2x128xf32>
    tpu.vector_store %arg4[%c0_21, %c0_22, %c0_23], %54 {strides = array<i32>} : memref<1x2x128xf32, #tpu.memory_space<vmem>>, vector<1x2x128xf32>,
    return
  }
  func.func @transform_0(%arg0: i32) -> (i32, i32, i32, i32) {
    %c0_i32 = arith.constant 0 : i32
    %c0_i32_0 = arith.constant 0 : i32
    %c0_i32_1 = arith.constant 0 : i32
    %c0_i32_2 = arith.constant 0 : i32
    return %arg0, %c0_i32, %c0_i32_0, %c0_i32_1 : i32, i32, i32, i32
  }
  func.func @transform_1(%arg0: i32) -> (i32, i32, i32) {
    %c0_i32 = arith.constant 0 : i32
    %c0_i32_0 = arith.constant 0 : i32
    %c0_i32_1 = arith.constant 0 : i32
    %c0_i32_2 = arith.constant 0 : i32
    return %c0_i32, %c0_i32_0, %c0_i32_1 : i32, i32, i32
  }
  func.func @transform_2(%arg0: i32) -> (i32, i32, i32, i32) {
    %c0_i32 = arith.constant 0 : i32
    %c0_i32_0 = arith.constant 0 : i32
    %c0_i32_1 = arith.constant 0 : i32
    %c0_i32_2 = arith.constant 0 : i32
    return %arg0, %c0_i32, %c0_i32_0, %c0_i32_1 : i32, i32, i32, i32
  }
  func.func @transform_3(%arg0: i32) -> (i32, i32, i32) {
    %c0_i32 = arith.constant 0 : i32
    %c0_i32_0 = arith.constant 0 : i32
    %c0_i32_1 = arith.constant 0 : i32
    return %arg0, %c0_i32, %c0_i32_0 : i32, i32, i32
  }
}

module attributes {stable_mosaic.version = 11 : i64} {
  func.func @bn_add_relu_kernel(%arg0: i32, %arg1: memref<1x16x16x128xf32, #tpu.memory_space<vmem>>, %arg2: memref<1x16x16x128xf32, #tpu.memory_space<vmem>>, %arg3: memref<1x128xf32, #tpu.memory_space<vmem>>, %arg4: memref<1x128xf32, #tpu.memory_space<vmem>>, %arg5: memref<1x16x16x128xf32, #tpu.memory_space<vmem>>) attributes {dimension_semantics = [#tpu.dimension_semantics<parallel>], iteration_bounds = array<i64: 2>, scalar_prefetch = 0 : i64, scratch_operands = 0 : i64, tpu.core_type = #tpu.core_type<tc>, window_params = [{transform_indices = @transform_0, window_bounds = array<i64: 1, 16, 16, 128>}, {transform_indices = @transform_1, window_bounds = array<i64: 1, 16, 16, 128>}, {pipeline_mode = #tpu.pipeline_mode<synchronous>, transform_indices = @transform_2, window_bounds = array<i64: 1, 128>}, {pipeline_mode = #tpu.pipeline_mode<synchronous>, transform_indices = @transform_3, window_bounds = array<i64: 1, 128>}, {transform_indices = @transform_4, window_bounds = array<i64: 1, 16, 16, 128>}]} {
    %c0 = arith.constant 0 : index
    %c0_0 = arith.constant 0 : index
    %c0_1 = arith.constant 0 : index
    %c0_2 = arith.constant 0 : index
    %0 = vector.load %arg1[%c0, %c0_0, %c0_1, %c0_2] : memref<1x16x16x128xf32, #tpu.memory_space<vmem>>, vector<1x16x16x128xf32>
    %1 = vector.shape_cast %0 : vector<1x16x16x128xf32> to vector<16x16x128xf32>
    %c0_3 = arith.constant 0 : index
    %c0_4 = arith.constant 0 : index
    %2 = vector.load %arg3[%c0_3, %c0_4] : memref<1x128xf32, #tpu.memory_space<vmem>>, vector<1x128xf32>
    %3 = vector.shape_cast %2 : vector<1x128xf32> to vector<1x1x128xf32>
    %4 = vector.broadcast %3 : vector<1x1x128xf32> to vector<16x16x128xf32>
    %5 = arith.mulf %1, %4 : vector<16x16x128xf32>
    %c0_5 = arith.constant 0 : index
    %c0_6 = arith.constant 0 : index
    %6 = vector.load %arg4[%c0_5, %c0_6] : memref<1x128xf32, #tpu.memory_space<vmem>>, vector<1x128xf32>
    %7 = vector.shape_cast %6 : vector<1x128xf32> to vector<1x1x128xf32>
    %8 = vector.broadcast %7 : vector<1x1x128xf32> to vector<16x16x128xf32>
    %9 = arith.addf %5, %8 : vector<16x16x128xf32>
    %c0_7 = arith.constant 0 : index
    %c0_8 = arith.constant 0 : index
    %c0_9 = arith.constant 0 : index
    %c0_10 = arith.constant 0 : index
    %10 = vector.load %arg2[%c0_7, %c0_8, %c0_9, %c0_10] : memref<1x16x16x128xf32, #tpu.memory_space<vmem>>, vector<1x16x16x128xf32>
    %11 = vector.shape_cast %10 : vector<1x16x16x128xf32> to vector<16x16x128xf32>
    %12 = arith.addf %9, %11 : vector<16x16x128xf32>
    %cst = arith.constant 0.000000e+00 : f32
    %13 = vector.broadcast %cst : f32 to vector<16x16x128xf32>
    %14 = arith.maximumf %12, %13 : vector<16x16x128xf32>
    %c0_11 = arith.constant 0 : index
    %c0_12 = arith.constant 0 : index
    %c0_13 = arith.constant 0 : index
    %c0_14 = arith.constant 0 : index
    %15 = vector.load %arg5[%c0_11, %c0_12, %c0_13, %c0_14] : memref<1x16x16x128xf32, #tpu.memory_space<vmem>>, vector<1x16x16x128xf32>
    %16 = vector.shape_cast %15 : vector<1x16x16x128xf32> to vector<16x16x128xf32>
    %17 = vector.shape_cast %14 : vector<16x16x128xf32> to vector<1x16x16x128xf32>
    tpu.vector_store %arg5[%c0_11, %c0_12, %c0_13, %c0_14], %17 {strides = array<i32>} : memref<1x16x16x128xf32, #tpu.memory_space<vmem>>, vector<1x16x16x128xf32>,
    return
  }
  func.func @transform_0(%arg0: i32) -> (i32, i32, i32, i32) {
    %c0_i32 = arith.constant 0 : i32
    %c0_i32_0 = arith.constant 0 : i32
    %c0_i32_1 = arith.constant 0 : i32
    %c0_i32_2 = arith.constant 0 : i32
    return %arg0, %c0_i32, %c0_i32_0, %c0_i32_1 : i32, i32, i32, i32
  }
  func.func @transform_1(%arg0: i32) -> (i32, i32, i32, i32) {
    %c0_i32 = arith.constant 0 : i32
    %c0_i32_0 = arith.constant 0 : i32
    %c0_i32_1 = arith.constant 0 : i32
    %c0_i32_2 = arith.constant 0 : i32
    return %arg0, %c0_i32, %c0_i32_0, %c0_i32_1 : i32, i32, i32, i32
  }
  func.func @transform_2(%arg0: i32) -> (i32, i32) {
    %c0_i32 = arith.constant 0 : i32
    %c0_i32_0 = arith.constant 0 : i32
    %c0_i32_1 = arith.constant 0 : i32
    return %c0_i32, %c0_i32_0 : i32, i32
  }
  func.func @transform_3(%arg0: i32) -> (i32, i32) {
    %c0_i32 = arith.constant 0 : i32
    %c0_i32_0 = arith.constant 0 : i32
    %c0_i32_1 = arith.constant 0 : i32
    return %c0_i32, %c0_i32_0 : i32, i32
  }
  func.func @transform_4(%arg0: i32) -> (i32, i32, i32, i32) {
    %c0_i32 = arith.constant 0 : i32
    %c0_i32_0 = arith.constant 0 : i32
    %c0_i32_1 = arith.constant 0 : i32
    %c0_i32_2 = arith.constant 0 : i32
    return %arg0, %c0_i32, %c0_i32_0, %c0_i32_1 : i32, i32, i32, i32
  }
}

module attributes {stable_mosaic.version = 11 : i64} {
  func.func @bn_relu_conv2_stats_kernel(%arg0: i32, %arg1: memref<1x16x16x128xf32, #tpu.memory_space<vmem>>, %arg2: memref<3x384x128xbf16, #tpu.memory_space<vmem>>, %arg3: memref<1x128xf32, #tpu.memory_space<vmem>>, %arg4: memref<1x128xf32, #tpu.memory_space<vmem>>, %arg5: memref<1x16x16x128xf32, #tpu.memory_space<vmem>>, %arg6: memref<1x2x128xf32, #tpu.memory_space<vmem>>) attributes {dimension_semantics = [#tpu.dimension_semantics<parallel>], iteration_bounds = array<i64: 2>, scalar_prefetch = 0 : i64, scratch_operands = 0 : i64, tpu.core_type = #tpu.core_type<tc>, window_params = [{transform_indices = @transform_0, window_bounds = array<i64: 1, 16, 16, 128>}, {pipeline_mode = #tpu.pipeline_mode<synchronous>, transform_indices = @transform_1, window_bounds = array<i64: 3, 384, 128>}, {pipeline_mode = #tpu.pipeline_mode<synchronous>, transform_indices = @transform_2, window_bounds = array<i64: 1, 128>}, {pipeline_mode = #tpu.pipeline_mode<synchronous>, transform_indices = @transform_3, window_bounds = array<i64: 1, 128>}, {transform_indices = @transform_4, window_bounds = array<i64: 1, 16, 16, 128>}, {transform_indices = @transform_5, window_bounds = array<i64: 1, 2, 128>}]} {
    %c0 = arith.constant 0 : index
    %c0_0 = arith.constant 0 : index
    %c0_1 = arith.constant 0 : index
    %c0_2 = arith.constant 0 : index
    %0 = vector.load %arg1[%c0, %c0_0, %c0_1, %c0_2] : memref<1x16x16x128xf32, #tpu.memory_space<vmem>>, vector<1x16x16x128xf32>
    %1 = vector.shape_cast %0 : vector<1x16x16x128xf32> to vector<16x16x128xf32>
    %c0_3 = arith.constant 0 : index
    %c0_4 = arith.constant 0 : index
    %2 = vector.load %arg3[%c0_3, %c0_4] : memref<1x128xf32, #tpu.memory_space<vmem>>, vector<1x128xf32>
    %3 = vector.shape_cast %2 : vector<1x128xf32> to vector<1x1x128xf32>
    %4 = vector.broadcast %3 : vector<1x1x128xf32> to vector<16x16x128xf32>
    %5 = arith.mulf %1, %4 : vector<16x16x128xf32>
    %c0_5 = arith.constant 0 : index
    %c0_6 = arith.constant 0 : index
    %6 = vector.load %arg4[%c0_5, %c0_6] : memref<1x128xf32, #tpu.memory_space<vmem>>, vector<1x128xf32>
    %7 = vector.shape_cast %6 : vector<1x128xf32> to vector<1x1x128xf32>
    %8 = vector.broadcast %7 : vector<1x1x128xf32> to vector<16x16x128xf32>
    %9 = arith.addf %5, %8 : vector<16x16x128xf32>
    %cst = arith.constant 0.000000e+00 : f32
    %10 = vector.broadcast %cst : f32 to vector<16x16x128xf32>
    %11 = arith.maximumf %9, %10 : vector<16x16x128xf32>
    %cst_7 = arith.constant 0.000000e+00 : f32
    %12 = vector.broadcast %cst_7 : f32 to vector<1x16x128xf32>
    %cst_8 = arith.constant 0.000000e+00 : f32
    %13 = vector.broadcast %cst_8 : f32 to vector<16x1x128xf32>
    %cst_9 = arith.constant 0.000000e+00 : f32
    %14 = vector.broadcast %cst_9 : f32 to vector<256x128xf32>
    %15 = vector.extract_strided_slice %11 {offsets = [0, 0, 0], sizes = [15, 16, 128], strides = [1, 1, 1]} : vector<16x16x128xf32> to vector<15x16x128xf32>
    %16 = tpu.concatenate %12, %15 in 0 : vector<1x16x128xf32>, vector<15x16x128xf32> -> vector<16x16x128xf32>
    %17 = vector.extract_strided_slice %16 {offsets = [0, 0, 0], sizes = [16, 15, 128], strides = [1, 1, 1]} : vector<16x16x128xf32> to vector<16x15x128xf32>
    %18 = tpu.concatenate %13, %17 in 1 : vector<16x1x128xf32>, vector<16x15x128xf32> -> vector<16x16x128xf32>
    %19 = vector.extract_strided_slice %16 {offsets = [0, 1, 0], sizes = [16, 15, 128], strides = [1, 1, 1]} : vector<16x16x128xf32> to vector<16x15x128xf32>
    %20 = tpu.concatenate %19, %13 in 1 : vector<16x15x128xf32>, vector<16x1x128xf32> -> vector<16x16x128xf32>
    %21 = tpu.concatenate %18, %16, %20 in 2 : vector<16x16x128xf32>, vector<16x16x128xf32>, vector<16x16x128xf32> -> vector<16x16x384xf32>
    %22 = vector.shape_cast %21 : vector<16x16x384xf32> to vector<256x384xf32>
    %23 = arith.truncf %22 : vector<256x384xf32> to vector<256x384xbf16>
    %c0_10 = arith.constant 0 : index
    %c0_11 = arith.constant 0 : index
    %c0_12 = arith.constant 0 : index
    %24 = vector.load %arg2[%c0_10, %c0_11, %c0_12] : memref<3x384x128xbf16, #tpu.memory_space<vmem>>, vector<1x384x128xbf16>
    %25 = vector.shape_cast %24 : vector<1x384x128xbf16> to vector<384x128xbf16>
    %cst_13 = arith.constant dense<0.000000e+00> : vector<256x128xf32>
    %26 = tpu.matmul %23, %25, %cst_13 {dimension_numbers = #tpu.dot_dimension_numbers<[1], [0], [0], [1], [0, 0, 1, 1], [], []>} : vector<256x384xbf16>, vector<384x128xbf16>, vector<256x128xf32> -> vector<256x128xf32>
    %27 = arith.addf %14, %26 : vector<256x128xf32>
    %28 = vector.extract_strided_slice %11 {offsets = [0, 0, 0], sizes = [16, 15, 128], strides = [1, 1, 1]} : vector<16x16x128xf32> to vector<16x15x128xf32>
    %29 = tpu.concatenate %13, %28 in 1 : vector<16x1x128xf32>, vector<16x15x128xf32> -> vector<16x16x128xf32>
    %30 = vector.extract_strided_slice %11 {offsets = [0, 1, 0], sizes = [16, 15, 128], strides = [1, 1, 1]} : vector<16x16x128xf32> to vector<16x15x128xf32>
    %31 = tpu.concatenate %30, %13 in 1 : vector<16x15x128xf32>, vector<16x1x128xf32> -> vector<16x16x128xf32>
    %32 = tpu.concatenate %29, %11, %31 in 2 : vector<16x16x128xf32>, vector<16x16x128xf32>, vector<16x16x128xf32> -> vector<16x16x384xf32>
    %33 = vector.shape_cast %32 : vector<16x16x384xf32> to vector<256x384xf32>
    %34 = arith.truncf %33 : vector<256x384xf32> to vector<256x384xbf16>
    %c1 = arith.constant 1 : index
    %c0_14 = arith.constant 0 : index
    %c0_15 = arith.constant 0 : index
    %35 = vector.load %arg2[%c1, %c0_14, %c0_15] : memref<3x384x128xbf16, #tpu.memory_space<vmem>>, vector<1x384x128xbf16>
    %36 = vector.shape_cast %35 : vector<1x384x128xbf16> to vector<384x128xbf16>
    %cst_16 = arith.constant dense<0.000000e+00> : vector<256x128xf32>
    %37 = tpu.matmul %34, %36, %cst_16 {dimension_numbers = #tpu.dot_dimension_numbers<[1], [0], [0], [1], [0, 0, 1, 1], [], []>} : vector<256x384xbf16>, vector<384x128xbf16>, vector<256x128xf32> -> vector<256x128xf32>
    %38 = arith.addf %27, %37 : vector<256x128xf32>
    %39 = vector.extract_strided_slice %11 {offsets = [1, 0, 0], sizes = [15, 16, 128], strides = [1, 1, 1]} : vector<16x16x128xf32> to vector<15x16x128xf32>
    %40 = tpu.concatenate %39, %12 in 0 : vector<15x16x128xf32>, vector<1x16x128xf32> -> vector<16x16x128xf32>
    %41 = vector.extract_strided_slice %40 {offsets = [0, 0, 0], sizes = [16, 15, 128], strides = [1, 1, 1]} : vector<16x16x128xf32> to vector<16x15x128xf32>
    %42 = tpu.concatenate %13, %41 in 1 : vector<16x1x128xf32>, vector<16x15x128xf32> -> vector<16x16x128xf32>
    %43 = vector.extract_strided_slice %40 {offsets = [0, 1, 0], sizes = [16, 15, 128], strides = [1, 1, 1]} : vector<16x16x128xf32> to vector<16x15x128xf32>
    %44 = tpu.concatenate %43, %13 in 1 : vector<16x15x128xf32>, vector<16x1x128xf32> -> vector<16x16x128xf32>
    %45 = tpu.concatenate %42, %40, %44 in 2 : vector<16x16x128xf32>, vector<16x16x128xf32>, vector<16x16x128xf32> -> vector<16x16x384xf32>
    %46 = vector.shape_cast %45 : vector<16x16x384xf32> to vector<256x384xf32>
    %47 = arith.truncf %46 : vector<256x384xf32> to vector<256x384xbf16>
    %c2 = arith.constant 2 : index
    %c0_17 = arith.constant 0 : index
    %c0_18 = arith.constant 0 : index
    %48 = vector.load %arg2[%c2, %c0_17, %c0_18] : memref<3x384x128xbf16, #tpu.memory_space<vmem>>, vector<1x384x128xbf16>
    %49 = vector.shape_cast %48 : vector<1x384x128xbf16> to vector<384x128xbf16>
    %cst_19 = arith.constant dense<0.000000e+00> : vector<256x128xf32>
    %50 = tpu.matmul %47, %49, %cst_19 {dimension_numbers = #tpu.dot_dimension_numbers<[1], [0], [0], [1], [0, 0, 1, 1], [], []>} : vector<256x384xbf16>, vector<384x128xbf16>, vector<256x128xf32> -> vector<256x128xf32>
    %51 = arith.addf %38, %50 : vector<256x128xf32>
    %52 = vector.shape_cast %51 : vector<256x128xf32> to vector<16x16x128xf32>
    %c0_20 = arith.constant 0 : index
    %c0_21 = arith.constant 0 : index
    %c0_22 = arith.constant 0 : index
    %c0_23 = arith.constant 0 : index
    %53 = vector.load %arg5[%c0_20, %c0_21, %c0_22, %c0_23] : memref<1x16x16x128xf32, #tpu.memory_space<vmem>>, vector<1x16x16x128xf32>
    %54 = vector.shape_cast %53 : vector<1x16x16x128xf32> to vector<16x16x128xf32>
    %55 = vector.shape_cast %52 : vector<16x16x128xf32> to vector<1x16x16x128xf32>
    tpu.vector_store %arg5[%c0_20, %c0_21, %c0_22, %c0_23], %55 {strides = array<i32>} : memref<1x16x16x128xf32, #tpu.memory_space<vmem>>, vector<1x16x16x128xf32>,
    %cst_24 = arith.constant dense<0.000000e+00> : vector<128xf32>
    %56 = vector.multi_reduction <add>, %51, %cst_24 [0] : vector<256x128xf32> to vector<128xf32>
    %57 = vector.shape_cast %56 : vector<128xf32> to vector<1x128xf32>
    %58 = arith.mulf %51, %51 : vector<256x128xf32>
    %cst_25 = arith.constant dense<0.000000e+00> : vector<128xf32>
    %59 = vector.multi_reduction <add>, %58, %cst_25 [0] : vector<256x128xf32> to vector<128xf32>
    %60 = vector.shape_cast %59 : vector<128xf32> to vector<1x128xf32>
    %61 = tpu.concatenate %57, %60 in 0 : vector<1x128xf32>, vector<1x128xf32> -> vector<2x128xf32>
    %c0_26 = arith.constant 0 : index
    %c0_27 = arith.constant 0 : index
    %c0_28 = arith.constant 0 : index
    %62 = vector.load %arg6[%c0_26, %c0_27, %c0_28] : memref<1x2x128xf32, #tpu.memory_space<vmem>>, vector<1x2x128xf32>
    %63 = vector.shape_cast %62 : vector<1x2x128xf32> to vector<2x128xf32>
    %64 = vector.shape_cast %61 : vector<2x128xf32> to vector<1x2x128xf32>
    tpu.vector_store %arg6[%c0_26, %c0_27, %c0_28], %64 {strides = array<i32>} : memref<1x2x128xf32, #tpu.memory_space<vmem>>, vector<1x2x128xf32>,
    return
  }
  func.func @transform_0(%arg0: i32) -> (i32, i32, i32, i32) {
    %c0_i32 = arith.constant 0 : i32
    %c0_i32_0 = arith.constant 0 : i32
    %c0_i32_1 = arith.constant 0 : i32
    %c0_i32_2 = arith.constant 0 : i32
    return %arg0, %c0_i32, %c0_i32_0, %c0_i32_1 : i32, i32, i32, i32
  }
  func.func @transform_1(%arg0: i32) -> (i32, i32, i32) {
    %c0_i32 = arith.constant 0 : i32
    %c0_i32_0 = arith.constant 0 : i32
    %c0_i32_1 = arith.constant 0 : i32
    %c0_i32_2 = arith.constant 0 : i32
    return %c0_i32, %c0_i32_0, %c0_i32_1 : i32, i32, i32
  }
  func.func @transform_2(%arg0: i32) -> (i32, i32) {
    %c0_i32 = arith.constant 0 : i32
    %c0_i32_0 = arith.constant 0 : i32
    %c0_i32_1 = arith.constant 0 : i32
    return %c0_i32, %c0_i32_0 : i32, i32
  }
  func.func @transform_3(%arg0: i32) -> (i32, i32) {
    %c0_i32 = arith.constant 0 : i32
    %c0_i32_0 = arith.constant 0 : i32
    %c0_i32_1 = arith.constant 0 : i32
    return %c0_i32, %c0_i32_0 : i32, i32
  }
  func.func @transform_4(%arg0: i32) -> (i32, i32, i32, i32) {
    %c0_i32 = arith.constant 0 : i32
    %c0_i32_0 = arith.constant 0 : i32
    %c0_i32_1 = arith.constant 0 : i32
    %c0_i32_2 = arith.constant 0 : i32
    return %arg0, %c0_i32, %c0_i32_0, %c0_i32_1 : i32, i32, i32, i32
  }
  func.func @transform_5(%arg0: i32) -> (i32, i32, i32) {
    %c0_i32 = arith.constant 0 : i32
    %c0_i32_0 = arith.constant 0 : i32
    %c0_i32_1 = arith.constant 0 : i32
    return %arg0, %c0_i32, %c0_i32_0 : i32, i32, i32
  }
}

</mosaic_0001>

<bundles_post_ra>
// kernel: basic_block.5
= control target key start
LH: loop header
LB: loop body
LE: loop exit
PB: predicated region body
PF: predicated region fallthrough
CT: control target
= control target key end

     0   :  { %s576_s15 = smov 0   ;;  %s777_s0 = inlined_call_operand.vmem [shape: f32[2,16,16,128], index: 0, kind: input, shape index: {}]   ;;  %s778_s1 = inlined_call_operand.vmem [shape: f32[2,16,16,128], index: 1, kind: input, shape index: {}]   ;;  %s779_s2 = inlined_call_operand.vmem [shape: f32[1,128], index: 2, kind: input, shape index: {}]   ;;  %s780_s3 = inlined_call_operand.vmem [shape: f32[1,128], index: 3, kind: input, shape index: {}]   ;;  %s781_s4 = inlined_call_operand.vmem [shape: f32[2,16,16,128], index: 4, kind: output, shape index: {}]  }
   0x1 LB: > { %s517_s16 = sadd.s32 4294967295, %s549_s15   ;;  %p521_p0 = scmp.ge.s32.totalorder %s549_s15, 1  ;;  %s549_s15 = sphi %s576_s15, %s14_s15  }
   0x2   : > { %p172_p1 = scmp.lt.s32.totalorder %s549_s15, 3 }
   0x4   : > { %p173_p2 = pnand %p521_p0, %p172_p1 }
   0x5   : > { %p203_p3 = scmp.lt.s32.totalorder (!%p173_p2), %s517_s16, 1 }
   0x6   : > { %176 = sbr.rel (%p173_p2) target bundleno = 55 (0x37), region = 36 }
   0xb   : > { %s783_s16 = smov (!%p203_p3, %s517_s16), 1  ;;  %v587_v0 = vld [vmem:[%s779_s2] ss:$0 sm:$0xff] }
   0xc   : > { %s589_s19 = sshll.u32 %s783_s16, 8  ;;  %v606_v1 = vld [vmem:[%s780_s3] ss:$0 sm:$0xff] }
   0xd   : > { %s595_s22 = scalar_lea.vmem %s777_s0, %s589_s19  ;;  %s601_s25 = scalar_lea.vmem %s778_s1, %s589_s19 }
   0xe   : > { %v218_v2 = vld [vmem:[%s595_s22] sm:$0xff]  ;;  %v219_v3 = vld [vmem:[%s595_s22 + $0x8] sm:$0xff]  ;;  %v220_v7 = vld [vmem:[%s595_s22 + $0x10] sm:$0xff]  ;;  %s637_s30 = scalar_lea.vmem %s781_s4, %s589_s19 }
   0xf   : > { %v254_v4 = vmul.f32 %v587_v0, %v218_v2  ;;  %v322_v5 = vld [vmem:[%s601_s25] sm:$0xff]  ;;  %v255_v6 = vmul.f32 %v587_v0, %v219_v3  ;;  %v323_v8 = vld [vmem:[%s601_s25 + $0x8] sm:$0xff]  ;;  %v256_v9 = vmul.f32 %v587_v0, %v220_v7  ;;  %v221_v10 = vld [vmem:[%s595_s22 + $0x18] sm:$0xff] }
  0x10   : > { %v222_v11 = vld [vmem:[%s595_s22 + $0x20] sm:$0xff]  ;;  %v324_v14 = vld [vmem:[%s601_s25 + $0x10] sm:$0xff]  ;;  %v257_v15 = vmul.f32 %v587_v0, %v221_v10  ;;  %v325_v16 = vld [vmem:[%s601_s25 + $0x18] sm:$0xff] }
  0x11   : > { %v290_v12 = vadd.f32 %v606_v1, %v254_v4  ;;  %v291_v13 = vadd.f32 %v606_v1, %v255_v6  ;;  %v258_v17 = vmul.f32 %v587_v0, %v222_v11  ;;  %v223_v18 = vld [vmem:[%s595_s22 + $0x28] sm:$0xff]  ;;  %v292_v19 = vadd.f32 %v606_v1, %v256_v9  ;;  %v326_v20 = vld [vmem:[%s601_s25 + $0x20] sm:$0xff]  ;;  %v224_v22 = vld [vmem:[%s595_s22 + $0x30] sm:$0xff] }
  0x12   : > { %v259_v21 = vmul.f32 %v587_v0, %v223_v18  ;;  %v225_v23 = vld [vmem:[%s595_s22 + $0x38] sm:$0xff]  ;;  %v293_v26 = vadd.f32 %v606_v1, %v257_v15  ;;  %v327_v28 = vld [vmem:[%s601_s25 + $0x28] sm:$0xff]  ;;  %v260_v31 = vmul.f32 %v587_v0, %v224_v22  ;;  %v226_v33 = vld [vmem:[%s595_s22 + $0x40] sm:$0xff] }
  0x13   : > { %v354_v24 = vadd.f32 %v322_v5, %v290_v12  ;;  %v355_v25 = vadd.f32 %v323_v8, %v291_v13  ;;  %v294_v27 = vadd.f32 %v606_v1, %v258_v17  ;;  %v356_v29 = vadd.f32 %v324_v14, %v292_v19  ;;  %v227_v34 = vld [vmem:[%s595_s22 + $0x48] sm:$0xff]  ;;  %v328_v39 = vld [vmem:[%s601_s25 + $0x30] sm:$0xff]  ;;  %v329_v40 = vld [vmem:[%s601_s25 + $0x38] sm:$0xff] }
  0x14   : > { %v295_v30 = vadd.f32 %v606_v1, %v259_v21  ;;  %v261_v32 = vmul.f32 %v587_v0, %v225_v23  ;;  %v357_v37 = vadd.f32 %v325_v16, %v293_v26  ;;  %v228_v41 = vld [vmem:[%s595_s22 + $0x50] sm:$0xff]  ;;  %v296_v44 = vadd.f32 %v606_v1, %v260_v31  ;;  %v229_v46 = vld [vmem:[%s595_s22 + $0x58] sm:$0xff]  ;;  %v230_v47 = vld [vmem:[%s595_s22 + $0x60] sm:$0xff] }
  0x15   : > { %v386_v35 = vmax.f32 %v354_v24, 0.0  ;;  %v387_v36 = vmax.f32 %v355_v25, 0.0  ;;  %v358_v38 = vadd.f32 %v326_v20, %v294_v27  ;;  %v388_v42 = vmax.f32 %v356_v29, 0.0  ;;  %v231_v52 = vld [vmem:[%s595_s22 + $0x68] sm:$0xff]  ;;  %v330_v56 = vld [vmem:[%s601_s25 + $0x40] sm:$0xff]  ;;  %v332_v61 = vld [vmem:[%s601_s25 + $0x50] sm:$0xff] }
  0x16   : > { %v359_v43 = vadd.f32 %v327_v28, %v295_v30  ;;  %v297_v45 = vadd.f32 %v606_v1, %v261_v32  ;;  %v389_v48 = vmax.f32 %v357_v37, 0.0  ;;  %v262_v50 = vmul.f32 %v587_v0, %v226_v33  ;;  %v331_v57 = vld [vmem:[%s601_s25 + $0x48] sm:$0xff]  ;;  %v232_v2 = vld [vmem:[%s595_s22 + $0x70] sm:$0xff]  ;;  %v233_v3 = vld [vmem:[%s595_s22 + $0x78] sm:$0xff] }
  0x17   : > { %418 = vst [vmem:[%s637_s30] sm:$0xff] %v386_v35  ;;  %v390_v49 = vmax.f32 %v358_v38, 0.0  ;;  %v263_v51 = vmul.f32 %v587_v0, %v227_v34  ;;  %v360_v54 = vadd.f32 %v328_v39, %v296_v44  ;;  %v264_v58 = vmul.f32 %v587_v0, %v228_v41  ;;  %v333_v7 = vld [vmem:[%s601_s25 + $0x58] sm:$0xff]  ;;  %v334_v8 = vld [vmem:[%s601_s25 + $0x60] sm:$0xff]  ;;  %v335_v14 = vld [vmem:[%s601_s25 + $0x68] sm:$0xff] }
  0x18   : > { %419 = vst [vmem:[%s637_s30 + $0x8] sm:$0xff] %v387_v36  ;;  %v391_v53 = vmax.f32 %v359_v43, 0.0  ;;  %v361_v55 = vadd.f32 %v329_v40, %v297_v45  ;;  %v298_v59 = vadd.f32 %v606_v1, %v262_v50  ;;  %v265_v62 = vmul.f32 %v587_v0, %v229_v46  ;;  %v234_v19 = vld [vmem:[%s595_s22 + $0x80] sm:$0xff]  ;;  %v235_v20 = vld [vmem:[%s595_s22 + $0x88] sm:$0xff]  ;;  %v336_v25 = vld [vmem:[%s601_s25 + $0x70] sm:$0xff] }
  0x19   : > { %420 = vst [vmem:[%s637_s30 + $0x10] sm:$0xff] %v388_v42  ;;  %v299_v60 = vadd.f32 %v606_v1, %v263_v51  ;;  %v266_v63 = vmul.f32 %v587_v0, %v230_v47  ;;  %v392_v4 = vmax.f32 %v360_v54, 0.0  ;;  %v300_v6 = vadd.f32 %v606_v1, %v264_v58  ;;  %v337_v26 = vld [vmem:[%s601_s25 + $0x78] sm:$0xff]  ;;  %v236_v27 = vld [vmem:[%s595_s22 + $0x90] sm:$0xff]  ;;  %v238_v33 = vld [vmem:[%s595_s22 + $0xa0] sm:$0xff] }
  0x1a   : > { %421 = vst [vmem:[%s637_s30 + $0x18] sm:$0xff] %v389_v48  ;;  %v393_v5 = vmax.f32 %v361_v55, 0.0  ;;  %v267_v9 = vmul.f32 %v587_v0, %v231_v52  ;;  %v362_v10 = vadd.f32 %v330_v56, %v298_v59  ;;  %v301_v12 = vadd.f32 %v606_v1, %v265_v62  ;;  %v237_v32 = vld [vmem:[%s595_s22 + $0x98] sm:$0xff]  ;;  %v239_v38 = vld [vmem:[%s595_s22 + $0xa8] sm:$0xff]  ;;  %v338_v42 = vld [vmem:[%s601_s25 + $0x80] sm:$0xff] }
  0x1b   : > { %422 = vst [vmem:[%s637_s30 + $0x20] sm:$0xff] %v390_v49  ;;  %v363_v11 = vadd.f32 %v331_v57, %v299_v60  ;;  %v302_v13 = vadd.f32 %v606_v1, %v266_v63  ;;  %v364_v15 = vadd.f32 %v332_v61, %v300_v6  ;;  %v268_v17 = vmul.f32 %v587_v0, %v232_v2  ;;  %v339_v43 = vld [vmem:[%s601_s25 + $0x88] sm:$0xff]  ;;  %v340_v47 = vld [vmem:[%s601_s25 + $0x90] sm:$0xff]  ;;  %v241_v51 = vld [vmem:[%s595_s22 + $0xb8] sm:$0xff] }
  0x1c   : > { %423 = vst [vmem:[%s637_s30 + $0x28] sm:$0xff] %v391_v53  ;;  %v303_v16 = vadd.f32 %v606_v1, %v267_v9  ;;  %v269_v18 = vmul.f32 %v587_v0, %v233_v3  ;;  %v394_v21 = vmax.f32 %v362_v10, 0.0  ;;  %v365_v23 = vadd.f32 %v333_v7, %v301_v12  ;;  %v240_v50 = vld [vmem:[%s595_s22 + $0xb0] sm:$0xff]  ;;  %v341_v55 = vld [vmem:[%s601_s25 + $0x98] sm:$0xff]  ;;  %v342_v56 = vld [vmem:[%s601_s25 + $0xa0] sm:$0xff] }
  0x1d   : > { %424 = vst [vmem:[%s637_s30 + $0x30] sm:$0xff] %v392_v4  ;;  %v395_v22 = vmax.f32 %v363_v11, 0.0  ;;  %v366_v24 = vadd.f32 %v334_v8, %v302_v13  ;;  %v396_v28 = vmax.f32 %v364_v15, 0.0  ;;  %v304_v30 = vadd.f32 %v606_v1, %v268_v17  ;;  %v343_v62 = vld [vmem:[%s601_s25 + $0xa8] sm:$0xff]  ;;  %v344_v11 = vld [vmem:[%s601_s25 + $0xb0] sm:$0xff]  ;;  %v345_v12 = vld [vmem:[%s601_s25 + $0xb8] sm:$0xff] }
  0x1e   : > { %425 = vst [vmem:[%s637_s30 + $0x38] sm:$0xff] %v393_v5  ;;  %v367_v29 = vadd.f32 %v335_v14, %v303_v16  ;;  %v305_v31 = vadd.f32 %v606_v1, %v269_v18  ;;  %v397_v34 = vmax.f32 %v365_v23, 0.0  ;;  %v270_v36 = vmul.f32 %v587_v0, %v234_v19  ;;  %v242_v5 = vld [vmem:[%s595_s22 + $0xc0] sm:$0xff]  ;;  %v243_v6 = vld [vmem:[%s595_s22 + $0xc8] sm:$0xff]  ;;  %v244_v13 = vld [vmem:[%s595_s22 + $0xd0] sm:$0xff] }
  0x1f   : > { %426 = vst [vmem:[%s637_s30 + $0x40] sm:$0xff] %v394_v21  ;;  %v398_v35 = vmax.f32 %v366_v24, 0.0  ;;  %v271_v37 = vmul.f32 %v587_v0, %v235_v20  ;;  %v368_v40 = vadd.f32 %v336_v25, %v304_v30  ;;  %v272_v44 = vmul.f32 %v587_v0, %v236_v27  ;;  %v245_v18 = vld [vmem:[%s595_s22 + $0xd8] sm:$0xff]  ;;  %v246_v19 = vld [vmem:[%s595_s22 + $0xe0] sm:$0xff]  ;;  %v247_v24 = vld [vmem:[%s595_s22 + $0xe8] sm:$0xff] }
  0x20   : > { %427 = vst [vmem:[%s637_s30 + $0x48] sm:$0xff] %v395_v22  ;;  %v399_v39 = vmax.f32 %v367_v29, 0.0  ;;  %v369_v41 = vadd.f32 %v337_v26, %v305_v31  ;;  %v306_v45 = vadd.f32 %v606_v1, %v270_v36  ;;  %v273_v48 = vmul.f32 %v587_v0, %v237_v32  ;;  %v347_v29 = vld [vmem:[%s601_s25 + $0xc8] sm:$0xff]  ;;  %v248_v36 = vld [vmem:[%s595_s22 + $0xf0] sm:$0xff] }
  0x21   : > { %428 = vst [vmem:[%s637_s30 + $0x50] sm:$0xff] %v396_v28  ;;  %v307_v46 = vadd.f32 %v606_v1, %v271_v37  ;;  %v274_v49 = vmul.f32 %v587_v0, %v238_v33  ;;  %v400_v52 = vmax.f32 %v368_v40, 0.0  ;;  %v308_v54 = vadd.f32 %v606_v1, %v272_v44  ;;  %v346_v28 = vld [vmem:[%s601_s25 + $0xc0] sm:$0xff]  ;;  %v348_v33 = vld [vmem:[%s601_s25 + $0xd0] sm:$0xff]  ;;  %v249_v37 = vld [vmem:[%s595_s22 + $0xf8] sm:$0xff] }
  0x22   : > { %429 = vst [vmem:[%s637_s30 + $0x58] sm:$0xff] %v397_v34  ;;  %v401_v53 = vmax.f32 %v369_v41, 0.0  ;;  %v275_v57 = vmul.f32 %v587_v0, %v239_v38  ;;  %v370_v58 = vadd.f32 %v338_v42, %v306_v45  ;;  %v309_v60 = vadd.f32 %v606_v1, %v273_v48  ;;  %v349_v41 = vld [vmem:[%s601_s25 + $0xd8] sm:$0xff]  ;;  %v350_v42 = vld [vmem:[%s601_s25 + $0xe0] sm:$0xff]  ;;  %v351_v48 = vld [vmem:[%s601_s25 + $0xe8] sm:$0xff] }
  0x23   : > { %430 = vst [vmem:[%s637_s30 + $0x60] sm:$0xff] %v398_v35  ;;  %v371_v59 = vadd.f32 %v339_v43, %v307_v46  ;;  %v310_v61 = vadd.f32 %v606_v1, %v274_v49  ;;  %v372_v63 = vadd.f32 %v340_v47, %v308_v54  ;;  %v276_v3 = vmul.f32 %v587_v0, %v240_v50 }
  0x24   : > { %431 = vst [vmem:[%s637_s30 + $0x68] sm:$0xff] %v399_v39  ;;  %v311_v2 = vadd.f32 %v606_v1, %v275_v57  ;;  %v277_v4 = vmul.f32 %v587_v0, %v241_v51  ;;  %v402_v7 = vmax.f32 %v370_v58, 0.0  ;;  %v373_v9 = vadd.f32 %v341_v55, %v309_v60  ;;  %v352_v57 = vld [vmem:[%s601_s25 + $0xf0] sm:$0xff]  ;;  %v353_v58 = vld [vmem:[%s601_s25 + $0xf8] sm:$0xff] }
  0x25   : > { %432 = vst [vmem:[%s637_s30 + $0x70] sm:$0xff] %v400_v52  ;;  %v403_v8 = vmax.f32 %v371_v59, 0.0  ;;  %v374_v10 = vadd.f32 %v342_v56, %v310_v61  ;;  %v404_v14 = vmax.f32 %v372_v63, 0.0  ;;  %v312_v16 = vadd.f32 %v606_v1, %v276_v3 }
  0x26   : > { %433 = vst [vmem:[%s637_s30 + $0x78] sm:$0xff] %v401_v53  ;;  %v375_v15 = vadd.f32 %v343_v62, %v311_v2  ;;  %v313_v17 = vadd.f32 %v606_v1, %v277_v4  ;;  %v405_v20 = vmax.f32 %v373_v9, 0.0  ;;  %v278_v22 = vmul.f32 %v587_v0, %v242_v5 }
  0x27   : > { %434 = vst [vmem:[%s637_s30 + $0x80] sm:$0xff] %v402_v7  ;;  %v406_v21 = vmax.f32 %v374_v10, 0.0  ;;  %v279_v23 = vmul.f32 %v587_v0, %v243_v6  ;;  %v376_v26 = vadd.f32 %v344_v11, %v312_v16  ;;  %v280_v30 = vmul.f32 %v587_v0, %v244_v13 }
  0x28   : > { %435 = vst [vmem:[%s637_s30 + $0x88] sm:$0xff] %v403_v8  ;;  %v407_v25 = vmax.f32 %v375_v15, 0.0  ;;  %v377_v27 = vadd.f32 %v345_v12, %v313_v17  ;;  %v314_v31 = vadd.f32 %v606_v1, %v278_v22  ;;  %v281_v34 = vmul.f32 %v587_v0, %v245_v18 }
  0x29   : > { %436 = vst [vmem:[%s637_s30 + $0x90] sm:$0xff] %v404_v14  ;;  %v315_v32 = vadd.f32 %v606_v1, %v279_v23  ;;  %v282_v35 = vmul.f32 %v587_v0, %v246_v19  ;;  %v408_v38 = vmax.f32 %v376_v26, 0.0  ;;  %v316_v40 = vadd.f32 %v606_v1, %v280_v30 }
  0x2a   : > { %437 = vst [vmem:[%s637_s30 + $0x98] sm:$0xff] %v405_v20  ;;  %v409_v39 = vmax.f32 %v377_v27, 0.0  ;;  %v283_v43 = vmul.f32 %v587_v0, %v247_v24  ;;  %v378_v44 = vadd.f32 %v346_v28, %v314_v31  ;;  %v317_v46 = vadd.f32 %v606_v1, %v281_v34 }
  0x2b   : > { %438 = vst [vmem:[%s637_s30 + $0xa0] sm:$0xff] %v406_v21  ;;  %v379_v45 = vadd.f32 %v347_v29, %v315_v32  ;;  %v318_v47 = vadd.f32 %v606_v1, %v282_v35  ;;  %v380_v49 = vadd.f32 %v348_v33, %v316_v40  ;;  %v284_v51 = vmul.f32 %v587_v0, %v248_v36 }
  0x2c   : > { %439 = vst [vmem:[%s637_s30 + $0xa8] sm:$0xff] %v407_v25  ;;  %v319_v50 = vadd.f32 %v606_v1, %v283_v43  ;;  %v285_v52 = vmul.f32 %v587_v0, %v249_v37  ;;  %v410_v53 = vmax.f32 %v378_v44, 0.0  ;;  %v381_v55 = vadd.f32 %v349_v41, %v317_v46 }
  0x2d   : > { %440 = vst [vmem:[%s637_s30 + $0xb0] sm:$0xff] %v408_v38  ;;  %v411_v54 = vmax.f32 %v379_v45, 0.0  ;;  %v382_v56 = vadd.f32 %v350_v42, %v318_v47  ;;  %v412_v59 = vmax.f32 %v380_v49, 0.0  ;;  %v320_v61 = vadd.f32 %v606_v1, %v284_v51 }
  0x2e   : > { %441 = vst [vmem:[%s637_s30 + $0xb8] sm:$0xff] %v409_v39  ;;  %v383_v60 = vadd.f32 %v351_v48, %v319_v50  ;;  %v321_v0 = vadd.f32 %v606_v1, %v285_v52  ;;  %v413_v62 = vmax.f32 %v381_v55, 0.0 }
  0x2f   : > { %442 = vst [vmem:[%s637_s30 + $0xc0] sm:$0xff] %v410_v53  ;;  %v414_v63 = vmax.f32 %v382_v56, 0.0  ;;  %v384_v3 = vadd.f32 %v352_v57, %v320_v61 }
  0x30   : > { %443 = vst [vmem:[%s637_s30 + $0xc8] sm:$0xff] %v411_v54  ;;  %v415_v2 = vmax.f32 %v383_v60, 0.0  ;;  %v385_v4 = vadd.f32 %v353_v58, %v321_v0 }
  0x31   : > { %444 = vst [vmem:[%s637_s30 + $0xd0] sm:$0xff] %v412_v59  ;;  %v416_v5 = vmax.f32 %v384_v3, 0.0 }
  0x32   : > { %445 = vst [vmem:[%s637_s30 + $0xd8] sm:$0xff] %v413_v62  ;;  %v417_v6 = vmax.f32 %v385_v4, 0.0 }
  0x33   : > { %446 = vst [vmem:[%s637_s30 + $0xe0] sm:$0xff] %v414_v63 }
  0x34   : > { %447 = vst [vmem:[%s637_s30 + $0xe8] sm:$0xff] %v415_v2 }
  0x35   : > { %448 = vst [vmem:[%s637_s30 + $0xf0] sm:$0xff] %v416_v5 }
  0x36   : > { %449 = vst [vmem:[%s637_s30 + $0xf8] sm:$0xff] %v417_v6 }
  0x37 PF: > { %s14_s15 = sadd.s32 1, %s549_s15  }
  0x38   : > { %p11_p4 = scmp.ge.s32.totalorder %s14_s15, 4  }
  0x3a   :  { %13 = sbr.rel (!%p11_p4) target bundleno = 1 (0x1), region = 69 }

// kernel: basic_block.3
= control target key start
LH: loop header
LB: loop body
LE: loop exit
PB: predicated region body
PF: predicated region fallthrough
CT: control target
= control target key end

     0   :  { %s3011_s12 = smov 0   ;;  %s4158_s0 = inlined_call_operand.vmem [shape: f32[2,16,16,128], index: 0, kind: input, shape index: {}]   ;;  %s4159_s1 = inlined_call_operand.vmem [shape: bf16[3,384,128], index: 1, kind: input, shape index: {}]   ;;  %s4160_s2 = inlined_call_operand.vmem [shape: f32[2,16,16,128], index: 2, kind: output, shape index: {0}]   ;;  %s4161_s3 = inlined_call_operand.vmem [shape: f32[2,2,128], index: 3, kind: output, shape index: {1}]  }
   0x1 LB: > { %s2139_s13 = sadd.s32 4294967295, %s2986_s12   ;;  %p2143_p0 = scmp.ge.s32.totalorder %s2986_s12, 1  ;;  %s2986_s12 = sphi %s3011_s12, %s14_s12  }
   0x2   : > { %p140_p1 = scmp.lt.s32.totalorder %s2986_s12, 3 }
   0x4   : > { %p141_p2 = pnand %p2143_p0, %p140_p1 }
   0x6   : > { %144 = sbr.rel (%p141_p2) target bundleno = 768 (0x300), region = 28 }
   0xb   : > { %v2904_v0 = vld [vmem:[%s4159_s1 + $0xf8] sm:$0xff]  ;;  %v2903_v1 = vld [vmem:[%s4159_s1 + $0xf0] sm:$0xff]  ;;  %p168_p3 = scmp.lt.s32.totalorder %s2139_s13, 1  ;;  %v2902_v2 = vld [vmem:[%s4159_s1 + $0xe8] sm:$0xff]  ;;  %vm245_vm0 = vcmask 1040384   ;;  %vm2988_vm2 = vmmov 1  }
   0xc   : > { %743 = vmatpush.bf16.msra.mxu0 %v2904_v0  ;;  %2945 = vmatpush.bf16.msra.mxu1 %v2904_v0  ;;  %v2901_v3 = vld [vmem:[%s4159_s1 + $0xe0] sm:$0xff]  ;;  %v2900_v4 = vld [vmem:[%s4159_s1 + $0xd8] sm:$0xff]  ;;  %v2899_v5 = vld [vmem:[%s4159_s1 + $0xd0] sm:$0xff]  ;;  %vm341_vm4 = vcmask 1046528  }
   0xd   : > { %2946 = vmatpush.bf16.msra.mxu2 %v2904_v0  ;;  %2947 = vmatpush.bf16.msra.mxu3 %v2904_v0  ;;  %s4289_s13 = smov (!%p168_p3, %s2139_s13), 1  ;;  %v2898_v14 = vld [vmem:[%s4159_s1 + $0xc8] sm:$0xff]  ;;  %v2897_v23 = vld [vmem:[%s4159_s1 + $0xc0] sm:$0xff]  ;;  %vm2293_vm1 = vmneg %vm245_vm0 }
   0xe   : > { %s2871_s22 = sshll.u32 %s4289_s13, 8  ;;  %v2920_v28 = vld [vmem:[%s4159_s1 + $0x178] sm:$0xff]  ;;  %vm3101_vm3 = vmpackc.low %vm2988_vm2, %vm2293_vm1  ;;  %v2919_v37 = vld [vmem:[%s4159_s1 + $0x170] sm:$0xff] }
   0xf   : > { %s3042_s27 = scalar_lea.vmem %s4158_s0, %s2871_s22  ;;  %v2880_v29 = vld [vmem:[%s4159_s1 + $0x38] sm:$0xff]  ;;  %v2879_v38 = vld [vmem:[%s4159_s1 + $0x30] sm:$0xff]  ;;  %v2918_v49 = vld [vmem:[%s4159_s1 + $0x168] sm:$0xff]  ;;  %s4015_s21 = scalar_lea.vmem %s4160_s2, %s2871_s22 }
  0x10   : > { %744 = vmatpush.bf16.msra.mxu0 %v2903_v1  ;;  %2948 = vmatpush.bf16.msra.mxu1 %v2903_v1  ;;  %v3048_v6 = vld [vmem:[%s3042_s27] sm:$0xff]  ;;  %v3051_v7 = vld [vmem:[%s3042_s27 + $0x8] sm:$0xff]  ;;  %v2912_v35 = vld [vmem:[%s4159_s1 + $0x138] sm:$0xff]  ;;  %s2148_s22 = sshll.u32 %s4289_s13, 1 }
  0x11   : > { %2949 = vmatpush.bf16.msra.mxu2 %v2903_v1  ;;  %2950 = vmatpush.bf16.msra.mxu3 %v2903_v1  ;;  %v3054_v8 = vld [vmem:[%s3042_s27 + $0x40] sm:$0xff]  ;;  %v3057_v9 = vld [vmem:[%s3042_s27 + $0x48] sm:$0xff]  ;;  %v248_v15 = vrot.slane %v3048_v6, 7  ;;  %v249_v16 = vrot.slane %v3051_v7, 7  ;;  %v2888_v36 = vld [vmem:[%s4159_s1 + $0x78] sm:$0xff]  ;;  %s181_s25 = scalar_lea.vmem %s4161_s3, %s2148_s22 }
  0x12   : > { %v3060_v10 = vld [vmem:[%s3042_s27 + $0x80] sm:$0xff]  ;;  %v3063_v11 = vld [vmem:[%s3042_s27 + $0x88] sm:$0xff]  ;;  %v260_v17 = vrot.slane %v3054_v8, 7  ;;  %v261_v18 = vrot.slane %v3057_v9, 7  ;;  %v3128_v39 = vld [vmem:[%s3042_s27 + $0x10] sm:$0xff] }
  0x13   : > { %v3066_v12 = vld [vmem:[%s3042_s27 + $0xc0] sm:$0xff]  ;;  %v3069_v13 = vld [vmem:[%s3042_s27 + $0xc8] sm:$0xff]  ;;  %v272_v19 = vrot.slane %v3060_v10, 7  ;;  %v273_v20 = vrot.slane %v3063_v11, 7  ;;  %v250_v24 = vsel %vm245_vm0, %v248_v15, %v249_v16  ;;  %v3131_v40 = vld [vmem:[%s3042_s27 + $0x18] sm:$0xff]  ;;  %v251_v51 = vrot.slane %v3128_v39, 7 }
  0x14   : > { %745 = vmatpush.bf16.msra.mxu0 %v2902_v2  ;;  %2951 = vmatpush.bf16.msra.mxu1 %v2902_v2  ;;  %v284_v21 = vrot.slane %v3066_v12, 7  ;;  %v285_v22 = vrot.slane %v3069_v13, 7  ;;  %v262_v25 = vsel %vm245_vm0, %v260_v17, %v261_v18  ;;  %v3096_v30 = vpack.c.bf16 %v250_v24, %v248_v15  ;;  %v3134_v41 = vld [vmem:[%s3042_s27 + $0x50] sm:$0xff]  ;;  %v3143_v42 = vld [vmem:[%s3042_s27 + $0x58] sm:$0xff]  ;;  %v2878_v50 = vld [vmem:[%s4159_s1 + $0x28] sm:$0xff] }
  0x15   : > { %2952 = vmatpush.bf16.msra.mxu2 %v2902_v2  ;;  %2953 = vmatpush.bf16.msra.mxu3 %v2902_v2  ;;  %v274_v26 = vsel %vm245_vm0, %v272_v19, %v273_v20  ;;  %v3098_v31 = vpack.c.bf16 %v262_v25, %v260_v17  ;;  %v3146_v43 = vld [vmem:[%s3042_s27 + $0x90] sm:$0xff]  ;;  %v3149_v44 = vld [vmem:[%s3042_s27 + $0x98] sm:$0xff]  ;;  %v252_v52 = vrot.slane %v3131_v40, 7  ;;  %v263_v53 = vrot.slane %v3134_v41, 7  ;;  %v2910_v59 = vld [vmem:[%s4159_s1 + $0x128] sm:$0xff] }
  0x16   : > { %v286_v27 = vsel %vm245_vm0, %v284_v21, %v285_v22  ;;  %v3105_v33 = vpack.c.bf16 %v274_v26, %v272_v19  ;;  %v3152_v45 = vld [vmem:[%s3042_s27 + $0xd0] sm:$0xff]  ;;  %v3161_v48 = vld [vmem:[%s3042_s27 + $0xd8] sm:$0xff]  ;;  %v264_v54 = vrot.slane %v3143_v42, 7  ;;  %v275_v55 = vrot.slane %v3146_v43, 7  ;;  %v2886_v60 = vld [vmem:[%s4159_s1 + $0x68] sm:$0xff] }
  0x17   : > { %4190 = vst [vmem:[#allocation2_spill] sm:$0xff] %v3098_v31  ;;  %v3107_v34 = vpack.c.bf16 %v286_v27, %v284_v21  ;;  %v2911_v46 = vld [vmem:[%s4159_s1 + $0x130] sm:$0xff]  ;;  %v276_v56 = vrot.slane %v3149_v44, 7  ;;  %v287_v57 = vrot.slane %v3152_v45, 7  ;;  %v288_v58 = vrot.slane %v3161_v48, 7  ;;  %v2917_v61 = vld [vmem:[%s4159_s1 + $0x160] sm:$0xff]  ;;  %vm3405_vm5 = vmpackc.low %vm341_vm4, %vm2988_vm2 }
  0x18   : > { %746 = vmatpush.bf16.msra.mxu0 %v2901_v3  ;;  %2954 = vmatpush.bf16.msra.mxu1 %v2901_v3  ;;  %v2887_v47 = vld [vmem:[%s4159_s1 + $0x70] sm:$0xff]  ;;  %v2877_v62 = vld [vmem:[%s4159_s1 + $0x20] sm:$0xff]  ;;  %v253_v63 = vsel %vm245_vm0, %v251_v51, %v252_v52  ;;  %v265_v0 = vsel %vm245_vm0, %v263_v53, %v264_v54  ;;  %v2908_v19 = vld [vmem:[%s4159_s1 + $0x118] sm:$0xff] }
  0x19   : > { %2955 = vmatpush.bf16.msra.mxu2 %v2901_v3  ;;  %2956 = vmatpush.bf16.msra.mxu3 %v2901_v3  ;;  %v277_v1 = vsel %vm245_vm0, %v275_v55, %v276_v56  ;;  %v289_v2 = vsel %vm245_vm0, %v287_v57, %v288_v58  ;;  %v2909_v3 = vld [vmem:[%s4159_s1 + $0x120] sm:$0xff]  ;;  %v3205_v15 = vpack.c.bf16 %v253_v63, %v251_v51  ;;  %v2884_v20 = vld [vmem:[%s4159_s1 + $0x58] sm:$0xff]  ;;  %v2915_v21 = vld [vmem:[%s4159_s1 + $0x150] sm:$0xff]  ;;  %v344_v63 = vrot.slane %v3048_v6, 1 }
  0x1a   : > { %v3207_v16 = vpack.c.bf16 %v265_v0, %v263_v53  ;;  %v3209_v17 = vpack.c.bf16 %v277_v1, %v275_v55  ;;  %v3211_v18 = vpack.c.bf16 %v289_v2, %v287_v57  ;;  %v2875_v22 = vld [vmem:[%s4159_s1 + $0x10] sm:$0xff]  ;;  %v3235_v24 = vld [vmem:[%s3042_s27 + $0x28] sm:$0xff]  ;;  %v3238_v25 = vld [vmem:[%s3042_s27 + $0x60] sm:$0xff] }
  0x1b   : > { %v3247_v26 = vld [vmem:[%s3042_s27 + $0x68] sm:$0xff]  ;;  %v3250_v27 = vld [vmem:[%s3042_s27 + $0xa0] sm:$0xff]  ;;  %v266_v51 = vrot.slane %v3238_v25, 7 }
  0x1c   : > { %747 = vmatpush.bf16.msra.mxu0 %v2900_v4  ;;  %2957 = vmatpush.bf16.msra.mxu1 %v2900_v4  ;;  %4193 = vst [vmem:[#allocation3_spill] sm:$0xff] %v3207_v16  ;;  %v267_v52 = vrot.slane %v3247_v26, 7  ;;  %v278_v53 = vrot.slane %v3250_v27, 7  ;;  %v2906_v57 = vld [vmem:[%s4159_s1 + $0x108] sm:$0xff]  ;;  %v2905_v2 = vld [vmem:[%s4159_s1 + $0x100] sm:$0xff] }
  0x1d   : > { %2958 = vmatpush.bf16.msra.mxu2 %v2900_v4  ;;  %2959 = vmatpush.bf16.msra.mxu3 %v2900_v4  ;;  %v2885_v4 = vld [vmem:[%s4159_s1 + $0x60] sm:$0xff]  ;;  %v2882_v58 = vld [vmem:[%s4159_s1 + $0x48] sm:$0xff] }
  0x20   : > { %748 = vmatpush.bf16.msra.mxu0 %v2899_v5  ;;  %2960 = vmatpush.bf16.msra.mxu1 %v2899_v5 }
  0x21   : > { %2961 = vmatpush.bf16.msra.mxu2 %v2899_v5  ;;  %2962 = vmatpush.bf16.msra.mxu3 %v2899_v5  ;;  %v2916_v5 = vld [vmem:[%s4159_s1 + $0x158] sm:$0xff] }
  0x24   : > { %749 = vmatpush.bf16.msra.mxu0 %v2898_v14  ;;  %2963 = vmatpush.bf16.msra.mxu1 %v2898_v14 }
  0x25   : > { %2964 = vmatpush.bf16.msra.mxu2 %v2898_v14  ;;  %2965 = vmatpush.bf16.msra.mxu3 %v2898_v14  ;;  %v2876_v14 = vld [vmem:[%s4159_s1 + $0x18] sm:$0xff] }
  0x28   : > { %750 = vmatpush.bf16.msra.mxu0 %v2897_v23  ;;  %2966 = vmatpush.bf16.msra.mxu1 %v2897_v23 }
  0x29   : > { %2967 = vmatpush.bf16.msra.mxu2 %v2897_v23  ;;  %2968 = vmatpush.bf16.msra.mxu3 %v2897_v23  ;;  %v3232_v23 = vld [vmem:[%s3042_s27 + $0x20] sm:$0xff] }
  0x2b   : > { %2296 = vmatmul.msk.bf16.vlgmr.msra.gmra.mxu0 %vm3101_vm3, %v3096_v30  ;;  %2312 = vmatmul.msk.bf16.vlgmr.msra.gmra.mxu1 %vm3101_vm3, %v3098_v31 }
  0x2c   : > { %2328 = vmatmul.msk.bf16.vlgmr.msra.gmra.mxu2 %vm3101_vm3, %v3105_v33  ;;  %2344 = vmatmul.msk.bf16.vlgmr.msra.gmra.mxu3 %vm3101_vm3, %v3107_v34 }
  0x2d   : > { %921 = vmatpush.bf16.msrb.mxu2 %v2920_v28  ;;  %1154 = vmatpush.bf16.msrb.mxu3 %v2880_v29  ;;  %v3253_v28 = vld [vmem:[%s3042_s27 + $0xa8] sm:$0xff]  ;;  %v3257_v29 = vpack.c.bf16 %v3051_v7, %v3048_v6 }
  0x2e   : > { %832 = vmatpush.bf16.msrb.mxu1 %v2912_v35  ;;  %1243 = vmatpush.bf16.msrb.mxu0 %v2888_v36  ;;  %v3260_v35 = vld [vmem:[%s3042_s27 + $0xe0] sm:$0xff]  ;;  %v2907_v36 = vld [vmem:[%s4159_s1 + $0x110] sm:$0xff]  ;;  %v279_v54 = vrot.slane %v3253_v28, 7 }
  0x2f   : > { %v290_v55 = vrot.slane %v3260_v35, 7 }
  0x30   : > { %v280_v0 = vsel %vm245_vm0, %v278_v53, %v279_v54  ;;  %v3366_v54 = vld [vmem:[%s3042_s27 + $0xf8] sm:$0xff] }
  0x31   : > { %922 = vmatpush.bf16.msrb.mxu2 %v2919_v37  ;;  %1155 = vmatpush.bf16.msrb.mxu3 %v2879_v38  ;;  %v2883_v37 = vld [vmem:[%s4159_s1 + $0x50] sm:$0xff]  ;;  %v3269_v38 = vld [vmem:[%s3042_s27 + $0xe8] sm:$0xff] }
  0x32   : > { %833 = vmatpush.bf16.msrb.mxu1 %v2911_v46  ;;  %1244 = vmatpush.bf16.msrb.mxu0 %v2887_v47  ;;  %v2914_v46 = vld [vmem:[%s4159_s1 + $0x148] sm:$0xff]  ;;  %v291_v56 = vrot.slane %v3269_v38, 7 }
  0x33   : > { %v2874_v47 = vld [vmem:[%s4159_s1 + $0x8] sm:$0xff] }
  0x34   : > { %v292_v1 = vsel %vm245_vm0, %v290_v55, %v291_v56 }
  0x35   : > { %923 = vmatpush.bf16.msrb.mxu2 %v2918_v49  ;;  %1156 = vmatpush.bf16.msrb.mxu3 %v2878_v50  ;;  %v254_v49 = vrot.slane %v3232_v23, 7  ;;  %v255_v50 = vrot.slane %v3235_v24, 7 }
  0x36   : > { %834 = vmatpush.bf16.msrb.mxu1 %v2910_v59  ;;  %1245 = vmatpush.bf16.msrb.mxu0 %v2886_v60  ;;  %v2913_v59 = vld [vmem:[%s4159_s1 + $0x140] sm:$0xff] }
  0x37   : > { %v2873_v60 = vld [vmem:[%s4159_s1] sm:$0xff] }
  0x39   : > { %924 = vmatpush.bf16.msrb.mxu2 %v2917_v61  ;;  %1157 = vmatpush.bf16.msrb.mxu3 %v2877_v62  ;;  %v256_v61 = vsel %vm245_vm0, %v254_v49, %v255_v50  ;;  %v268_v62 = vsel %vm245_vm0, %v266_v51, %v267_v52  ;;  %v3354_v50 = vld [vmem:[%s3042_s27 + $0xb0] sm:$0xff]  ;;  %v3360_v52 = vld [vmem:[%s3042_s27 + $0xb8] sm:$0xff] }
  0x3a   : > { %835 = vmatpush.bf16.msrb.mxu1 %v2909_v3  ;;  %1246 = vmatpush.bf16.msrb.mxu0 %v2885_v4  ;;  %v2881_v3 = vld [vmem:[%s4159_s1 + $0x40] sm:$0xff]  ;;  %v3308_v6 = vpack.c.bf16 %v256_v61, %v254_v49  ;;  %v3310_v4 = vpack.c.bf16 %v268_v62, %v266_v51  ;;  %v3351_v49 = vld [vmem:[%s3042_s27 + $0x78] sm:$0xff]  ;;  %v536_v62 = vrot.slane %v3366_v54, 7 }
  0x3b   : > { %2300 = vmatmul.msk.bf16.gmra.mxu0 %vm3101_vm3, %v3205_v15  ;;  %2316 = vmatmul.msk.bf16.gmra.mxu1 %vm3101_vm3, %v3207_v16  ;;  %v2944_v51 = vld [vmem:[%s4159_s1 + $0x238] sm:$0xff] }
  0x3c   : > { %2332 = vmatmul.msk.bf16.gmra.mxu2 %vm3101_vm3, %v3209_v17  ;;  %2348 = vmatmul.msk.bf16.gmra.mxu3 %vm3101_vm3, %v3211_v18  ;;  %4194 = vst [vmem:[#allocation4_spill] sm:$0xff] %v3308_v6 }
  0x3d   : > { %925 = vmatpush.bf16.msrb.mxu2 %v2916_v5  ;;  %1158 = vmatpush.bf16.msrb.mxu3 %v2876_v14  ;;  %4195 = vst [vmem:[#allocation5_spill] sm:$0xff] %v3310_v4  ;;  %v345_v5 = vrot.slane %v3051_v7, 1  ;;  %v3313_v14 = vpack.c.bf16 %v280_v0, %v278_v53  ;;  %v3327_v7 = vld [vmem:[%s3042_s27 + $0x30] sm:$0xff] }
  0x3e   : > { %836 = vmatpush.bf16.msrb.mxu1 %v2908_v19  ;;  %1247 = vmatpush.bf16.msrb.mxu0 %v2884_v20  ;;  %v3315_v19 = vpack.c.bf16 %v292_v1, %v290_v55  ;;  %v3363_v53 = vld [vmem:[%s3042_s27 + $0xf0] sm:$0xff]  ;;  %v257_v55 = vrot.slane %v3327_v7, 7 }
  0x3f   : > { %v346_v20 = vsel %vm341_vm4, %v344_v63, %v345_v5  ;;  %v535_v61 = vrot.slane %v3363_v53, 7 }
  0x41   : > { %926 = vmatpush.bf16.msrb.mxu2 %v2915_v21  ;;  %1159 = vmatpush.bf16.msrb.mxu3 %v2875_v22  ;;  %v3318_v21 = vpack.c.bf16 %v345_v5, %v346_v20  ;;  %v3330_v22 = vld [vmem:[%s3042_s27 + $0x38] sm:$0xff] }
  0x42   : > { %837 = vmatpush.bf16.msrb.mxu1 %v2907_v36  ;;  %1248 = vmatpush.bf16.msrb.mxu0 %v2883_v37  ;;  %v3333_v36 = vld [vmem:[%s3042_s27 + $0x70] sm:$0xff]  ;;  %v2928_v37 = vld [vmem:[%s4159_s1 + $0x1b8] sm:$0xff]  ;;  %v258_v56 = vrot.slane %v3330_v22, 7 }
  0x44   : > { %v259_v63 = vsel %vm245_vm0, %v257_v55, %v258_v56  ;;  %v4162_v56 = vmov 0.0|0.0  }
  0x45   : > { %927 = vmatpush.bf16.msrb.mxu2 %v2914_v46  ;;  %1160 = vmatpush.bf16.msrb.mxu3 %v2874_v47  ;;  %v2936_v46 = vld [vmem:[%s4159_s1 + $0x1f8] sm:$0xff] }
  0x46   : > { %838 = vmatpush.bf16.msrb.mxu1 %v2906_v57  ;;  %1249 = vmatpush.bf16.msrb.mxu0 %v2882_v58  ;;  %v2896_v47 = vld [vmem:[%s4159_s1 + $0xb8] sm:$0xff]  ;;  %v269_v57 = vrot.slane %v3333_v36, 7  ;;  %v270_v58 = vrot.slane %v3351_v49, 7 }
  0x48   : > { %v271_v0 = vsel %vm245_vm0, %v269_v57, %v270_v58  ;;  %v2935_v58 = vld [vmem:[%s4159_s1 + $0x1f0] sm:$0xff] }
  0x49   : > { %928 = vmatpush.bf16.msrb.mxu2 %v2913_v59  ;;  %1161 = vmatpush.bf16.msrb.mxu3 %v2873_v60  ;;  %v281_v59 = vrot.slane %v3354_v50, 7  ;;  %v282_v60 = vrot.slane %v3360_v52, 7  ;;  %v3382_v5 = vpack.c.bf16 %v271_v0, %v269_v57  ;;  %v2927_v57 = vld [vmem:[%s4159_s1 + $0x1b0] sm:$0xff]  ;;  %v3434_v0 = vpack.c.bf16 %v3131_v40, %v3128_v39 }
  0x4a   : > { %839 = vmatpush.bf16.msrb.mxu1 %v2905_v2  ;;  %1250 = vmatpush.bf16.msrb.mxu0 %v2881_v3  ;;  %v537_v2 = vsel %vm245_vm0, %v535_v61, %v536_v62  ;;  %v3380_v3 = vpack.c.bf16 %v259_v63, %v257_v55  ;;  %v348_v62 = vrot.slane %v3131_v40, 1  ;;  %v3451_v40 = vpack.c.bf16 %v3235_v24, %v3232_v23 }
  0x4b   : > { %2304 = vmatmul.msk.bf16.gmra.mxu0 %vm3101_vm3, %v3308_v6  ;;  %2320 = vmatmul.msk.bf16.gmra.mxu1 %vm3101_vm3, %v3310_v4  ;;  %v283_v1 = vsel %vm245_vm0, %v281_v59, %v282_v60  ;;  %4197 = vst [vmem:[#allocation7_spill] sm:$0xff] %v3382_v5  ;;  %v2943_v60 = vld [vmem:[%s4159_s1 + $0x230] sm:$0xff] }
  0x4c   : > { %2336 = vmatmul.msk.bf16.gmra.mxu2 %vm3101_vm3, %v3313_v14  ;;  %2352 = vmatmul.msk.bf16.gmra.mxu3 %vm3101_vm3, %v3315_v19  ;;  %4196 = vst [vmem:[#allocation6_spill] sm:$0xff] %v3380_v3  ;;  %v3384_v20 = vpack.c.bf16 %v283_v1, %v281_v59  ;;  %v2895_v59 = vld [vmem:[%s4159_s1 + $0xb0] sm:$0xff] }
  0x4d   : > { %1614 = vmatpush.bf16.msra.mxu2 %v2928_v37  ;;  %1703 = vmatpush.bf16.msra.mxu3 %v2936_v46  ;;  %v3386_v37 = vpack.c.bf16 %v537_v2, %v535_v61  ;;  %v4163_v46 = vmov 0.0   ;;  %v347_v61 = vrot.slane %v3128_v39, 1  ;;  %v350_v2 = vrot.slane %v3232_v23, 1  ;;  %4202 = vst [vmem:[#allocation10_spill] sm:$0xff] %v3451_v40  ;;  %v2934_v23 = vld [vmem:[%s4159_s1 + $0x1e8] sm:$0xff] }
  0x4e   : > { %1332 = vmatpush.bf16.msra.mxu1 %v2896_v47  ;;  %1792 = vmatpush.bf16.msra.mxu0 %v2944_v51  ;;  %v246_v47 = vrot.slane %v4163_v46, 7 }
  0x4f   : > { %4198 = vst [vmem:[#allocation8_spill] sm:$0xff] %v3386_v37  ;;  %v349_v63 = vsel %vm341_vm4, %v347_v61, %v348_v62  ;;  %v3480_v61 = vpack.c.bf16 %v3330_v22, %v3327_v7 }
  0x50   : > { %v3401_v51 = vpack.c.bf16 %v246_v47, %v246_v47  ;;  %v3436_v1 = vpack.c.bf16 %v348_v62, %v349_v63  ;;  %v351_v47 = vrot.slane %v3235_v24, 1  ;;  %v2894_v24 = vld [vmem:[%s4159_s1 + $0xa8] sm:$0xff]  ;;  %v356_v63 = vrot.slane %v3054_v8, 1 }
  0x51   : > { %1615 = vmatpush.bf16.msra.mxu2 %v2927_v57  ;;  %1704 = vmatpush.bf16.msra.mxu3 %v2935_v58  ;;  %v353_v58 = vrot.slane %v3327_v7, 1  ;;  %4203 = vst [vmem:[#allocation11_spill] sm:$0xff] %v3480_v61 }
  0x52   : > { %4199 = vst [vmem:[#allocation9_spill] sm:$0xff] %v3401_v51  ;;  %1333 = vmatpush.bf16.msra.mxu1 %v2895_v59  ;;  %1793 = vmatpush.bf16.msra.mxu0 %v2943_v60  ;;  %v352_v39 = vsel %vm341_vm4, %v350_v2, %v351_v47  ;;  %v354_v59 = vrot.slane %v3330_v22, 1  ;;  %v357_v2 = vrot.slane %v3057_v9, 1  ;;  %v3497_v22 = vpack.c.bf16 %v3057_v9, %v3054_v8  ;;  %v2925_v8 = vld [vmem:[%s4159_s1 + $0x1a0] sm:$0xff] }
  0x53   : > { %v3453_v57 = vpack.c.bf16 %v351_v47, %v352_v39  ;;  %v2933_v9 = vld [vmem:[%s4159_s1 + $0x1e0] sm:$0xff] }
  0x54   : > { %v355_v60 = vsel %vm341_vm4, %v353_v58, %v354_v59  ;;  %v358_v7 = vsel %vm341_vm4, %v356_v63, %v357_v2  ;;  %4205 = vst [vmem:[#allocation13_spill] sm:$0xff] %v3497_v22  ;;  %v359_v63 = vrot.slane %v3134_v41, 1 }
  0x55   : > { %1705 = vmatpush.bf16.msra.mxu3 %v2934_v23  ;;  %v3482_v62 = vpack.c.bf16 %v354_v59, %v355_v60  ;;  %v2893_v59 = vld [vmem:[%s4159_s1 + $0xa0] sm:$0xff] }
  0x56   : > { %1334 = vmatpush.bf16.msra.mxu1 %v2894_v24  ;;  %v2941_v60 = vld [vmem:[%s4159_s1 + $0x220] sm:$0xff] }
  0x57   : > { %4204 = vst [vmem:[#allocation12_spill] sm:$0xff] %v3482_v62 }
  0x59   : > { %1706 = vmatpush.bf16.msra.mxu3 %v2933_v9 }
  0x5a   : > { %1335 = vmatpush.bf16.msra.mxu1 %v2893_v59 }
  0x5b   : > { %2308 = vmatmul.msk.bf16.gmra.mxu0 %vm3101_vm3, %v3380_v3  ;;  %2324 = vmatmul.msk.bf16.gmra.mxu1 %vm3101_vm3, %v3382_v5 }
  0x5c   : > { %2340 = vmatmul.msk.bf16.gmra.mxu2 %vm3101_vm3, %v3384_v20  ;;  %2356 = vmatmul.msk.bf16.gmra.mxu3 %vm3101_vm3, %v3386_v37 }
  0x6b   : > { %840 = vmatmul.bf16.vlgmr.msrb.gmra.mxu1 %v3257_v29  ;;  %1251 = vmatmul.bf16.vlgmr.msrb.gmra.mxu0 %v4162_v56  ;;  %v3542_v56 = vpack.c.bf16 %v3143_v42, %v3134_v41 }
  0x6c   : > { %2359 = vmatmul.msk.bf16.vlgmr.msrb.gmra.mxu2 %vm3405_vm5, %v3318_v21  ;;  %2504 = vmatmul.msk.bf16.vlgmr.msrb.gmra.mxu3 %vm3101_vm3, %v3401_v51 }
  0x6d   : > { %4209 = vst [vmem:[#allocation17_spill] sm:$0xff] %v3542_v56 }
  0x7b   : > { %845 = vmatmul.bf16.gmra.mxu1 %v3434_v0  ;;  %1256 = vmatmul.bf16.gmra.mxu0 %v3257_v29  ;;  %v2942_v29 = vld [vmem:[%s4159_s1 + $0x228] sm:$0xff] }
  0x7c   : > { %2362 = vmatmul.msk.bf16.gmra.mxu2 %vm3405_vm5, %v3436_v1  ;;  %2508 = vmatmul.msk.bf16.gmra.mxu3 %vm3101_vm3, %v3096_v30  ;;  %v2926_v30 = vld [vmem:[%s4159_s1 + $0x1a8] sm:$0xff] }
  0x7d   : > { %1616 = vmatpush.bf16.msra.mxu2 %v2926_v30  ;;  %1794 = vmatpush.bf16.msra.mxu0 %v2942_v29  ;;  %v3503_v30 = vpack.c.bf16 %v357_v2, %v358_v7  ;;  %v360_v2 = vrot.slane %v3143_v42, 1 }
  0x7f   : > { %4206 = vst [vmem:[#allocation14_spill] sm:$0xff] %v3503_v30  ;;  %v361_v7 = vsel %vm341_vm4, %v359_v63, %v360_v2  ;;  %v362_v63 = vrot.slane %v3238_v25, 1 }
  0x80   : > { %v3548_v37 = vpack.c.bf16 %v360_v2, %v361_v7  ;;  %v363_v2 = vrot.slane %v3247_v26, 1 }
  0x81   : > { %1617 = vmatpush.bf16.msra.mxu2 %v2925_v8  ;;  %1795 = vmatpush.bf16.msra.mxu0 %v2941_v60 }
  0x82   : > { %4210 = vst [vmem:[#allocation18_spill] sm:$0xff] %v3548_v37  ;;  %v364_v7 = vsel %vm341_vm4, %v362_v63, %v363_v2 }
  0x8b   : > { %850 = vmatmul.bf16.gmra.mxu1 %v3451_v40  ;;  %1261 = vmatmul.bf16.gmra.mxu0 %v3434_v0 }
  0x8c   : > { %2365 = vmatmul.msk.bf16.gmra.mxu2 %vm3405_vm5, %v3453_v57  ;;  %2512 = vmatmul.msk.bf16.gmra.mxu3 %vm3101_vm3, %v3205_v15 }
  0x9b   : > { %855 = vmatmul.bf16.gmra.mxu1 %v3480_v61  ;;  %1266 = vmatmul.bf16.gmra.mxu0 %v3451_v40 }
  0x9c   : > { %2368 = vmatmul.msk.bf16.gmra.mxu2 %vm3405_vm5, %v3482_v62  ;;  %2516 = vmatmul.msk.bf16.gmra.mxu3 %vm3101_vm3, %v3308_v6 }
  0xa8   : > { %v3499_v47 = vpop.f32.mrf.mxu0  ;;  %v3501_v39 = vpop.f32.mrf.mxu1 }
  0xab   : > { %860 = vmatmul.bf16.gmra.mxu1 %v3497_v22  ;;  %1271 = vmatmul.bf16.gmra.mxu0 %v3480_v61 }
  0xac   : > { %2371 = vmatmul.msk.bf16.gmra.mxu2 %vm3405_vm5, %v3503_v30  ;;  %2520 = vmatmul.msk.bf16.gmra.mxu3 %vm3101_vm3, %v3380_v3 }
  0xaf   : > { %v3519_v23 = vpop.f32.mrf.mxu2  ;;  %v3521_v24 = vpop.f32.mrf.mxu3 }
  0xb0   : > { %4207 = vst [vmem:[#allocation15_spill] sm:$0xff] %v3521_v24  ;;  %v3523_v29 = vpop.f32.mrf.mxu0  ;;  %v3525_v58 = vpop.f32.mrf.mxu1 }
  0xb7   : > { %v3536_v8 = vpop.f32.mrf.mxu2  ;;  %v3538_v9 = vpop.f32.mrf.mxu3 }
  0xb8   : > { %4208 = vst [vmem:[#allocation16_spill] sm:$0xff] %v3538_v9  ;;  %v3544_v46 = vpop.f32.mrf.mxu0  ;;  %v3546_v51 = vpop.f32.mrf.mxu1 }
  0xbb   : > { %865 = vmatmul.bf16.gmra.mxu1 %v3542_v56  ;;  %1276 = vmatmul.bf16.gmra.mxu0 %v3497_v22 }
  0xbc   : > { %2374 = vmatmul.msk.bf16.gmra.mxu2 %vm3405_vm5, %v3548_v37  ;;  %2524 = vmatmul.msk.bf16.gmra.mxu3 %vm3101_vm3, %v3098_v31  ;;  %v3575_v37 = vpack.c.bf16 %v3247_v26, %v3238_v25  ;;  %v3581_v31 = vpack.c.bf16 %v363_v2, %v364_v7  ;;  %v2924_v25 = vld [vmem:[%s4159_s1 + $0x198] sm:$0xff] }
  0xbd   : > { %v2932_v26 = vld [vmem:[%s4159_s1 + $0x1d8] sm:$0xff]  ;;  %1618 = vmatpush.bf16.msra.mxu2 %v2924_v25 }
  0xbe   : > { %4215 = vst [vmem:[#allocation23_spill] sm:$0xff] %v3575_v37  ;;  %1707 = vmatpush.bf16.msra.mxu3 %v2932_v26  ;;  %v2940_v25 = vld [vmem:[%s4159_s1 + $0x218] sm:$0xff] }
  0xbf   : > { %v3558_v41 = vpop.f32.mrf.mxu2  ;;  %v3560_v42 = vpop.f32.mrf.mxu3  ;;  %4216 = vst [vmem:[#allocation24_spill] sm:$0xff] %v3581_v31  ;;  %1796 = vmatpush.bf16.msra.mxu0 %v2940_v25  ;;  %v369_v25 = vrot.slane %v3063_v11, 1 }
  0xc0   : > { %4211 = vst [vmem:[#allocation19_spill] sm:$0xff] %v3558_v41  ;;  %v3562_v59 = vpop.f32.mrf.mxu0  ;;  %v3564_v60 = vpop.f32.mrf.mxu1 }
  0xc1   : > { %4212 = vst [vmem:[#allocation20_spill] sm:$0xff] %v3560_v42 }
  0xc7   : > { %v3569_v9 = vpop.f32.mrf.mxu2  ;;  %v3571_v24 = vpop.f32.mrf.mxu3 }
  0xc8   : > { %4213 = vst [vmem:[#allocation21_spill] sm:$0xff] %v3569_v9  ;;  %v3577_v22 = vpop.f32.mrf.mxu0  ;;  %v3579_v42 = vpop.f32.mrf.mxu1 }
  0xc9   : > { %4214 = vst [vmem:[#allocation22_spill] sm:$0xff] %v3571_v24 }
  0xcb   : > { %870 = vmatmul.bf16.gmra.mxu1 %v3575_v37  ;;  %1281 = vmatmul.bf16.gmra.mxu0 %v3542_v56  ;;  %v366_v56 = vrot.slane %v3351_v49, 1 }
  0xcc   : > { %2377 = vmatmul.msk.bf16.gmra.mxu2 %vm3405_vm5, %v3581_v31  ;;  %2528 = vmatmul.msk.bf16.gmra.mxu3 %vm3101_vm3, %v3207_v16  ;;  %v365_v31 = vrot.slane %v3333_v36, 1  ;;  %v2892_v16 = vld [vmem:[%s4159_s1 + $0x98] sm:$0xff] }
  0xcd   : > { %1336 = vmatpush.bf16.msra.mxu1 %v2892_v16 }
  0xce   : > { %v367_v26 = vsel %vm341_vm4, %v365_v31, %v366_v56 }
  0xcf   : > { %v3597_v63 = vpop.f32.mrf.mxu2  ;;  %v3599_v2 = vpop.f32.mrf.mxu3  ;;  %v3626_v62 = vpack.c.bf16 %v366_v56, %v367_v26  ;;  %v368_v56 = vrot.slane %v3060_v10, 1 }
  0xd0   : > { %4217 = vst [vmem:[#allocation25_spill] sm:$0xff] %v3597_v63  ;;  %v3601_v7 = vpop.f32.mrf.mxu0  ;;  %v3603_v24 = vpop.f32.mrf.mxu1  ;;  %v3620_v63 = vpack.c.bf16 %v3351_v49, %v3333_v36 }
  0xd1   : > { %4218 = vst [vmem:[#allocation26_spill] sm:$0xff] %v3599_v2  ;;  %v370_v26 = vsel %vm341_vm4, %v368_v56, %v369_v25 }
  0xd2   : > { %4221 = vst [vmem:[#allocation29_spill] sm:$0xff] %v3620_v63 }
  0xd3   : > { %4222 = vst [vmem:[#allocation30_spill] sm:$0xff] %v3626_v62 }
  0xd7   : > { %v3614_v2 = vpop.f32.mrf.mxu2  ;;  %v3616_v30 = vpop.f32.mrf.mxu3 }
  0xd8   : > { %4219 = vst [vmem:[#allocation27_spill] sm:$0xff] %v3614_v2  ;;  %v3622_v61 = vpop.f32.mrf.mxu0  ;;  %v3624_v3 = vpop.f32.mrf.mxu1 }
  0xd9   : > { %4220 = vst [vmem:[#allocation28_spill] sm:$0xff] %v3616_v30 }
  0xdb   : > { %875 = vmatmul.bf16.gmra.mxu1 %v3620_v63  ;;  %1286 = vmatmul.bf16.gmra.mxu0 %v3575_v37  ;;  %v3653_v37 = vpack.c.bf16 %v3063_v11, %v3060_v10  ;;  %v2923_v10 = vld [vmem:[%s4159_s1 + $0x190] sm:$0xff] }
  0xdc   : > { %2380 = vmatmul.msk.bf16.gmra.mxu2 %vm3405_vm5, %v3626_v62  ;;  %2532 = vmatmul.msk.bf16.gmra.mxu3 %vm3101_vm3, %v3310_v4  ;;  %v2931_v11 = vld [vmem:[%s4159_s1 + $0x1d0] sm:$0xff] }
  0xdd   : > { %1619 = vmatpush.bf16.msra.mxu2 %v2923_v10  ;;  %1708 = vmatpush.bf16.msra.mxu3 %v2931_v11  ;;  %v2939_v10 = vld [vmem:[%s4159_s1 + $0x210] sm:$0xff] }
  0xde   : > { %1797 = vmatpush.bf16.msra.mxu0 %v2939_v10 }
  0xdf   : > { %v3636_v31 = vpop.f32.mrf.mxu2  ;;  %v3638_v16 = vpop.f32.mrf.mxu3 }
  0xe0   : > { %4223 = vst [vmem:[#allocation31_spill] sm:$0xff] %v3636_v31  ;;  %v3640_v36 = vpop.f32.mrf.mxu0  ;;  %v3642_v49 = vpop.f32.mrf.mxu1  ;;  %v3655_v31 = vpack.c.bf16 %v369_v25, %v370_v26 }
  0xe1   : > { %4224 = vst [vmem:[#allocation32_spill] sm:$0xff] %v3638_v16 }
  0xe2   : > { %4227 = vst [vmem:[#allocation35_spill] sm:$0xff] %v3655_v31 }
  0xe7   : > { %v3647_v30 = vpop.f32.mrf.mxu2  ;;  %v3649_v62 = vpop.f32.mrf.mxu3 }
  0xe8   : > { %4225 = vst [vmem:[#allocation33_spill] sm:$0xff] %v3647_v30  ;;  %v841_v4 = vpop.f32.mrf.mxu1  ;;  %v1252_v16 = vpop.f32.mrf.mxu0  ;;  %v2891_v30 = vld [vmem:[%s4159_s1 + $0x90] sm:$0xff] }
  0xe9   : > { %4226 = vst [vmem:[#allocation34_spill] sm:$0xff] %v3649_v62  ;;  %v842_v2 = vadd.f32 %v841_v4, %v3499_v47  ;;  %v371_v62 = vrot.slane %v3146_v43, 1  ;;  %1337 = vmatpush.bf16.msra.mxu1 %v2891_v30 }
  0xeb   : > { %880 = vmatmul.bf16.gmra.mxu1 %v3653_v37  ;;  %1291 = vmatmul.bf16.gmra.mxu0 %v3620_v63  ;;  %v372_v63 = vrot.slane %v3149_v44, 1 }
  0xec   : > { %2383 = vmatmul.msk.bf16.gmra.mxu2 %vm3405_vm5, %v3655_v31  ;;  %2536 = vmatmul.msk.bf16.gmra.mxu3 %vm3101_vm3, %v3382_v5 }
  0xed   : > { %v373_v11 = vsel %vm341_vm4, %v371_v62, %v372_v63 }
  0xee   : > { %v3688_v41 = vpack.c.bf16 %v372_v63, %v373_v11 }
  0xef   : > { %v930_v4 = vpop.f32.mrf.mxu2  ;;  %v1163_v47 = vpop.f32.mrf.mxu3 }
  0xf0   : > { %v931_v56 = vadd.f32 %v930_v4, %v842_v2  ;;  %v843_v25 = vpop.f32.mrf.mxu1  ;;  %v1254_v26 = vpop.f32.mrf.mxu0 }
  0xf1   : > { %v844_v31 = vadd.f32 %v843_v25, %v3523_v29  ;;  %v3686_v29 = vpack.c.bf16 %v3149_v44, %v3146_v43 }
  0xf2   : > { %v1164_v5 = vadd.f32 %v1163_v47, %v931_v56 }
  0xf4   : > { %v3681_v2 = vadd.f32 %v1252_v16, %v1164_v5 }
  0xf7   : > { %v932_v4 = vpop.f32.mrf.mxu2  ;;  %v1165_v9 = vpop.f32.mrf.mxu3 }
  0xf8   : > { %v933_v47 = vadd.f32 %v932_v4, %v844_v31  ;;  %v846_v56 = vpop.f32.mrf.mxu1  ;;  %v1257_v25 = vpop.f32.mrf.mxu0  ;;  %v375_v31 = vrot.slane %v3253_v28, 1 }
  0xf9   : > { %v847_v40 = vadd.f32 %v846_v56, %v3544_v46 }
  0xfa   : > { %v1166_v6 = vadd.f32 %v1165_v9, %v933_v47  ;;  %v374_v9 = vrot.slane %v3250_v27, 1 }
  0xfb   : > { %885 = vmatmul.bf16.gmra.mxu1 %v3686_v29  ;;  %1296 = vmatmul.bf16.gmra.mxu0 %v3653_v37 }
  0xfc   : > { %2386 = vmatmul.msk.bf16.gmra.mxu2 %vm3405_vm5, %v3688_v41  ;;  %2540 = vmatmul.msk.bf16.gmra.mxu3 %vm3101_vm3, %v3105_v33  ;;  %v3699_v43 = vadd.f32 %v1254_v26, %v1166_v6  ;;  %v376_v11 = vsel %vm341_vm4, %v374_v9, %v375_v31  ;;  %v3709_v6 = vpack.c.bf16 %v3253_v28, %v3250_v27  ;;  %v2922_v27 = vld [vmem:[%s4159_s1 + $0x188] sm:$0xff] }
  0xfd   : > { %v2930_v28 = vld [vmem:[%s4159_s1 + $0x1c8] sm:$0xff]  ;;  %1620 = vmatpush.bf16.msra.mxu2 %v2922_v27 }
  0xfe   : > { %1709 = vmatpush.bf16.msra.mxu3 %v2930_v28 }
  0xff   : > { %v935_v44 = vpop.f32.mrf.mxu2  ;;  %v1168_v5 = vpop.f32.mrf.mxu3 }
 0x100   : > { %v936_v62 = vadd.f32 %v935_v44, %v847_v40  ;;  %v848_v30 = vpop.f32.mrf.mxu1  ;;  %v1259_v46 = vpop.f32.mrf.mxu0  ;;  %v3711_v44 = vpack.c.bf16 %v375_v31, %v376_v11  ;;  %v377_v31 = vrot.slane %v3354_v50, 1  ;;  %v378_v11 = vrot.slane %v3360_v52, 1 }
 0x101   : > { %v849_v63 = vadd.f32 %v848_v30, %v3562_v59 }
 0x102   : > { %v1169_v16 = vadd.f32 %v1168_v5, %v936_v62 }
 0x104   : > { %v3704_v10 = vadd.f32 %v1257_v25, %v1169_v16 }
 0x107   : > { %v937_v4 = vpop.f32.mrf.mxu2  ;;  %v1170_v47 = vpop.f32.mrf.mxu3 }
 0x108   : > { %v938_v40 = vadd.f32 %v937_v4, %v849_v63  ;;  %v851_v26 = vpop.f32.mrf.mxu1  ;;  %v1262_v56 = vpop.f32.mrf.mxu0 }
 0x109   : > { %v852_v59 = vadd.f32 %v851_v26, %v3577_v22  ;;  %v379_v26 = vsel %vm341_vm4, %v377_v31, %v378_v11 }
 0x10a   : > { %v1171_v30 = vadd.f32 %v1170_v47, %v938_v40  ;;  %v2890_v47 = vld [vmem:[%s4159_s1 + $0x88] sm:$0xff] }
 0x10b   : > { %890 = vmatmul.bf16.gmra.mxu1 %v3709_v6  ;;  %1301 = vmatmul.bf16.gmra.mxu0 %v3686_v29 }
 0x10c   : > { %2389 = vmatmul.msk.bf16.gmra.mxu2 %vm3405_vm5, %v3711_v44  ;;  %2544 = vmatmul.msk.bf16.gmra.mxu3 %vm3101_vm3, %v3209_v17  ;;  %v3728_v22 = vadd.f32 %v1259_v46, %v1171_v30  ;;  %v2938_v46 = vld [vmem:[%s4159_s1 + $0x208] sm:$0xff] }
 0x10d   : > { %1338 = vmatpush.bf16.msra.mxu1 %v2890_v47  ;;  %1798 = vmatpush.bf16.msra.mxu0 %v2938_v46  ;;  %v381_v47 = vrot.slane %v3069_v13, 1 }
 0x10f   : > { %v940_v25 = vpop.f32.mrf.mxu2  ;;  %v1173_v5 = vpop.f32.mrf.mxu3 }
 0x110   : > { %v941_v62 = vadd.f32 %v940_v25, %v852_v59  ;;  %v853_v9 = vpop.f32.mrf.mxu1  ;;  %v1264_v63 = vpop.f32.mrf.mxu0 }
 0x111   : > { %v854_v16 = vadd.f32 %v853_v9, %v3601_v7  ;;  %v3744_v7 = vpack.c.bf16 %v3360_v52, %v3354_v50 }
 0x112   : > { %v1174_v4 = vadd.f32 %v1173_v5, %v941_v62  ;;  %v3746_v5 = vpack.c.bf16 %v378_v11, %v379_v26  ;;  %v380_v11 = vrot.slane %v3066_v12, 1 }
 0x114   : > { %v3739_v40 = vadd.f32 %v1262_v56, %v1174_v4 }
 0x117   : > { %v942_v59 = vpop.f32.mrf.mxu2  ;;  %v1175_v30 = vpop.f32.mrf.mxu3 }
 0x118   : > { %v943_v27 = vadd.f32 %v942_v59, %v854_v16  ;;  %v856_v28 = vpop.f32.mrf.mxu1  ;;  %v1267_v25 = vpop.f32.mrf.mxu0  ;;  %v382_v59 = vsel %vm341_vm4, %v380_v11, %v381_v47 }
 0x119   : > { %v857_v62 = vadd.f32 %v856_v28, %v3622_v61 }
 0x11a   : > { %v1176_v9 = vadd.f32 %v1175_v30, %v943_v27 }
 0x11b   : > { %895 = vmatmul.bf16.gmra.mxu1 %v3744_v7  ;;  %1306 = vmatmul.bf16.gmra.mxu0 %v3709_v6 }
 0x11c   : > { %2392 = vmatmul.msk.bf16.gmra.mxu2 %vm3405_vm5, %v3746_v5  ;;  %2548 = vmatmul.msk.bf16.gmra.mxu3 %vm3101_vm3, %v3313_v14  ;;  %v3757_v50 = vadd.f32 %v1264_v63, %v1176_v9  ;;  %v3767_v63 = vpack.c.bf16 %v3069_v13, %v3066_v12  ;;  %v2921_v12 = vld [vmem:[%s4159_s1 + $0x180] sm:$0xff] }
 0x11d   : > { %v2929_v13 = vld [vmem:[%s4159_s1 + $0x1c0] sm:$0xff]  ;;  %1621 = vmatpush.bf16.msra.mxu2 %v2921_v12  ;;  %v3802_v12 = vpack.c.bf16 %v3161_v48, %v3152_v45 }
 0x11e   : > { %4228 = vst [vmem:[#allocation36_spill] sm:$0xff] %v3757_v50  ;;  %1710 = vmatpush.bf16.msra.mxu3 %v2929_v13 }
 0x11f   : > { %v945_v52 = vpop.f32.mrf.mxu2  ;;  %v1178_v56 = vpop.f32.mrf.mxu3 }
 0x120   : > { %v946_v31 = vadd.f32 %v945_v52, %v857_v62  ;;  %v858_v16 = vpop.f32.mrf.mxu1  ;;  %v1269_v61 = vpop.f32.mrf.mxu0  ;;  %v3769_v52 = vpack.c.bf16 %v381_v47, %v382_v59  ;;  %v383_v47 = vrot.slane %v3152_v45, 1 }
 0x121   : > { %v859_v4 = vadd.f32 %v858_v16, %v3640_v36 }
 0x122   : > { %v1179_v46 = vadd.f32 %v1178_v56, %v946_v31 }
 0x124   : > { %v3762_v26 = vadd.f32 %v1267_v25, %v1179_v46  ;;  %v384_v46 = vrot.slane %v3161_v48, 1 }
 0x127   : > { %v947_v30 = vpop.f32.mrf.mxu2  ;;  %v1180_v27 = vpop.f32.mrf.mxu3 }
 0x128   : > { %v948_v28 = vadd.f32 %v947_v30, %v859_v4  ;;  %v861_v62 = vpop.f32.mrf.mxu1  ;;  %v1272_v9 = vpop.f32.mrf.mxu0  ;;  %v2889_v30 = vld [vmem:[%s4159_s1 + $0x80] sm:$0xff] }
 0x129   : > { %v862_v25 = vadd.f32 %v861_v62, %v3501_v39  ;;  %v2937_v39 = vld [vmem:[%s4159_s1 + $0x200] sm:$0xff]  ;;  %1339 = vmatpush.bf16.msra.mxu1 %v2889_v30  ;;  %v387_v30 = vrot.slane %v3269_v38, 1 }
 0x12a   : > { %v1181_v50 = vadd.f32 %v1180_v27, %v948_v28  ;;  %1799 = vmatpush.bf16.msra.mxu0 %v2937_v39 }
 0x12b   : > { %900 = vmatmul.bf16.gmra.mxu1 %v3767_v63  ;;  %1311 = vmatmul.bf16.gmra.mxu0 %v3744_v7 }
 0x12c   : > { %2395 = vmatmul.msk.bf16.gmra.mxu2 %vm3405_vm5, %v3769_v52  ;;  %2552 = vmatmul.msk.bf16.gmra.mxu3 %vm3101_vm3, %v3384_v20  ;;  %v3785_v36 = vadd.f32 %v1269_v61, %v1181_v50  ;;  %v385_v61 = vsel %vm341_vm4, %v383_v47, %v384_v46 }
 0x12f   : > { %v950_v56 = vpop.f32.mrf.mxu2  ;;  %v1183_v31 = vpop.f32.mrf.mxu3 }
 0x130   : > { %v951_v16 = vadd.f32 %v950_v56, %v862_v25  ;;  %v863_v11 = vpop.f32.mrf.mxu1  ;;  %v1274_v4 = vpop.f32.mrf.mxu0 }
 0x131   : > { %v864_v27 = vadd.f32 %v863_v11, %v3525_v58 }
 0x132   : > { %v1184_v59 = vadd.f32 %v1183_v31, %v951_v16  ;;  %v3804_v31 = vpack.c.bf16 %v384_v46, %v385_v61 }
 0x134   : > { %v3796_v50 = vadd.f32 %v1272_v9, %v1184_v59  ;;  %v386_v59 = vrot.slane %v3260_v35, 1 }
 0x137   : > { %v952_v28 = vpop.f32.mrf.mxu2  ;;  %v1185_v62 = vpop.f32.mrf.mxu3 }
 0x138   : > { %v953_v13 = vadd.f32 %v952_v28, %v864_v27  ;;  %v866_v25 = vpop.f32.mrf.mxu1  ;;  %v1277_v56 = vpop.f32.mrf.mxu0  ;;  %v388_v27 = vsel %vm341_vm4, %v386_v59, %v387_v30  ;;  %v541_v59 = vrot.slane %v3363_v53, 1 }
 0x139   : > { %v867_v48 = vadd.f32 %v866_v25, %v3546_v51  ;;  %v3825_v51 = vpack.c.bf16 %v3269_v38, %v3260_v35 }
 0x13a   : > { %v1186_v16 = vadd.f32 %v1185_v62, %v953_v13 }
 0x13b   : > { %905 = vmatmul.bf16.gmra.mxu1 %v3802_v12  ;;  %1316 = vmatmul.bf16.gmra.mxu0 %v3767_v63 }
 0x13c   : > { %2398 = vmatmul.msk.bf16.gmra.mxu2 %vm3405_vm5, %v3804_v31  ;;  %2556 = vmatmul.msk.bf16.gmra.mxu3 %vm3101_vm3, %v3107_v34  ;;  %v3814_v45 = vadd.f32 %v1274_v4, %v1186_v16 }
 0x13f   : > { %v955_v58 = vpop.f32.mrf.mxu2  ;;  %v1188_v9 = vpop.f32.mrf.mxu3 }
 0x140   : > { %v956_v11 = vadd.f32 %v955_v58, %v867_v48  ;;  %v868_v47 = vpop.f32.mrf.mxu1  ;;  %v1279_v46 = vpop.f32.mrf.mxu0  ;;  %v3827_v48 = vpack.c.bf16 %v387_v30, %v388_v27  ;;  %v542_v30 = vrot.slane %v3366_v54, 1 }
 0x141   : > { %v869_v28 = vadd.f32 %v868_v47, %v3564_v60 }
 0x142   : > { %v1189_v39 = vadd.f32 %v1188_v9, %v956_v11 }
 0x144   : > { %v3819_v61 = vadd.f32 %v1277_v56, %v1189_v39 }
 0x147   : > { %v957_v4 = vpop.f32.mrf.mxu2  ;;  %v1190_v62 = vpop.f32.mrf.mxu3 }
 0x148   : > { %v958_v13 = vadd.f32 %v957_v4, %v869_v28  ;;  %v871_v25 = vpop.f32.mrf.mxu1  ;;  %v1282_v16 = vpop.f32.mrf.mxu0  ;;  %v543_v28 = vsel %vm341_vm4, %v541_v59, %v542_v30 }
 0x149   : > { %v872_v38 = vadd.f32 %v871_v25, %v3579_v42  ;;  %v3848_v42 = vpack.c.bf16 %v3366_v54, %v3363_v53 }
 0x14a   : > { %v1191_v58 = vadd.f32 %v1190_v62, %v958_v13 }
 0x14b   : > { %910 = vmatmul.bf16.gmra.mxu1 %v3825_v51  ;;  %1321 = vmatmul.bf16.gmra.mxu0 %v3802_v12 }
 0x14c   : > { %2401 = vmatmul.msk.bf16.gmra.mxu2 %vm3405_vm5, %v3827_v48  ;;  %2560 = vmatmul.msk.bf16.gmra.mxu3 %vm3101_vm3, %v3211_v18  ;;  %v3837_v35 = vadd.f32 %v1279_v46, %v1191_v58 }
 0x14f   : > { %v960_v60 = vpop.f32.mrf.mxu2  ;;  %v1193_v56 = vpop.f32.mrf.mxu3 }
 0x150   : > { %v961_v9 = vadd.f32 %v960_v60, %v872_v38  ;;  %v873_v11 = vpop.f32.mrf.mxu1  ;;  %v1284_v47 = vpop.f32.mrf.mxu0  ;;  %v3850_v38 = vpack.c.bf16 %v542_v30, %v543_v28  ;;  %v4230_v30 = vmov 0.0  }
 0x151   : > { %v874_v4 = vadd.f32 %v873_v11, %v3603_v24 }
 0x152   : > { %v1194_v39 = vadd.f32 %v1193_v56, %v961_v9 }
 0x154   : > { %v3842_v27 = vadd.f32 %v1282_v16, %v1194_v39  ;;  %v342_v39 = vrot.slane %v4230_v30, 1 }
 0x157   : > { %v962_v46 = vpop.f32.mrf.mxu2  ;;  %v1195_v62 = vpop.f32.mrf.mxu3 }
 0x158   : > { %v963_v13 = vadd.f32 %v962_v46, %v874_v4  ;;  %v876_v25 = vpop.f32.mrf.mxu1  ;;  %v1287_v58 = vpop.f32.mrf.mxu0  ;;  %v3867_v46 = vpack.c.bf16 %v342_v39, %v342_v39 }
 0x159   : > { %v877_v54 = vadd.f32 %v876_v25, %v3624_v3 }
 0x15a   : > { %v1196_v60 = vadd.f32 %v1195_v62, %v963_v13 }
 0x15b   : > { %915 = vmatmul.bf16.gmra.mxu1 %v3848_v42  ;;  %1326 = vmatmul.bf16.gmra.mxu0 %v3825_v51 }
 0x15c   : > { %2404 = vmatmul.msk.bf16.gmra.mxu2 %vm3405_vm5, %v3850_v38  ;;  %2564 = vmatmul.msk.bf16.gmra.mxu3 %vm3101_vm3, %v3315_v19  ;;  %v3860_v53 = vadd.f32 %v1284_v47, %v1196_v60 }
 0x15e   : > { %4229 = vst [vmem:[#allocation37_spill] sm:$0xff] %v3860_v53 }
 0x15f   : > { %v965_v24 = vpop.f32.mrf.mxu2  ;;  %v1198_v16 = vpop.f32.mrf.mxu3 }
 0x160   : > { %v966_v56 = vadd.f32 %v965_v24, %v877_v54  ;;  %v878_v9 = vpop.f32.mrf.mxu1  ;;  %v1289_v11 = vpop.f32.mrf.mxu0 }
 0x161   : > { %v879_v4 = vadd.f32 %v878_v9, %v3642_v49 }
 0x162   : > { %v1199_v59 = vadd.f32 %v1198_v16, %v966_v56 }
 0x164   : > { %v3864_v28 = vadd.f32 %v1287_v58, %v1199_v59 }
 0x167   : > { %v967_v62 = vpop.f32.mrf.mxu2  ;;  %v1200_v13 = vpop.f32.mrf.mxu3 }
 0x168   : > { %v968_v47 = vadd.f32 %v967_v62, %v879_v4  ;;  %v881_v60 = vpop.f32.mrf.mxu1  ;;  %v1292_v53 = vpop.f32.mrf.mxu0 }
 0x169   : > { %v882_v25 = vadd.f32 %v881_v60, %v3519_v23  ;;  %v4231_v23 = vld [vmem:[#allocation4_spill] sm:$0xff] }
 0x16a   : > { %v1201_v3 = vadd.f32 %v1200_v13, %v968_v47 }
 0x16b   : > { %2567 = vmatmul.msk.bf16.vlgmr.msra.gmra.mxu1 %vm3405_vm5, %v3867_v46  ;;  %2823 = vmatmul.msk.bf16.vlgmr.msra.gmra.mxu0 %vm3405_vm5, %v3436_v1 }
 0x16c   : > { %2760 = vmatmul.msk.bf16.vlgmr.msra.gmra.mxu2 %vm3101_vm3, %v3205_v15  ;;  %1711 = vmatmul.bf16.vlgmr.msra.gmra.mxu3 %v3434_v0  ;;  %v3879_v49 = vadd.f32 %v1289_v11, %v1201_v3  ;;  %v4234_v11 = vld [vmem:[#allocation19_spill] sm:$0xff] }
 0x16f   : > { %v970_v58 = vpop.f32.mrf.mxu2  ;;  %v1203_v54 = vpop.f32.mrf.mxu3 }
 0x170   : > { %v971_v24 = vadd.f32 %v970_v58, %v882_v25  ;;  %v883_v16 = vpop.f32.mrf.mxu1  ;;  %v1294_v56 = vpop.f32.mrf.mxu0 }
 0x171   : > { %v884_v30 = vadd.f32 %v883_v16, %v3536_v8  ;;  %v4236_v16 = vld [vmem:[#allocation21_spill] sm:$0xff] }
 0x172   : > { %v1204_v9 = vadd.f32 %v1203_v54, %v971_v24 }
 0x174   : > { %v3882_v59 = vadd.f32 %v1292_v53, %v1204_v9  ;;  %v4232_v53 = vld [vmem:[#allocation10_spill] sm:$0xff] }
 0x177   : > { %v972_v39 = vpop.f32.mrf.mxu2  ;;  %v1205_v4 = vpop.f32.mrf.mxu3 }
 0x178   : > { %v973_v62 = vadd.f32 %v972_v39, %v884_v30  ;;  %v886_v15 = vpop.f32.mrf.mxu1  ;;  %v1297_v13 = vpop.f32.mrf.mxu0 }
 0x179   : > { %v887_v47 = vadd.f32 %v886_v15, %v4234_v11  ;;  %v4238_v15 = vld [vmem:[#allocation6_spill] sm:$0xff]  ;;  %v4241_v11 = vld [vmem:[#allocation25_spill] sm:$0xff] }
 0x17a   : > { %v1206_v0 = vadd.f32 %v1205_v4, %v973_v62 }
 0x17b   : > { %2570 = vmatmul.msk.bf16.gmra.mxu1 %vm3405_vm5, %v3318_v21  ;;  %2826 = vmatmul.msk.bf16.gmra.mxu0 %vm3405_vm5, %v3453_v57 }
 0x17c   : > { %2764 = vmatmul.msk.bf16.gmra.mxu2 %vm3101_vm3, %v4231_v23  ;;  %1716 = vmatmul.bf16.gmra.mxu3 %v4232_v53  ;;  %v3895_v8 = vadd.f32 %v1294_v56, %v1206_v0  ;;  %v4237_v56 = vld [vmem:[#allocation12_spill] sm:$0xff] }
 0x17e   : > { %4233 = vst [vmem:[#allocation4_spill] sm:$0xff] %v3895_v8 }
 0x17f   : > { %v975_v60 = vpop.f32.mrf.mxu2  ;;  %v1208_v3 = vpop.f32.mrf.mxu3 }
 0x180   : > { %v976_v25 = vadd.f32 %v975_v60, %v887_v47  ;;  %v888_v58 = vpop.f32.mrf.mxu1  ;;  %v1299_v54 = vpop.f32.mrf.mxu0 }
 0x181   : > { %v889_v9 = vadd.f32 %v888_v58, %v4236_v16 }
 0x182   : > { %v1209_v21 = vadd.f32 %v1208_v3, %v976_v25 }
 0x184   : > { %v3898_v24 = vadd.f32 %v1297_v13, %v1209_v21  ;;  %v4239_v13 = vld [vmem:[#allocation11_spill] sm:$0xff] }
 0x186   : > { %4235 = vst [vmem:[#allocation10_spill] sm:$0xff] %v3898_v24 }
 0x187   : > { %v977_v30 = vpop.f32.mrf.mxu2  ;;  %v1210_v39 = vpop.f32.mrf.mxu3 }
 0x188   : > { %v978_v4 = vadd.f32 %v977_v30, %v889_v9  ;;  %v891_v62 = vpop.f32.mrf.mxu1  ;;  %v1302_v23 = vpop.f32.mrf.mxu0  ;;  %v4243_v9 = vld [vmem:[#allocation27_spill] sm:$0xff] }
 0x189   : > { %v892_v47 = vadd.f32 %v891_v62, %v4241_v11  ;;  %v4245_v62 = vld [vmem:[#allocation2_spill] sm:$0xff]  ;;  %v4248_v11 = vld [vmem:[#allocation31_spill] sm:$0xff] }
 0x18a   : > { %v1211_v53 = vadd.f32 %v1210_v39, %v978_v4 }
 0x18b   : > { %2573 = vmatmul.msk.bf16.gmra.mxu1 %vm3405_vm5, %v3436_v1  ;;  %2829 = vmatmul.msk.bf16.gmra.mxu0 %vm3405_vm5, %v4237_v56 }
 0x18c   : > { %2768 = vmatmul.msk.bf16.gmra.mxu2 %vm3101_vm3, %v4238_v15  ;;  %1721 = vmatmul.bf16.gmra.mxu3 %v4239_v13  ;;  %v3911_v0 = vadd.f32 %v1299_v54, %v1211_v53  ;;  %v4244_v54 = vld [vmem:[#allocation14_spill] sm:$0xff] }
 0x18e   : > { %4240 = vst [vmem:[#allocation19_spill] sm:$0xff] %v3911_v0 }
 0x18f   : > { %v980_v60 = vpop.f32.mrf.mxu2  ;;  %v1213_v3 = vpop.f32.mrf.mxu3 }
 0x190   : > { %v981_v25 = vadd.f32 %v980_v60, %v892_v47  ;;  %v893_v58 = vpop.f32.mrf.mxu1  ;;  %v1304_v21 = vpop.f32.mrf.mxu0 }
 0x191   : > { %v894_v30 = vadd.f32 %v893_v58, %v4243_v9  ;;  %v4250_v9 = vld [vmem:[#allocation33_spill] sm:$0xff] }
 0x192   : > { %v1214_v1 = vadd.f32 %v1213_v3, %v981_v25 }
 0x194   : > { %v3914_v16 = vadd.f32 %v1302_v23, %v1214_v1  ;;  %v4246_v23 = vld [vmem:[#allocation13_spill] sm:$0xff] }
 0x196   : > { %4242 = vst [vmem:[#allocation21_spill] sm:$0xff] %v3914_v16 }
 0x197   : > { %v982_v39 = vpop.f32.mrf.mxu2  ;;  %v1215_v4 = vpop.f32.mrf.mxu3 }
 0x198   : > { %v983_v24 = vadd.f32 %v982_v39, %v894_v30  ;;  %v896_v15 = vpop.f32.mrf.mxu1  ;;  %v1307_v8 = vpop.f32.mrf.mxu0 }
 0x199   : > { %v897_v47 = vadd.f32 %v896_v15, %v4248_v11  ;;  %v4252_v15 = vld [vmem:[#allocation3_spill] sm:$0xff] }
 0x19a   : > { %v1216_v13 = vadd.f32 %v1215_v4, %v983_v24  ;;  %v4255_v11 = vld [vmem:[#allocation15_spill] sm:$0xff] }
 0x19b   : > { %2576 = vmatmul.msk.bf16.gmra.mxu1 %vm3405_vm5, %v3453_v57  ;;  %2832 = vmatmul.msk.bf16.gmra.mxu0 %vm3405_vm5, %v4244_v54 }
 0x19c   : > { %2772 = vmatmul.msk.bf16.gmra.mxu2 %vm3101_vm3, %v4245_v62  ;;  %1726 = vmatmul.bf16.gmra.mxu3 %v4246_v23  ;;  %v3927_v53 = vadd.f32 %v1304_v21, %v1216_v13  ;;  %v4251_v21 = vld [vmem:[#allocation18_spill] sm:$0xff] }
 0x19e   : > { %4247 = vst [vmem:[#allocation12_spill] sm:$0xff] %v3927_v53 }
 0x19f   : > { %v985_v60 = vpop.f32.mrf.mxu2  ;;  %v1218_v24 = vpop.f32.mrf.mxu3 }
 0x1a0   : > { %v986_v3 = vadd.f32 %v985_v60, %v897_v47  ;;  %v898_v25 = vpop.f32.mrf.mxu1  ;;  %v1309_v58 = vpop.f32.mrf.mxu0 }
 0x1a1   : > { %v899_v30 = vadd.f32 %v898_v25, %v4250_v9  ;;  %v4257_v9 = vld [vmem:[#allocation16_spill] sm:$0xff] }
 0x1a2   : > { %v1219_v57 = vadd.f32 %v1218_v24, %v986_v3 }
 0x1a4   : > { %v3930_v1 = vadd.f32 %v1307_v8, %v1219_v57  ;;  %v4253_v8 = vld [vmem:[#allocation17_spill] sm:$0xff] }
 0x1a6   : > { %4249 = vst [vmem:[#allocation6_spill] sm:$0xff] %v3930_v1 }
 0x1a7   : > { %v987_v39 = vpop.f32.mrf.mxu2  ;;  %v1220_v4 = vpop.f32.mrf.mxu3 }
 0x1a8   : > { %v988_v16 = vadd.f32 %v987_v39, %v899_v30  ;;  %v901_v62 = vpop.f32.mrf.mxu1  ;;  %v1312_v0 = vpop.f32.mrf.mxu0 }
 0x1a9   : > { %v902_v47 = vadd.f32 %v901_v62, %v4255_v11  ;;  %v4259_v62 = vld [vmem:[#allocation5_spill] sm:$0xff]  ;;  %v4262_v11 = vld [vmem:[#allocation20_spill] sm:$0xff] }
 0x1aa   : > { %v1221_v23 = vadd.f32 %v1220_v4, %v988_v16 }
 0x1ab   : > { %2579 = vmatmul.msk.bf16.gmra.mxu1 %vm3405_vm5, %v4237_v56  ;;  %2835 = vmatmul.msk.bf16.gmra.mxu0 %vm3405_vm5, %v4251_v21 }
 0x1ac   : > { %2776 = vmatmul.msk.bf16.gmra.mxu2 %vm3101_vm3, %v4252_v15  ;;  %1731 = vmatmul.bf16.gmra.mxu3 %v4253_v8  ;;  %v3943_v13 = vadd.f32 %v1309_v58, %v1221_v23  ;;  %v4258_v58 = vld [vmem:[#allocation24_spill] sm:$0xff] }
 0x1ae   : > { %4254 = vst [vmem:[#allocation11_spill] sm:$0xff] %v3943_v13 }
 0x1af   : > { %v990_v60 = vpop.f32.mrf.mxu2  ;;  %v1223_v16 = vpop.f32.mrf.mxu3 }
 0x1b0   : > { %v991_v24 = vadd.f32 %v990_v60, %v902_v47  ;;  %v903_v3 = vpop.f32.mrf.mxu1  ;;  %v1314_v25 = vpop.f32.mrf.mxu0 }
 0x1b1   : > { %v904_v30 = vadd.f32 %v903_v3, %v4257_v9  ;;  %v4264_v9 = vld [vmem:[#allocation22_spill] sm:$0xff] }
 0x1b2   : > { %v1224_v56 = vadd.f32 %v1223_v16, %v991_v24 }
 0x1b4   : > { %v3946_v57 = vadd.f32 %v1312_v0, %v1224_v56  ;;  %v4260_v0 = vld [vmem:[#allocation23_spill] sm:$0xff] }
 0x1b6   : > { %4256 = vst [vmem:[#allocation25_spill] sm:$0xff] %v3946_v57 }
 0x1b7   : > { %v992_v39 = vpop.f32.mrf.mxu2  ;;  %v1225_v4 = vpop.f32.mrf.mxu3 }
 0x1b8   : > { %v993_v1 = vadd.f32 %v992_v39, %v904_v30  ;;  %v906_v15 = vpop.f32.mrf.mxu1  ;;  %v1317_v53 = vpop.f32.mrf.mxu0 }
 0x1b9   : > { %v907_v47 = vadd.f32 %v906_v15, %v4262_v11  ;;  %v4266_v15 = vld [vmem:[#allocation7_spill] sm:$0xff]  ;;  %v4268_v11 = vld [vmem:[#allocation26_spill] sm:$0xff] }
 0x1ba   : > { %v1226_v8 = vadd.f32 %v1225_v4, %v993_v1 }
 0x1bb   : > { %2582 = vmatmul.msk.bf16.gmra.mxu1 %vm3405_vm5, %v4244_v54  ;;  %2838 = vmatmul.msk.bf16.gmra.mxu0 %vm3405_vm5, %v4258_v58 }
 0x1bc   : > { %2780 = vmatmul.msk.bf16.gmra.mxu2 %vm3101_vm3, %v4259_v62  ;;  %1736 = vmatmul.bf16.gmra.mxu3 %v4260_v0  ;;  %v3959_v23 = vadd.f32 %v1314_v25, %v1226_v8  ;;  %v4265_v25 = vld [vmem:[#allocation30_spill] sm:$0xff] }
 0x1be   : > { %4261 = vst [vmem:[#allocation27_spill] sm:$0xff] %v3959_v23 }
 0x1bf   : > { %v995_v60 = vpop.f32.mrf.mxu2  ;;  %v1228_v1 = vpop.f32.mrf.mxu3 }
 0x1c0   : > { %v996_v16 = vadd.f32 %v995_v60, %v907_v47  ;;  %v908_v24 = vpop.f32.mrf.mxu1  ;;  %v1319_v3 = vpop.f32.mrf.mxu0 }
 0x1c1   : > { %v909_v30 = vadd.f32 %v908_v24, %v4264_v9  ;;  %v4269_v9 = vld [vmem:[#allocation28_spill] sm:$0xff] }
 0x1c2   : > { %v1229_v54 = vadd.f32 %v1228_v1, %v996_v16 }
 0x1c4   : > { %v3962_v56 = vadd.f32 %v1317_v53, %v1229_v54  ;;  %v4267_v53 = vld [vmem:[#allocation29_spill] sm:$0xff] }
 0x1c6   : > { %4263 = vst [vmem:[#allocation14_spill] sm:$0xff] %v3962_v56 }
 0x1c7   : > { %v997_v39 = vpop.f32.mrf.mxu2  ;;  %v1230_v4 = vpop.f32.mrf.mxu3 }
 0x1c8   : > { %v998_v57 = vadd.f32 %v997_v39, %v909_v30  ;;  %v911_v62 = vpop.f32.mrf.mxu1  ;;  %v1322_v13 = vpop.f32.mrf.mxu0 }
 0x1c9   : > { %v912_v47 = vadd.f32 %v911_v62, %v4268_v11  ;;  %v4271_v62 = vld [vmem:[#allocation32_spill] sm:$0xff] }
 0x1ca   : > { %v1231_v0 = vadd.f32 %v1230_v4, %v998_v57 }
 0x1cb   : > { %2585 = vmatmul.msk.bf16.gmra.mxu1 %vm3405_vm5, %v4251_v21  ;;  %2841 = vmatmul.msk.bf16.gmra.mxu0 %vm3405_vm5, %v4265_v25 }
 0x1cc   : > { %2784 = vmatmul.msk.bf16.gmra.mxu2 %vm3101_vm3, %v4266_v15  ;;  %1741 = vmatmul.bf16.gmra.mxu3 %v4267_v53  ;;  %v3975_v8 = vadd.f32 %v1319_v3, %v1231_v0  ;;  %v4270_v3 = vld [vmem:[#allocation35_spill] sm:$0xff] }
 0x1cf   : > { %v1000_v60 = vpop.f32.mrf.mxu2  ;;  %v1233_v57 = vpop.f32.mrf.mxu3 }
 0x1d0   : > { %v1001_v1 = vadd.f32 %v1000_v60, %v912_v47  ;;  %v913_v16 = vpop.f32.mrf.mxu1  ;;  %v1324_v24 = vpop.f32.mrf.mxu0 }
 0x1d1   : > { %v914_v30 = vadd.f32 %v913_v16, %v4269_v9  ;;  %v4272_v16 = vld [vmem:[#allocation34_spill] sm:$0xff] }
 0x1d2   : > { %v1234_v21 = vadd.f32 %v1233_v57, %v1001_v1 }
 0x1d4   : > { %v3978_v54 = vadd.f32 %v1322_v13, %v1234_v21 }
 0x1d7   : > { %v1002_v39 = vpop.f32.mrf.mxu2  ;;  %v1235_v4 = vpop.f32.mrf.mxu3 }
 0x1d8   : > { %v1003_v56 = vadd.f32 %v1002_v39, %v914_v30  ;;  %v916_v15 = vpop.f32.mrf.mxu1  ;;  %v1327_v23 = vpop.f32.mrf.mxu0 }
 0x1d9   : > { %v917_v0 = vadd.f32 %v916_v15, %v4271_v62 }
 0x1da   : > { %v1236_v53 = vadd.f32 %v1235_v4, %v1003_v56 }
 0x1db   : > { %2588 = vmatmul.msk.bf16.gmra.mxu1 %vm3405_vm5, %v4258_v58  ;;  %2844 = vmatmul.msk.bf16.gmra.mxu0 %vm3405_vm5, %v4270_v3 }
 0x1dc   : > { %2788 = vmatmul.msk.bf16.gmra.mxu2 %vm3101_vm3, %v3105_v33  ;;  %1746 = vmatmul.bf16.gmra.mxu3 %v3653_v37  ;;  %v3991_v13 = vadd.f32 %v1324_v24, %v1236_v53 }
 0x1df   : > { %v1005_v11 = vpop.f32.mrf.mxu2  ;;  %v1238_v56 = vpop.f32.mrf.mxu3 }
 0x1e0   : > { %v1006_v47 = vadd.f32 %v1005_v11, %v917_v0  ;;  %v918_v60 = vpop.f32.mrf.mxu1  ;;  %v1329_v57 = vpop.f32.mrf.mxu0 }
 0x1e1   : > { %v919_v21 = vadd.f32 %v918_v60, %v4272_v16 }
 0x1e2   : > { %v1239_v58 = vadd.f32 %v1238_v56, %v1006_v47 }
 0x1e4   : > { %v3994_v1 = vadd.f32 %v1327_v23, %v1239_v58 }
 0x1e7   : > { %v1007_v9 = vpop.f32.mrf.mxu2  ;;  %v1240_v30 = vpop.f32.mrf.mxu3 }
 0x1e8   : > { %v1008_v39 = vadd.f32 %v1007_v9, %v919_v21  ;;  %v1341_v33 = vpop.f32.mrf.mxu1  ;;  %v1801_v37 = vpop.f32.mrf.mxu0 }
 0x1e9   : > { %v1342_v11 = vadd.f32 %v1341_v33, %v3681_v2 }
 0x1ea   : > { %v1241_v24 = vadd.f32 %v1240_v30, %v1008_v39 }
 0x1eb   : > { %2591 = vmatmul.msk.bf16.gmra.mxu1 %vm3405_vm5, %v4265_v25  ;;  %2847 = vmatmul.msk.bf16.gmra.mxu0 %vm3405_vm5, %v3688_v41 }
 0x1ec   : > { %2792 = vmatmul.msk.bf16.gmra.mxu2 %vm3101_vm3, %v3209_v17  ;;  %1751 = vmatmul.bf16.gmra.mxu3 %v3686_v29  ;;  %v4007_v23 = vadd.f32 %v1329_v57, %v1241_v24 }
 0x1ef   : > { %v1623_v4 = vpop.f32.mrf.mxu2  ;;  %v1712_v15 = vpop.f32.mrf.mxu3 }
 0x1f0   : > { %v1713_v53 = vadd.f32 %v1712_v15, %v1623_v4  ;;  %v1343_v62 = vpop.f32.mrf.mxu1  ;;  %v1803_v0 = vpop.f32.mrf.mxu0 }
 0x1f1   : > { %v1344_v58 = vadd.f32 %v1343_v62, %v3699_v43 }
 0x1f2   : > { %v1802_v25 = vadd.f32 %v1801_v37, %v1713_v53 }
 0x1f4   : > { %v1881_v17 = vadd.f32 %v1802_v25, %v1342_v11 }
 0x1f6   : > { %1913 = vst [vmem:[%s4015_s21] sm:$0xff] %v1881_v17  ;;  %v1982_v21 = vmul.f32 %v1881_v17, %v1881_v17 }
 0x1f7   : > { %v1625_v29 = vpop.f32.mrf.mxu2  ;;  %v1714_v56 = vpop.f32.mrf.mxu3 }
 0x1f8   : > { %v1715_v47 = vadd.f32 %v1714_v56, %v1625_v29  ;;  %v1346_v60 = vpop.f32.mrf.mxu1  ;;  %v1806_v57 = vpop.f32.mrf.mxu0 }
 0x1f9   : > { %v1347_v4 = vadd.f32 %v1346_v60, %v3704_v10 }
 0x1fa   : > { %v1804_v16 = vadd.f32 %v1803_v0, %v1715_v47 }
 0x1fb   : > { %2594 = vmatmul.msk.bf16.gmra.mxu1 %vm3405_vm5, %v4270_v3  ;;  %2850 = vmatmul.msk.bf16.gmra.mxu0 %vm3405_vm5, %v3711_v44 }
 0x1fc   : > { %v1882_v2 = vadd.f32 %v1804_v16, %v1344_v58  ;;  %2796 = vmatmul.msk.bf16.gmra.mxu2 %vm3101_vm3, %v3313_v14  ;;  %1756 = vmatmul.bf16.gmra.mxu3 %v3709_v6 }
 0x1fe   : > { %1914 = vst [vmem:[%s4015_s21 + $0x8] sm:$0xff] %v1882_v2  ;;  %v1945_v43 = vadd.f32 %v1882_v2, %v1881_v17  ;;  %v1983_v9 = vmul.f32 %v1882_v2, %v1882_v2 }
 0x1ff   : > { %v1628_v30 = vpop.f32.mrf.mxu2  ;;  %v1717_v39 = vpop.f32.mrf.mxu3 }
 0x200   : > { %v2014_v33 = vadd.f32 %v1983_v9, %v1982_v21  ;;  %v1718_v3 = vadd.f32 %v1717_v39, %v1628_v30  ;;  %v1348_v37 = vpop.f32.mrf.mxu1  ;;  %v1808_v24 = vpop.f32.mrf.mxu0 }
 0x201   : > { %v1349_v56 = vadd.f32 %v1348_v37, %v3728_v22 }
 0x202   : > { %v1807_v15 = vadd.f32 %v1806_v57, %v1718_v3 }
 0x204   : > { %v1883_v53 = vadd.f32 %v1807_v15, %v1347_v4  ;;  %v4273_v15 = vld [vmem:[#allocation36_spill] sm:$0xff] }
 0x206   : > { %1915 = vst [vmem:[%s4015_s21 + $0x10] sm:$0xff] %v1883_v53  ;;  %v1946_v62 = vadd.f32 %v1945_v43, %v1883_v53  ;;  %v1984_v14 = vmul.f32 %v1883_v53, %v1883_v53 }
 0x207   : > { %v1630_v0 = vpop.f32.mrf.mxu2  ;;  %v1719_v6 = vpop.f32.mrf.mxu3 }
 0x208   : > { %v2015_v11 = vadd.f32 %v2014_v33, %v1984_v14  ;;  %v1720_v25 = vadd.f32 %v1719_v6, %v1630_v0  ;;  %v1351_v17 = vpop.f32.mrf.mxu1  ;;  %v1811_v29 = vpop.f32.mrf.mxu0 }
 0x209   : > { %v1352_v43 = vadd.f32 %v1351_v17, %v3739_v40 }
 0x20a   : > { %v1809_v47 = vadd.f32 %v1808_v24, %v1720_v25 }
 0x20b   : > { %2597 = vmatmul.msk.bf16.gmra.mxu1 %vm3405_vm5, %v3688_v41  ;;  %2853 = vmatmul.msk.bf16.gmra.mxu0 %vm3405_vm5, %v3746_v5 }
 0x20c   : > { %v1884_v10 = vadd.f32 %v1809_v47, %v1349_v56  ;;  %2800 = vmatmul.msk.bf16.gmra.mxu2 %vm3101_vm3, %v3384_v20  ;;  %1761 = vmatmul.bf16.gmra.mxu3 %v3744_v7 }
 0x20e   : > { %1916 = vst [vmem:[%s4015_s21 + $0x18] sm:$0xff] %v1884_v10  ;;  %v1947_v60 = vadd.f32 %v1946_v62, %v1884_v10  ;;  %v1985_v22 = vmul.f32 %v1884_v10, %v1884_v10 }
 0x20f   : > { %v1633_v57 = vpop.f32.mrf.mxu2  ;;  %v1722_v58 = vpop.f32.mrf.mxu3 }
 0x210   : > { %v2016_v16 = vadd.f32 %v2015_v11, %v1985_v22  ;;  %v1723_v2 = vadd.f32 %v1722_v58, %v1633_v57  ;;  %v1353_v41 = vpop.f32.mrf.mxu1  ;;  %v1813_v21 = vpop.f32.mrf.mxu0 }
 0x211   : > { %v1354_v53 = vadd.f32 %v1353_v41, %v4273_v15 }
 0x212   : > { %v1812_v9 = vadd.f32 %v1811_v29, %v1723_v2 }
 0x214   : > { %v1885_v30 = vadd.f32 %v1812_v9, %v1352_v43 }
 0x216   : > { %1917 = vst [vmem:[%s4015_s21 + $0x20] sm:$0xff] %v1885_v30  ;;  %v1948_v39 = vadd.f32 %v1947_v60, %v1885_v30  ;;  %v1986_v33 = vmul.f32 %v1885_v30, %v1885_v30 }
 0x217   : > { %v1635_v20 = vpop.f32.mrf.mxu2  ;;  %v1724_v3 = vpop.f32.mrf.mxu3 }
 0x218   : > { %v2017_v7 = vadd.f32 %v2016_v16, %v1986_v33  ;;  %v1725_v37 = vadd.f32 %v1724_v3, %v1635_v20  ;;  %v1356_v24 = vpop.f32.mrf.mxu1  ;;  %v1816_v4 = vpop.f32.mrf.mxu0 }
 0x219   : > { %v1357_v56 = vadd.f32 %v1356_v24, %v3762_v26 }
 0x21a   : > { %v1814_v62 = vadd.f32 %v1813_v21, %v1725_v37 }
 0x21b   : > { %2600 = vmatmul.msk.bf16.gmra.mxu1 %vm3405_vm5, %v3711_v44  ;;  %2856 = vmatmul.msk.bf16.gmra.mxu0 %vm3405_vm5, %v3769_v52 }
 0x21c   : > { %v1886_v40 = vadd.f32 %v1814_v62, %v1354_v53  ;;  %2804 = vmatmul.msk.bf16.gmra.mxu2 %vm3101_vm3, %v3107_v34  ;;  %1766 = vmatmul.bf16.gmra.mxu3 %v3767_v63 }
 0x21e   : > { %1918 = vst [vmem:[%s4015_s21 + $0x28] sm:$0xff] %v1886_v40  ;;  %v1949_v14 = vadd.f32 %v1948_v39, %v1886_v40  ;;  %v1987_v0 = vmul.f32 %v1886_v40, %v1886_v40 }
 0x21f   : > { %v1638_v6 = vpop.f32.mrf.mxu2  ;;  %v1727_v11 = vpop.f32.mrf.mxu3 }
 0x220   : > { %v2018_v25 = vadd.f32 %v2017_v7, %v1987_v0  ;;  %v1728_v17 = vadd.f32 %v1727_v11, %v1638_v6  ;;  %v1358_v44 = vpop.f32.mrf.mxu1  ;;  %v1818_v29 = vpop.f32.mrf.mxu0 }
 0x221   : > { %v1359_v41 = vadd.f32 %v1358_v44, %v3785_v36 }
 0x222   : > { %v1817_v47 = vadd.f32 %v1816_v4, %v1728_v17 }
 0x224   : > { %v1887_v10 = vadd.f32 %v1817_v47, %v1357_v56 }
 0x226   : > { %1919 = vst [vmem:[%s4015_s21 + $0x30] sm:$0xff] %v1887_v10  ;;  %v1950_v60 = vadd.f32 %v1949_v14, %v1887_v10  ;;  %v1988_v22 = vmul.f32 %v1887_v10, %v1887_v10 }
 0x227   : > { %v1640_v34 = vpop.f32.mrf.mxu2  ;;  %v1729_v57 = vpop.f32.mrf.mxu3 }
 0x228   : > { %v2019_v63 = vadd.f32 %v2018_v25, %v1988_v22  ;;  %v1730_v58 = vadd.f32 %v1729_v57, %v1640_v34  ;;  %v1361_v16 = vpop.f32.mrf.mxu1  ;;  %v1821_v2 = vpop.f32.mrf.mxu0 }
 0x229   : > { %v1362_v3 = vadd.f32 %v1361_v16, %v3796_v50 }
 0x22a   : > { %v1819_v21 = vadd.f32 %v1818_v29, %v1730_v58 }
 0x22b   : > { %2603 = vmatmul.msk.bf16.gmra.mxu1 %vm3405_vm5, %v3746_v5  ;;  %2859 = vmatmul.msk.bf16.gmra.mxu0 %vm3405_vm5, %v3804_v31 }
 0x22c   : > { %v1888_v26 = vadd.f32 %v1819_v21, %v1359_v41  ;;  %2808 = vmatmul.msk.bf16.gmra.mxu2 %vm3101_vm3, %v3211_v18  ;;  %1771 = vmatmul.bf16.gmra.mxu3 %v3802_v12  ;;  %v4274_v41 = vld [vmem:[#allocation8_spill] sm:$0xff] }
 0x22e   : > { %1920 = vst [vmem:[%s4015_s21 + $0x38] sm:$0xff] %v1888_v26  ;;  %v1951_v43 = vadd.f32 %v1950_v60, %v1888_v26  ;;  %v1989_v36 = vmul.f32 %v1888_v26, %v1888_v26 }
 0x22f   : > { %v1643_v9 = vpop.f32.mrf.mxu2  ;;  %v1732_v30 = vpop.f32.mrf.mxu3 }
 0x230   : > { %v2020_v39 = vadd.f32 %v2019_v63, %v1989_v36  ;;  %v1733_v33 = vadd.f32 %v1732_v30, %v1643_v9  ;;  %v1363_v5 = vpop.f32.mrf.mxu1  ;;  %v1823_v20 = vpop.f32.mrf.mxu0 }
 0x231   : > { %v1364_v14 = vadd.f32 %v1363_v5, %v3814_v45 }
 0x232   : > { %v1822_v7 = vadd.f32 %v1821_v2, %v1733_v33 }
 0x234   : > { %v1889_v37 = vadd.f32 %v1822_v7, %v1362_v3 }
 0x236   : > { %1921 = vst [vmem:[%s4015_s21 + $0x40] sm:$0xff] %v1889_v37  ;;  %v1952_v24 = vadd.f32 %v1951_v43, %v1889_v37  ;;  %v1990_v4 = vmul.f32 %v1889_v37, %v1889_v37 }
 0x237   : > { %v1645_v18 = vpop.f32.mrf.mxu2  ;;  %v1734_v15 = vpop.f32.mrf.mxu3 }
 0x238   : > { %v2021_v12 = vadd.f32 %v2020_v39, %v1990_v4  ;;  %v1735_v53 = vadd.f32 %v1734_v15, %v1645_v18  ;;  %v1366_v62 = vpop.f32.mrf.mxu1  ;;  %v1826_v40 = vpop.f32.mrf.mxu0  ;;  %v4275_v18 = vld [vmem:[#allocation37_spill] sm:$0xff] }
 0x239   : > { %v1367_v56 = vadd.f32 %v1366_v62, %v3819_v61  ;;  %v4277_v62 = vmov 0.0|0.0  }
 0x23a   : > { %v1824_v0 = vadd.f32 %v1823_v20, %v1735_v53  ;;  %v4276_v53 = vld [vmem:[#allocation9_spill] sm:$0xff] }
 0x23b   : > { %2606 = vmatmul.msk.bf16.gmra.mxu1 %vm3405_vm5, %v3769_v52  ;;  %2862 = vmatmul.msk.bf16.gmra.mxu0 %vm3405_vm5, %v3827_v48 }
 0x23c   : > { %v1890_v50 = vadd.f32 %v1824_v0, %v1364_v14  ;;  %2812 = vmatmul.msk.bf16.gmra.mxu2 %vm3101_vm3, %v3315_v19  ;;  %1776 = vmatmul.bf16.gmra.mxu3 %v3825_v51 }
 0x23e   : > { %1922 = vst [vmem:[%s4015_s21 + $0x48] sm:$0xff] %v1890_v50  ;;  %v1953_v6 = vadd.f32 %v1952_v24, %v1890_v50  ;;  %v1991_v45 = vmul.f32 %v1890_v50, %v1890_v50 }
 0x23f   : > { %v1648_v11 = vpop.f32.mrf.mxu2  ;;  %v1737_v25 = vpop.f32.mrf.mxu3 }
 0x240   : > { %v2022_v17 = vadd.f32 %v2021_v12, %v1991_v45  ;;  %v1738_v44 = vadd.f32 %v1737_v25, %v1648_v11  ;;  %v1368_v52 = vpop.f32.mrf.mxu1  ;;  %v1828_v29 = vpop.f32.mrf.mxu0 }
 0x241   : > { %v1369_v16 = vadd.f32 %v1368_v52, %v3837_v35 }
 0x242   : > { %v1827_v47 = vadd.f32 %v1826_v40, %v1738_v44 }
 0x244   : > { %v1891_v10 = vadd.f32 %v1827_v47, %v1367_v56 }
 0x246   : > { %1923 = vst [vmem:[%s4015_s21 + $0x50] sm:$0xff] %v1891_v10  ;;  %v1954_v60 = vadd.f32 %v1953_v6, %v1891_v10  ;;  %v1992_v22 = vmul.f32 %v1891_v10, %v1891_v10 }
 0x247   : > { %v1650_v19 = vpop.f32.mrf.mxu2  ;;  %v1739_v34 = vpop.f32.mrf.mxu3 }
 0x248   : > { %v2023_v51 = vadd.f32 %v2022_v17, %v1992_v22  ;;  %v1740_v57 = vadd.f32 %v1739_v34, %v1650_v19  ;;  %v1371_v63 = vpop.f32.mrf.mxu1  ;;  %v1831_v58 = vpop.f32.mrf.mxu0 }
 0x249   : > { %v1372_v39 = vadd.f32 %v1371_v63, %v3842_v27 }
 0x24a   : > { %v1829_v2 = vadd.f32 %v1828_v29, %v1740_v57 }
 0x24b   : > { %2609 = vmatmul.msk.bf16.gmra.mxu1 %vm3405_vm5, %v3804_v31  ;;  %2865 = vmatmul.msk.bf16.gmra.mxu0 %vm3405_vm5, %v3850_v38 }
 0x24c   : > { %v1892_v61 = vadd.f32 %v1829_v2, %v1369_v16  ;;  %2816 = vmatmul.msk.bf16.gmra.mxu2 %vm3101_vm3, %v4274_v41  ;;  %1781 = vmatmul.bf16.gmra.mxu3 %v3848_v42 }
 0x24e   : > { %1924 = vst [vmem:[%s4015_s21 + $0x58] sm:$0xff] %v1892_v61  ;;  %v1955_v21 = vadd.f32 %v1954_v60, %v1892_v61  ;;  %v1993_v35 = vmul.f32 %v1892_v61, %v1892_v61 }
 0x24f   : > { %v1653_v26 = vpop.f32.mrf.mxu2  ;;  %v1742_v43 = vpop.f32.mrf.mxu3 }
 0x250   : > { %v2024_v36 = vadd.f32 %v2023_v51, %v1993_v35  ;;  %v1743_v9 = vadd.f32 %v1742_v43, %v1653_v26  ;;  %v1373_v31 = vpop.f32.mrf.mxu1  ;;  %v1833_v30 = vpop.f32.mrf.mxu0 }
 0x251   : > { %v1374_v15 = vadd.f32 %v1373_v31, %v4275_v18  ;;  %v4279_v18 = vld [vmem:[#allocation10_spill] sm:$0xff] }
 0x252   : > { %v1832_v38 = vadd.f32 %v1831_v58, %v1743_v9 }
 0x254   : > { %v1893_v33 = vadd.f32 %v1832_v38, %v1372_v39  ;;  %v4278_v39 = vld [vmem:[#allocation4_spill] sm:$0xff] }
 0x256   : > { %1925 = vst [vmem:[%s4015_s21 + $0x60] sm:$0xff] %v1893_v33  ;;  %v1956_v5 = vadd.f32 %v1955_v21, %v1893_v33  ;;  %v1994_v20 = vmul.f32 %v1893_v33, %v1893_v33 }
 0x257   : > { %v1655_v3 = vpop.f32.mrf.mxu2  ;;  %v1744_v7 = vpop.f32.mrf.mxu3 }
 0x258   : > { %v2025_v42 = vadd.f32 %v2024_v36, %v1994_v20  ;;  %v1745_v37 = vadd.f32 %v1744_v7, %v1655_v3  ;;  %v1376_v24 = vpop.f32.mrf.mxu1  ;;  %v1836_v4 = vpop.f32.mrf.mxu0 }
 0x259   : > { %v1377_v55 = vadd.f32 %v1376_v24, %v3864_v28 }
 0x25a   : > { %v1834_v12 = vadd.f32 %v1833_v30, %v1745_v37 }
 0x25b   : > { %2612 = vmatmul.msk.bf16.gmra.mxu1 %vm3405_vm5, %v3827_v48  ;;  %2868 = vmatmul.msk.bf16.gmra.mxu0 %vm3405_vm5, %v3867_v46 }
 0x25c   : > { %v1894_v27 = vadd.f32 %v1834_v12, %v1374_v15  ;;  %2820 = vmatmul.msk.bf16.gmra.mxu2 %vm3101_vm3, %v4276_v53  ;;  %1786 = vmatmul.bf16.gmra.mxu3 %v4277_v62 }
 0x25e   : > { %1926 = vst [vmem:[%s4015_s21 + $0x68] sm:$0xff] %v1894_v27  ;;  %v1957_v40 = vadd.f32 %v1956_v5, %v1894_v27  ;;  %v1995_v14 = vmul.f32 %v1894_v27, %v1894_v27 }
 0x25f   : > { %v1658_v0 = vpop.f32.mrf.mxu2  ;;  %v1747_v50 = vpop.f32.mrf.mxu3 }
 0x260   : > { %v2026_v6 = vadd.f32 %v2025_v42, %v1995_v14  ;;  %v1748_v45 = vadd.f32 %v1747_v50, %v1658_v0  ;;  %v1378_v48 = vpop.f32.mrf.mxu1  ;;  %v1838_v11 = vpop.f32.mrf.mxu0 }
 0x261   : > { %v1379_v60 = vadd.f32 %v1378_v48, %v3879_v49  ;;  %v4280_v48 = vld [vmem:[#allocation19_spill] sm:$0xff] }
 0x262   : > { %v1837_v46 = vadd.f32 %v1836_v4, %v1748_v45 }
 0x264   : > { %v1895_v25 = vadd.f32 %v1837_v46, %v1377_v55 }
 0x266   : > { %1927 = vst [vmem:[%s4015_s21 + $0x70] sm:$0xff] %v1895_v25  ;;  %v1958_v17 = vadd.f32 %v1957_v40, %v1895_v25  ;;  %v1996_v32 = vmul.f32 %v1895_v25, %v1895_v25 }
 0x267   : > { %v1660_v44 = vpop.f32.mrf.mxu2  ;;  %v1749_v52 = vpop.f32.mrf.mxu3 }
 0x268   : > { %v2027_v29 = vadd.f32 %v2026_v6, %v1996_v32  ;;  %v1750_v56 = vadd.f32 %v1749_v52, %v1660_v44  ;;  %v1381_v47 = vpop.f32.mrf.mxu1  ;;  %v1841_v10 = vpop.f32.mrf.mxu0 }
 0x269   : > { %v1382_v61 = vadd.f32 %v1381_v47, %v3882_v59 }
 0x26a   : > { %v1839_v22 = vadd.f32 %v1838_v11, %v1750_v56 }
 0x26c   : > { %v1896_v19 = vadd.f32 %v1839_v22, %v1379_v60 }
 0x26e   : > { %1928 = vst [vmem:[%s4015_s21 + $0x78] sm:$0xff] %v1896_v19  ;;  %v1959_v34 = vadd.f32 %v1958_v17, %v1896_v19  ;;  %v1997_v51 = vmul.f32 %v1896_v19, %v1896_v19 }
 0x26f   : > { %v1663_v28 = vpop.f32.mrf.mxu2  ;;  %v1752_v57 = vpop.f32.mrf.mxu3 }
 0x270   : > { %v2028_v63 = vadd.f32 %v2027_v29, %v1997_v51  ;;  %v1753_v58 = vadd.f32 %v1752_v57, %v1663_v28  ;;  %v1383_v16 = vpop.f32.mrf.mxu1  ;;  %v1843_v2 = vpop.f32.mrf.mxu0 }
 0x271   : > { %v1384_v38 = vadd.f32 %v1383_v16, %v4278_v39 }
 0x272   : > { %v1842_v41 = vadd.f32 %v1841_v10, %v1753_v58  ;;  %v4281_v10 = vld [vmem:[#allocation21_spill] sm:$0xff] }
 0x274   : > { %v1897_v21 = vadd.f32 %v1842_v41, %v1382_v61  ;;  %v4282_v61 = vld [vmem:[#allocation12_spill] sm:$0xff] }
 0x276   : > { %1929 = vst [vmem:[%s4015_s21 + $0x80] sm:$0xff] %v1897_v21  ;;  %v1960_v35 = vadd.f32 %v1959_v34, %v1897_v21  ;;  %v1998_v26 = vmul.f32 %v1897_v21, %v1897_v21 }
 0x277   : > { %v1665_v49 = vpop.f32.mrf.mxu2  ;;  %v1754_v43 = vpop.f32.mrf.mxu3 }
 0x278   : > { %v2029_v36 = vadd.f32 %v2028_v63, %v1998_v26  ;;  %v1755_v9 = vadd.f32 %v1754_v43, %v1665_v49  ;;  %v1386_v31 = vpop.f32.mrf.mxu1  ;;  %v1846_v30 = vpop.f32.mrf.mxu0 }
 0x279   : > { %v1387_v15 = vadd.f32 %v1386_v31, %v4279_v18 }
 0x27a   : > { %v1844_v33 = vadd.f32 %v1843_v2, %v1755_v9 }
 0x27c   : > { %v1898_v5 = vadd.f32 %v1844_v33, %v1384_v38  ;;  %v4283_v38 = vld [vmem:[#allocation6_spill] sm:$0xff] }
 0x27e   : > { %1930 = vst [vmem:[%s4015_s21 + $0x88] sm:$0xff] %v1898_v5  ;;  %v1961_v20 = vadd.f32 %v1960_v35, %v1898_v5  ;;  %v1999_v3 = vmul.f32 %v1898_v5, %v1898_v5 }
 0x27f   : > { %v1668_v59 = vpop.f32.mrf.mxu2  ;;  %v1757_v7 = vpop.f32.mrf.mxu3 }
 0x280   : > { %v2030_v42 = vadd.f32 %v2029_v36, %v1999_v3  ;;  %v1758_v37 = vadd.f32 %v1757_v7, %v1668_v59  ;;  %v1388_v24 = vpop.f32.mrf.mxu1  ;;  %v1848_v4 = vpop.f32.mrf.mxu0 }
 0x281   : > { %v1389_v11 = vadd.f32 %v1388_v24, %v4280_v48 }
 0x282   : > { %v1847_v12 = vadd.f32 %v1846_v30, %v1758_v37 }
 0x284   : > { %v1899_v27 = vadd.f32 %v1847_v12, %v1387_v15  ;;  %v4284_v15 = vld [vmem:[#allocation11_spill] sm:$0xff] }
 0x286   : > { %1931 = vst [vmem:[%s4015_s21 + $0x90] sm:$0xff] %v1899_v27  ;;  %v1962_v53 = vadd.f32 %v1961_v20, %v1899_v27  ;;  %v2000_v62 = vmul.f32 %v1899_v27, %v1899_v27 }
 0x287   : > { %v1670_v40 = vpop.f32.mrf.mxu2  ;;  %v1759_v14 = vpop.f32.mrf.mxu3 }
 0x288   : > { %v2031_v0 = vadd.f32 %v2030_v42, %v2000_v62  ;;  %v1760_v50 = vadd.f32 %v1759_v14, %v1670_v40  ;;  %v1391_v6 = vpop.f32.mrf.mxu1  ;;  %v1851_v45 = vpop.f32.mrf.mxu0 }
 0x289   : > { %v1392_v60 = vadd.f32 %v1391_v6, %v4281_v10 }
 0x28a   : > { %v1849_v55 = vadd.f32 %v1848_v4, %v1760_v50 }
 0x28c   : > { %v1900_v46 = vadd.f32 %v1849_v55, %v1389_v11  ;;  %v4285_v11 = vld [vmem:[#allocation25_spill] sm:$0xff] }
 0x28e   : > { %1932 = vst [vmem:[%s4015_s21 + $0x98] sm:$0xff] %v1900_v46  ;;  %v1963_v25 = vadd.f32 %v1962_v53, %v1900_v46  ;;  %v2001_v17 = vmul.f32 %v1900_v46, %v1900_v46 }
 0x28f   : > { %v1673_v32 = vpop.f32.mrf.mxu2  ;;  %v1762_v44 = vpop.f32.mrf.mxu3 }
 0x290   : > { %v2032_v52 = vadd.f32 %v2031_v0, %v2001_v17  ;;  %v1763_v29 = vadd.f32 %v1762_v44, %v1673_v32  ;;  %v1393_v56 = vpop.f32.mrf.mxu1  ;;  %v1853_v47 = vpop.f32.mrf.mxu0 }
 0x291   : > { %v1394_v41 = vadd.f32 %v1393_v56, %v4282_v61 }
 0x292   : > { %v1852_v22 = vadd.f32 %v1851_v45, %v1763_v29 }
 0x294   : > { %v1901_v19 = vadd.f32 %v1852_v22, %v1392_v60  ;;  %v4286_v60 = vld [vmem:[#allocation27_spill] sm:$0xff] }
 0x296   : > { %1933 = vst [vmem:[%s4015_s21 + $0xa0] sm:$0xff] %v1901_v19  ;;  %v1964_v34 = vadd.f32 %v1963_v25, %v1901_v19  ;;  %v2002_v51 = vmul.f32 %v1901_v19, %v1901_v19 }
 0x297   : > { %v1675_v28 = vpop.f32.mrf.mxu2  ;;  %v1764_v57 = vpop.f32.mrf.mxu3 }
 0x298   : > { %v2033_v63 = vadd.f32 %v2032_v52, %v2002_v51  ;;  %v1765_v58 = vadd.f32 %v1764_v57, %v1675_v28  ;;  %v1396_v16 = vpop.f32.mrf.mxu1  ;;  %v1856_v2 = vpop.f32.mrf.mxu0 }
 0x299   : > { %v1397_v33 = vadd.f32 %v1396_v16, %v4283_v38 }
 0x29a   : > { %v1854_v21 = vadd.f32 %v1853_v47, %v1765_v58 }
 0x29c   : > { %v1902_v35 = vadd.f32 %v1854_v21, %v1394_v41  ;;  %v4287_v41 = vld [vmem:[#allocation14_spill] sm:$0xff] }
 0x29e   : > { %1934 = vst [vmem:[%s4015_s21 + $0xa8] sm:$0xff] %v1902_v35  ;;  %v1965_v26 = vadd.f32 %v1964_v34, %v1902_v35  ;;  %v2003_v49 = vmul.f32 %v1902_v35, %v1902_v35 }
 0x29f   : > { %v1678_v43 = vpop.f32.mrf.mxu2  ;;  %v1767_v36 = vpop.f32.mrf.mxu3 }
 0x2a0   : > { %v2034_v9 = vadd.f32 %v2033_v63, %v2003_v49  ;;  %v1768_v31 = vadd.f32 %v1767_v36, %v1678_v43  ;;  %v1398_v30 = vpop.f32.mrf.mxu1  ;;  %v1858_v39 = vpop.f32.mrf.mxu0 }
 0x2a1   : > { %v1399_v12 = vadd.f32 %v1398_v30, %v4284_v15 }
 0x2a2   : > { %v1857_v5 = vadd.f32 %v1856_v2, %v1768_v31 }
 0x2a4   : > { %v1903_v20 = vadd.f32 %v1857_v5, %v1397_v33 }
 0x2a6   : > { %1935 = vst [vmem:[%s4015_s21 + $0xb0] sm:$0xff] %v1903_v20  ;;  %v1966_v3 = vadd.f32 %v1965_v26, %v1903_v20  ;;  %v2004_v59 = vmul.f32 %v1903_v20, %v1903_v20 }
 0x2a7   : > { %v1680_v7 = vpop.f32.mrf.mxu2  ;;  %v1769_v42 = vpop.f32.mrf.mxu3 }
 0x2a8   : > { %v2035_v37 = vadd.f32 %v2034_v9, %v2004_v59  ;;  %v1770_v24 = vadd.f32 %v1769_v42, %v1680_v7  ;;  %v1401_v4 = vpop.f32.mrf.mxu1  ;;  %v1861_v18 = vpop.f32.mrf.mxu0 }
 0x2a9   : > { %v1402_v55 = vadd.f32 %v1401_v4, %v4285_v11 }
 0x2aa   : > { %v1859_v27 = vadd.f32 %v1858_v39, %v1770_v24 }
 0x2ac   : > { %v1904_v53 = vadd.f32 %v1859_v27, %v1399_v12 }
 0x2ae   : > { %1936 = vst [vmem:[%s4015_s21 + $0xb8] sm:$0xff] %v1904_v53  ;;  %v1967_v62 = vadd.f32 %v1966_v3, %v1904_v53  ;;  %v2005_v40 = vmul.f32 %v1904_v53, %v1904_v53 }
 0x2af   : > { %v1683_v14 = vpop.f32.mrf.mxu2  ;;  %v1772_v0 = vpop.f32.mrf.mxu3 }
 0x2b0   : > { %v2036_v50 = vadd.f32 %v2035_v37, %v2005_v40  ;;  %v1773_v6 = vadd.f32 %v1772_v0, %v1683_v14  ;;  %v1403_v45 = vpop.f32.mrf.mxu1  ;;  %v1863_v48 = vpop.f32.mrf.mxu0 }
 0x2b1   : > { %v1404_v22 = vadd.f32 %v1403_v45, %v4286_v60 }
 0x2b2   : > { %v1862_v46 = vadd.f32 %v1861_v18, %v1773_v6 }
 0x2b4   : > { %v1905_v25 = vadd.f32 %v1862_v46, %v1402_v55 }
 0x2b6   : > { %1937 = vst [vmem:[%s4015_s21 + $0xc0] sm:$0xff] %v1905_v25  ;;  %v1968_v17 = vadd.f32 %v1967_v62, %v1905_v25  ;;  %v2006_v32 = vmul.f32 %v1905_v25, %v1905_v25 }
 0x2b7   : > { %v1685_v44 = vpop.f32.mrf.mxu2  ;;  %v1774_v52 = vpop.f32.mrf.mxu3 }
 0x2b8   : > { %v2037_v29 = vadd.f32 %v2036_v50, %v2006_v32  ;;  %v1775_v56 = vadd.f32 %v1774_v52, %v1685_v44  ;;  %v1406_v47 = vpop.f32.mrf.mxu1  ;;  %v1866_v10 = vpop.f32.mrf.mxu0 }
 0x2b9   : > { %v1407_v21 = vadd.f32 %v1406_v47, %v4287_v41 }
 0x2ba   : > { %v1864_v19 = vadd.f32 %v1863_v48, %v1775_v56 }
 0x2bc   : > { %v1906_v34 = vadd.f32 %v1864_v19, %v1404_v22 }
 0x2be   : > { %1938 = vst [vmem:[%s4015_s21 + $0xc8] sm:$0xff] %v1906_v34  ;;  %v1969_v51 = vadd.f32 %v1968_v17, %v1906_v34  ;;  %v2007_v28 = vmul.f32 %v1906_v34, %v1906_v34 }
 0x2bf   : > { %v1688_v57 = vpop.f32.mrf.mxu2  ;;  %v1777_v63 = vpop.f32.mrf.mxu3 }
 0x2c0   : > { %v2038_v58 = vadd.f32 %v2037_v29, %v2007_v28  ;;  %v1778_v16 = vadd.f32 %v1777_v63, %v1688_v57  ;;  %v1408_v2 = vpop.f32.mrf.mxu1  ;;  %v1868_v61 = vpop.f32.mrf.mxu0 }
 0x2c1   : > { %v1409_v38 = vadd.f32 %v1408_v2, %v3975_v8 }
 0x2c2   : > { %v1867_v35 = vadd.f32 %v1866_v10, %v1778_v16 }
 0x2c4   : > { %v1907_v26 = vadd.f32 %v1867_v35, %v1407_v21 }
 0x2c6   : > { %1939 = vst [vmem:[%s4015_s21 + $0xd0] sm:$0xff] %v1907_v26  ;;  %v1970_v49 = vadd.f32 %v1969_v51, %v1907_v26  ;;  %v2008_v43 = vmul.f32 %v1907_v26, %v1907_v26 }
 0x2c7   : > { %v1690_v36 = vpop.f32.mrf.mxu2  ;;  %v1779_v9 = vpop.f32.mrf.mxu3 }
 0x2c8   : > { %v2039_v31 = vadd.f32 %v2038_v58, %v2008_v43  ;;  %v1780_v30 = vadd.f32 %v1779_v9, %v1690_v36  ;;  %v1411_v39 = vpop.f32.mrf.mxu1  ;;  %v1871_v5 = vpop.f32.mrf.mxu0 }
 0x2c9   : > { %v1412_v4 = vadd.f32 %v1411_v39, %v3978_v54 }
 0x2ca   : > { %v1869_v33 = vadd.f32 %v1868_v61, %v1780_v30 }
 0x2cc   : > { %v1908_v20 = vadd.f32 %v1869_v33, %v1409_v38 }
 0x2ce   : > { %1940 = vst [vmem:[%s4015_s21 + $0xd8] sm:$0xff] %v1908_v20  ;;  %v1971_v3 = vadd.f32 %v1970_v49, %v1908_v20  ;;  %v2009_v59 = vmul.f32 %v1908_v20, %v1908_v20 }
 0x2cf   : > { %v1693_v7 = vpop.f32.mrf.mxu2  ;;  %v1782_v42 = vpop.f32.mrf.mxu3 }
 0x2d0   : > { %v2040_v37 = vadd.f32 %v2039_v31, %v2009_v59  ;;  %v1783_v24 = vadd.f32 %v1782_v42, %v1693_v7  ;;  %v1413_v15 = vpop.f32.mrf.mxu1  ;;  %v1873_v27 = vpop.f32.mrf.mxu0 }
 0x2d1   : > { %v1414_v50 = vadd.f32 %v1413_v15, %v3991_v13 }
 0x2d2   : > { %v1872_v18 = vadd.f32 %v1871_v5, %v1783_v24 }
 0x2d4   : > { %v1909_v12 = vadd.f32 %v1872_v18, %v1412_v4 }
 0x2d6   : > { %1941 = vst [vmem:[%s4015_s21 + $0xe0] sm:$0xff] %v1909_v12  ;;  %v1972_v8 = vadd.f32 %v1971_v3, %v1909_v12  ;;  %v2010_v53 = vmul.f32 %v1909_v12, %v1909_v12 }
 0x2d7   : > { %v1695_v62 = vpop.f32.mrf.mxu2  ;;  %v1784_v40 = vpop.f32.mrf.mxu3 }
 0x2d8   : > { %v2041_v14 = vadd.f32 %v2040_v37, %v2010_v53  ;;  %v1785_v0 = vadd.f32 %v1784_v40, %v1695_v62  ;;  %v1416_v48 = vpop.f32.mrf.mxu1  ;;  %v1876_v55 = vpop.f32.mrf.mxu0 }
 0x2d9   : > { %v1417_v44 = vadd.f32 %v1416_v48, %v3994_v1 }
 0x2da   : > { %v1874_v6 = vadd.f32 %v1873_v27, %v1785_v0 }
 0x2dc   : > { %v1910_v45 = vadd.f32 %v1874_v6, %v1414_v50 }
 0x2de   : > { %1942 = vst [vmem:[%s4015_s21 + $0xe8] sm:$0xff] %v1910_v45  ;;  %v1973_v54 = vadd.f32 %v1972_v8, %v1910_v45  ;;  %v2011_v11 = vmul.f32 %v1910_v45, %v1910_v45 }
 0x2df   : > { %v1698_v46 = vpop.f32.mrf.mxu2  ;;  %v1787_v25 = vpop.f32.mrf.mxu3 }
 0x2e0   : > { %v2042_v17 = vadd.f32 %v2041_v14, %v2011_v11  ;;  %v1788_v32 = vadd.f32 %v1787_v25, %v1698_v46  ;;  %v1418_v13 = vpop.f32.mrf.mxu1  ;;  %v1878_v34 = vpop.f32.mrf.mxu0 }
 0x2e1   : > { %v1419_v51 = vadd.f32 %v1418_v13, %v4007_v23 }
 0x2e2   : > { %v1877_v52 = vadd.f32 %v1876_v55, %v1788_v32 }
 0x2e4   : > { %v1911_v29 = vadd.f32 %v1877_v52, %v1417_v44 }
 0x2e6   : > { %1943 = vst [vmem:[%s4015_s21 + $0xf0] sm:$0xff] %v1911_v29  ;;  %v1974_v56 = vadd.f32 %v1973_v54, %v1911_v29  ;;  %v2012_v47 = vmul.f32 %v1911_v29, %v1911_v29 }
 0x2e7   : > { %v1700_v10 = vpop.f32.mrf.mxu2  ;;  %v1789_v60 = vpop.f32.mrf.mxu3 }
 0x2e8   : > { %v2043_v22 = vadd.f32 %v2042_v17, %v2012_v47  ;;  %v1790_v19 = vadd.f32 %v1789_v60, %v1700_v10 }
 0x2ea   : > { %v1879_v28 = vadd.f32 %v1878_v34, %v1790_v19 }
 0x2ec   : > { %v1912_v57 = vadd.f32 %v1879_v28, %v1419_v51 }
 0x2ee   : > { %1944 = vst [vmem:[%s4015_s21 + $0xf8] sm:$0xff] %v1912_v57  ;;  %v1975_v63 = vadd.f32 %v1974_v56, %v1912_v57  ;;  %v2013_v58 = vmul.f32 %v1912_v57, %v1912_v57 }
 0x2f0   : > { %v1976_v1 = vrot.slane %v1975_v63, 4  ;;  %v2044_v16 = vadd.f32 %v2043_v22, %v2013_v58 }
 0x2f2   : > { %v1977_v2 = vadd.f32 %v1976_v1, %v1975_v63  ;;  %v2045_v61 = vrot.slane %v2044_v16, 4 }
 0x2f4   : > { %v1978_v41 = vrot.slane %v1977_v2, 2  ;;  %v2046_v21 = vadd.f32 %v2045_v61, %v2044_v16 }
 0x2f6   : > { %v1979_v35 = vadd.f32 %v1978_v41, %v1977_v2  ;;  %v2047_v26 = vrot.slane %v2046_v21, 2 }
 0x2f8   : > { %v1980_v49 = vrot.slane %v1979_v35, 1  ;;  %v2048_v43 = vadd.f32 %v2047_v26, %v2046_v21 }
 0x2fa   : > { %v2049_v36 = vrot.slane %v2048_v43, 1  ;;  %v1981_v23 = vadd.f32 %v1980_v49, %v1979_v35 }
 0x2fc   : > { %v2050_v9 = vadd.f32 %v2049_v36, %v2048_v43 }
 0x2fe   : > { %v2051_v31 = vsel %vm245_vm0, %v1981_v23, %v2050_v9 }
 0x2ff   : > { %2052 = vst [vmem:[%s181_s25] sm:$0x3] %v2051_v31 }
 0x300 PF: > { %s14_s12 = sadd.s32 1, %s2986_s12  }
 0x301   : > { %p11_p4 = scmp.ge.s32.totalorder %s14_s12, 4  }
 0x303   :  { %13 = sbr.rel (!%p11_p4) target bundleno = 1 (0x1), region = 72 }

// kernel: basic_block.4
= control target key start
LH: loop header
LB: loop body
LE: loop exit
PB: predicated region body
PF: predicated region fallthrough
CT: control target
= control target key end

     0   :  { %s3181_s18 = smov 0   ;;  %s4408_s0 = inlined_call_operand.vmem [shape: f32[2,16,16,128], index: 0, kind: input, shape index: {}]   ;;  %s4409_s1 = inlined_call_operand.vmem [shape: bf16[3,384,128], index: 1, kind: input, shape index: {}]   ;;  %s4410_s2 = inlined_call_operand.vmem [shape: f32[1,128], index: 2, kind: input, shape index: {}]   ;;  %s4411_s3 = inlined_call_operand.vmem [shape: f32[1,128], index: 3, kind: input, shape index: {}]   ;;  %s4412_s4 = inlined_call_operand.vmem [shape: f32[2,16,16,128], index: 4, kind: output, shape index: {0}]   ;;  %s4413_s5 = inlined_call_operand.vmem [shape: f32[2,2,128], index: 5, kind: output, shape index: {1}]  }
   0x1 LB: > { %s2297_s19 = sadd.s32 4294967295, %s3146_s18   ;;  %p2301_p0 = scmp.ge.s32.totalorder %s3146_s18, 1  ;;  %s3146_s18 = sphi %s3181_s18, %s16_s18  }
   0x2   : > { %p190_p1 = scmp.lt.s32.totalorder %s3146_s18, 3 }
   0x4   : > { %p191_p2 = pnand %p2301_p0, %p190_p1 }
   0x6   : > { %194 = sbr.rel (%p191_p2) target bundleno = 768 (0x300), region = 36 }
   0xb   : > { %v3062_v0 = vld [vmem:[%s4409_s1 + $0xf8] sm:$0xff]  ;;  %p222_p3 = scmp.lt.s32.totalorder %s2297_s19, 1  ;;  %v3061_v1 = vld [vmem:[%s4409_s1 + $0xf0] sm:$0xff]  ;;  %v3060_v2 = vld [vmem:[%s4409_s1 + $0xe8] sm:$0xff]  ;;  %vm403_vm0 = vcmask 1040384   ;;  %vm3148_vm2 = vmmov 1  }
   0xc   : > { %901 = vmatpush.bf16.msra.mxu0 %v3062_v0  ;;  %3103 = vmatpush.bf16.msra.mxu1 %v3062_v0  ;;  %v3211_v3 = vld [vmem:[%s4410_s2] ss:$0 sm:$0xff]  ;;  %v3058_v26 = vld [vmem:[%s4409_s1 + $0xd8] sm:$0xff]  ;;  %v3057_v35 = vld [vmem:[%s4409_s1 + $0xd0] sm:$0xff]  ;;  %vm499_vm4 = vcmask 1046528  }
   0xd   : > { %s4545_s19 = smov (!%p222_p3, %s2297_s19), 1  ;;  %3104 = vmatpush.bf16.msra.mxu2 %v3062_v0  ;;  %3105 = vmatpush.bf16.msra.mxu3 %v3062_v0  ;;  %v3226_v14 = vld [vmem:[%s4411_s3] ss:$0 sm:$0xff]  ;;  %v3056_v46 = vld [vmem:[%s4409_s1 + $0xc8] sm:$0xff]  ;;  %vm3299_vm1 = vmneg %vm403_vm0 }
   0xe   : > { %s3029_s24 = sshll.u32 %s4545_s19, 8  ;;  %v3059_v17 = vld [vmem:[%s4409_s1 + $0xe0] sm:$0xff]  ;;  %vm3325_vm3 = vmpackc.low %vm3148_vm2, %vm3299_vm1 }
   0xf   : > { %s3206_s29 = scalar_lea.vmem %s4408_s0, %s3029_s24  ;;  %v3055_v63 = vld [vmem:[%s4409_s1 + $0xc0] sm:$0xff]  ;;  %vm3670_vm5 = vmpackc.low %vm499_vm4, %vm3148_vm2  ;;  %s4265_s21 = scalar_lea.vmem %s4412_s4, %s3029_s24 }
  0x10   : > { %902 = vmatpush.bf16.msra.mxu0 %v3061_v1  ;;  %3106 = vmatpush.bf16.msra.mxu1 %v3061_v1  ;;  %v236_v4 = vld [vmem:[%s3206_s29] sm:$0xff]  ;;  %v237_v5 = vld [vmem:[%s3206_s29 + $0x8] sm:$0xff]  ;;  %v238_v44 = vld [vmem:[%s3206_s29 + $0x10] sm:$0xff]  ;;  %s2306_s24 = sshll.u32 %s4545_s19, 1 }
  0x11   : > { %v244_v6 = vld [vmem:[%s3206_s29 + $0x40] sm:$0xff]  ;;  %3107 = vmatpush.bf16.msra.mxu2 %v3061_v1  ;;  %3108 = vmatpush.bf16.msra.mxu3 %v3061_v1  ;;  %v245_v7 = vld [vmem:[%s3206_s29 + $0x48] sm:$0xff]  ;;  %v272_v12 = vmul.f32 %v3211_v3, %v236_v4  ;;  %v273_v13 = vmul.f32 %v3211_v3, %v237_v5  ;;  %v239_v45 = vld [vmem:[%s3206_s29 + $0x18] sm:$0xff]  ;;  %v274_v55 = vmul.f32 %v3211_v3, %v238_v44  ;;  %s235_s25 = scalar_lea.vmem %s4413_s5, %s2306_s24 }
  0x12   : > { %v252_v8 = vld [vmem:[%s3206_s29 + $0x80] sm:$0xff]  ;;  %v253_v9 = vld [vmem:[%s3206_s29 + $0x88] sm:$0xff]  ;;  %v280_v15 = vmul.f32 %v3211_v3, %v244_v6  ;;  %v281_v16 = vmul.f32 %v3211_v3, %v245_v7  ;;  %v246_v49 = vld [vmem:[%s3206_s29 + $0x50] sm:$0xff]  ;;  %v275_v56 = vmul.f32 %v3211_v3, %v239_v45 }
  0x13   : > { %v260_v10 = vld [vmem:[%s3206_s29 + $0xc0] sm:$0xff]  ;;  %v261_v11 = vld [vmem:[%s3206_s29 + $0xc8] sm:$0xff]  ;;  %v288_v18 = vmul.f32 %v3211_v3, %v252_v8  ;;  %v289_v19 = vmul.f32 %v3211_v3, %v253_v9  ;;  %v308_v22 = vadd.f32 %v3226_v14, %v272_v12  ;;  %v309_v23 = vadd.f32 %v3226_v14, %v273_v13  ;;  %v247_v50 = vld [vmem:[%s3206_s29 + $0x58] sm:$0xff] }
  0x14   : > { %903 = vmatpush.bf16.msra.mxu0 %v3060_v2  ;;  %3109 = vmatpush.bf16.msra.mxu1 %v3060_v2  ;;  %v296_v20 = vmul.f32 %v3211_v3, %v260_v10  ;;  %v297_v21 = vmul.f32 %v3211_v3, %v261_v11  ;;  %v316_v24 = vadd.f32 %v3226_v14, %v280_v15  ;;  %v254_v53 = vld [vmem:[%s3206_s29 + $0x90] sm:$0xff]  ;;  %v255_v54 = vld [vmem:[%s3206_s29 + $0x98] sm:$0xff]  ;;  %v265_v4 = vld [vmem:[%s3206_s29 + $0xe8] sm:$0xff] }
  0x15   : > { %3110 = vmatpush.bf16.msra.mxu2 %v3060_v2  ;;  %3111 = vmatpush.bf16.msra.mxu3 %v3060_v2  ;;  %v317_v25 = vadd.f32 %v3226_v14, %v281_v16  ;;  %v324_v27 = vadd.f32 %v3226_v14, %v288_v18  ;;  %v325_v28 = vadd.f32 %v3226_v14, %v289_v19  ;;  %v3248_v31 = vmax.f32 %v308_v22, 0.0  ;;  %v262_v57 = vld [vmem:[%s3206_s29 + $0xd0] sm:$0xff]  ;;  %v263_v58 = vld [vmem:[%s3206_s29 + $0xd8] sm:$0xff] }
  0x16   : > { %v332_v29 = vadd.f32 %v3226_v14, %v296_v20  ;;  %v333_v30 = vadd.f32 %v3226_v14, %v297_v21  ;;  %v3250_v32 = vmax.f32 %v309_v23, 0.0  ;;  %v3252_v33 = vmax.f32 %v316_v24, 0.0  ;;  %v3078_v9 = vld [vmem:[%s4409_s1 + $0x178] sm:$0xff]  ;;  %v3069_v45 = vld [vmem:[%s4409_s1 + $0x130] sm:$0xff] }
  0x17   : > { %v3254_v34 = vmax.f32 %v317_v25, 0.0  ;;  %v3259_v36 = vmax.f32 %v324_v27, 0.0  ;;  %v3261_v37 = vmax.f32 %v325_v28, 0.0  ;;  %v406_v40 = vrot.slane %v3248_v31, 7  ;;  %v3038_v10 = vld [vmem:[%s4409_s1 + $0x38] sm:$0xff]  ;;  %v3037_v27 = vld [vmem:[%s4409_s1 + $0x30] sm:$0xff] }
  0x18   : > { %904 = vmatpush.bf16.msra.mxu0 %v3059_v17  ;;  %3112 = vmatpush.bf16.msra.mxu1 %v3059_v17  ;;  %v3263_v38 = vmax.f32 %v332_v29, 0.0  ;;  %v3265_v39 = vmax.f32 %v333_v30, 0.0  ;;  %v407_v41 = vrot.slane %v3250_v32, 7  ;;  %v418_v42 = vrot.slane %v3252_v33, 7  ;;  %v3070_v22 = vld [vmem:[%s4409_s1 + $0x138] sm:$0xff] }
  0x19   : > { %3113 = vmatpush.bf16.msra.mxu2 %v3059_v17  ;;  %3114 = vmatpush.bf16.msra.mxu3 %v3059_v17  ;;  %v419_v43 = vrot.slane %v3254_v34, 7  ;;  %v430_v47 = vrot.slane %v3259_v36, 7  ;;  %v431_v48 = vrot.slane %v3261_v37, 7  ;;  %v282_v61 = vmul.f32 %v3211_v3, %v246_v49  ;;  %v3046_v23 = vld [vmem:[%s4409_s1 + $0x78] sm:$0xff] }
  0x1a   : > { %v442_v51 = vrot.slane %v3263_v38, 7  ;;  %v443_v52 = vrot.slane %v3265_v39, 7  ;;  %v408_v59 = vsel %vm403_vm0, %v406_v40, %v407_v41  ;;  %v283_v62 = vmul.f32 %v3211_v3, %v247_v50  ;;  %v3076_v50 = vld [vmem:[%s4409_s1 + $0x168] sm:$0xff] }
  0x1b   : > { %v420_v60 = vsel %vm403_vm0, %v418_v42, %v419_v43  ;;  %v432_v0 = vsel %vm403_vm0, %v430_v47, %v431_v48  ;;  %v290_v1 = vmul.f32 %v3211_v3, %v254_v53  ;;  %v291_v2 = vmul.f32 %v3211_v3, %v255_v54 }
  0x1c   : > { %905 = vmatpush.bf16.msra.mxu0 %v3058_v26  ;;  %3115 = vmatpush.bf16.msra.mxu1 %v3058_v26  ;;  %v444_v5 = vsel %vm403_vm0, %v442_v51, %v443_v52  ;;  %v298_v6 = vmul.f32 %v3211_v3, %v262_v57  ;;  %v299_v7 = vmul.f32 %v3211_v3, %v263_v58 }
  0x1d   : > { %3116 = vmatpush.bf16.msra.mxu2 %v3058_v26  ;;  %3117 = vmatpush.bf16.msra.mxu3 %v3058_v26  ;;  %v3306_v8 = vpack.c.bf16 %v408_v59, %v406_v40  ;;  %v310_v11 = vadd.f32 %v3226_v14, %v274_v55  ;;  %v311_v12 = vadd.f32 %v3226_v14, %v275_v56  ;;  %v3077_v26 = vld [vmem:[%s4409_s1 + $0x170] sm:$0xff]  ;;  %v248_v55 = vld [vmem:[%s3206_s29 + $0x60] sm:$0xff]  ;;  %v249_v56 = vld [vmem:[%s3206_s29 + $0x68] sm:$0xff] }
  0x1e   : > { %v3316_v13 = vpack.c.bf16 %v420_v60, %v418_v42  ;;  %v3318_v15 = vpack.c.bf16 %v432_v0, %v430_v47  ;;  %v318_v16 = vadd.f32 %v3226_v14, %v282_v61  ;;  %v319_v17 = vadd.f32 %v3226_v14, %v283_v62  ;;  %v240_v42 = vld [vmem:[%s3206_s29 + $0x20] sm:$0xff]  ;;  %v241_v47 = vld [vmem:[%s3206_s29 + $0x28] sm:$0xff] }
  0x1f   : > { %v3329_v19 = vpack.c.bf16 %v444_v5, %v442_v51  ;;  %v326_v20 = vadd.f32 %v3226_v14, %v290_v1  ;;  %v327_v21 = vadd.f32 %v3226_v14, %v291_v2  ;;  %v334_v24 = vadd.f32 %v3226_v14, %v298_v6  ;;  %v3036_v51 = vld [vmem:[%s4409_s1 + $0x28] sm:$0xff]  ;;  %v256_v61 = vld [vmem:[%s3206_s29 + $0xa0] sm:$0xff] }
  0x20   : > { %906 = vmatpush.bf16.msra.mxu0 %v3057_v35  ;;  %3118 = vmatpush.bf16.msra.mxu1 %v3057_v35  ;;  %4446 = vst [vmem:[#allocation2_spill] sm:$0xff] %v3316_v13  ;;  %v335_v25 = vadd.f32 %v3226_v14, %v299_v7  ;;  %v3347_v28 = vmax.f32 %v310_v11, 0.0  ;;  %v3349_v29 = vmax.f32 %v311_v12, 0.0  ;;  %v3357_v30 = vmax.f32 %v318_v16, 0.0  ;;  %v3068_v59 = vld [vmem:[%s4409_s1 + $0x128] sm:$0xff]  ;;  %v264_v2 = vld [vmem:[%s3206_s29 + $0xe0] sm:$0xff] }
  0x21   : > { %3119 = vmatpush.bf16.msra.mxu2 %v3057_v35  ;;  %3120 = vmatpush.bf16.msra.mxu3 %v3057_v35  ;;  %v3359_v35 = vmax.f32 %v319_v17, 0.0  ;;  %v3367_v40 = vmax.f32 %v326_v20, 0.0  ;;  %v3369_v41 = vmax.f32 %v327_v21, 0.0  ;;  %v3372_v43 = vmax.f32 %v334_v24, 0.0  ;;  %v257_v62 = vld [vmem:[%s3206_s29 + $0xa8] sm:$0xff]  ;;  %v3075_v6 = vld [vmem:[%s4409_s1 + $0x160] sm:$0xff] }
  0x22   : > { %v3374_v44 = vmax.f32 %v335_v25, 0.0  ;;  %v409_v48 = vrot.slane %v3347_v28, 7  ;;  %v410_v49 = vrot.slane %v3349_v29, 7  ;;  %v421_v52 = vrot.slane %v3357_v30, 7  ;;  %v3044_v1 = vld [vmem:[%s4409_s1 + $0x68] sm:$0xff]  ;;  %v3035_v7 = vld [vmem:[%s4409_s1 + $0x20] sm:$0xff] }
  0x23   : > { %v422_v53 = vrot.slane %v3359_v35, 7  ;;  %v276_v54 = vmul.f32 %v3211_v3, %v240_v42  ;;  %v433_v57 = vrot.slane %v3367_v40, 7  ;;  %v434_v58 = vrot.slane %v3369_v41, 7 }
  0x24   : > { %907 = vmatpush.bf16.msra.mxu0 %v3056_v46  ;;  %3121 = vmatpush.bf16.msra.mxu1 %v3056_v46  ;;  %v277_v60 = vmul.f32 %v3211_v3, %v241_v47  ;;  %v446_v0 = vrot.slane %v3374_v44, 7  ;;  %v411_v5 = vsel %vm403_vm0, %v409_v48, %v410_v49  ;;  %v292_v16 = vmul.f32 %v3211_v3, %v256_v61  ;;  %v3074_v47 = vld [vmem:[%s4409_s1 + $0x158] sm:$0xff]  ;;  %v3073_v61 = vld [vmem:[%s4409_s1 + $0x150] sm:$0xff] }
  0x25   : > { %3122 = vmatpush.bf16.msra.mxu2 %v3056_v46  ;;  %3123 = vmatpush.bf16.msra.mxu3 %v3056_v46  ;;  %v3045_v46 = vld [vmem:[%s4409_s1 + $0x70] sm:$0xff]  ;;  %v423_v11 = vsel %vm403_vm0, %v421_v52, %v422_v53  ;;  %v312_v12 = vadd.f32 %v3226_v14, %v276_v54  ;;  %v293_v17 = vmul.f32 %v3211_v3, %v257_v62 }
  0x26   : > { %v435_v20 = vsel %vm403_vm0, %v433_v57, %v434_v58  ;;  %v313_v21 = vadd.f32 %v3226_v14, %v277_v60  ;;  %v3428_v24 = vpack.c.bf16 %v411_v5, %v409_v48  ;;  %v3437_v42 = vpack.c.bf16 %v423_v11, %v421_v52  ;;  %v3034_v48 = vld [vmem:[%s4409_s1 + $0x18] sm:$0xff]  ;;  %v3033_v62 = vld [vmem:[%s4409_s1 + $0x10] sm:$0xff] }
  0x27   : > { %v3447_v49 = vpack.c.bf16 %v435_v20, %v433_v57  ;;  %v329_v52 = vadd.f32 %v3226_v14, %v293_v17  ;;  %v3066_v57 = vld [vmem:[%s4409_s1 + $0x118] sm:$0xff] }
  0x28   : > { %908 = vmatpush.bf16.msra.mxu0 %v3055_v63  ;;  %3124 = vmatpush.bf16.msra.mxu1 %v3055_v63  ;;  %4449 = vst [vmem:[#allocation3_spill] sm:$0xff] %v3437_v42  ;;  %v3455_v54 = vmax.f32 %v313_v21, 0.0  ;;  %v3042_v58 = vld [vmem:[%s4409_s1 + $0x58] sm:$0xff]  ;;  %v242_v21 = vld [vmem:[%s3206_s29 + $0x30] sm:$0xff] }
  0x29   : > { %3125 = vmatpush.bf16.msra.mxu2 %v3055_v63  ;;  %3126 = vmatpush.bf16.msra.mxu3 %v3055_v63  ;;  %v445_v63 = vrot.slane %v3372_v43, 7 }
  0x2b   : > { %2454 = vmatmul.msk.bf16.vlgmr.msra.gmra.mxu0 %vm3325_vm3, %v3306_v8  ;;  %2470 = vmatmul.msk.bf16.vlgmr.msra.gmra.mxu1 %vm3325_vm3, %v3316_v13  ;;  %v447_v25 = vsel %vm403_vm0, %v445_v63, %v446_v0 }
  0x2c   : > { %2486 = vmatmul.msk.bf16.vlgmr.msra.gmra.mxu2 %vm3325_vm3, %v3318_v15  ;;  %2502 = vmatmul.msk.bf16.vlgmr.msra.gmra.mxu3 %vm3325_vm3, %v3329_v19  ;;  %v3453_v53 = vpack.c.bf16 %v447_v25, %v445_v63 }
  0x2d   : > { %1079 = vmatpush.bf16.msrb.mxu2 %v3078_v9  ;;  %1312 = vmatpush.bf16.msrb.mxu3 %v3038_v10  ;;  %v284_v9 = vmul.f32 %v3211_v3, %v248_v55  ;;  %v285_v10 = vmul.f32 %v3211_v3, %v249_v56 }
  0x2e   : > { %990 = vmatpush.bf16.msrb.mxu1 %v3070_v22  ;;  %1401 = vmatpush.bf16.msrb.mxu0 %v3046_v23  ;;  %v300_v22 = vmul.f32 %v3211_v3, %v264_v2  ;;  %v301_v23 = vmul.f32 %v3211_v3, %v265_v4  ;;  %4450 = vst [vmem:[#allocation4_spill] sm:$0xff] %v3453_v53  ;;  %v413_v2 = vrot.slane %v3455_v54, 7 }
  0x30   : > { %v336_v55 = vadd.f32 %v3226_v14, %v300_v22  ;;  %v337_v56 = vadd.f32 %v3226_v14, %v301_v23  ;;  %v243_v22 = vld [vmem:[%s3206_s29 + $0x38] sm:$0xff]  ;;  %v250_v23 = vld [vmem:[%s3206_s29 + $0x70] sm:$0xff] }
  0x31   : > { %1080 = vmatpush.bf16.msrb.mxu2 %v3077_v26  ;;  %1313 = vmatpush.bf16.msrb.mxu3 %v3037_v27  ;;  %v3067_v26 = vld [vmem:[%s4409_s1 + $0x120] sm:$0xff] }
  0x32   : > { %991 = vmatpush.bf16.msrb.mxu1 %v3069_v45  ;;  %1402 = vmatpush.bf16.msrb.mxu0 %v3045_v46  ;;  %v3043_v27 = vld [vmem:[%s4409_s1 + $0x60] sm:$0xff]  ;;  %v320_v45 = vadd.f32 %v3226_v14, %v284_v9  ;;  %v321_v46 = vadd.f32 %v3226_v14, %v285_v10  ;;  %v3493_v4 = vmax.f32 %v336_v55, 0.0  ;;  %v3495_v5 = vmax.f32 %v337_v56, 0.0  ;;  %v3041_v9 = vld [vmem:[%s4409_s1 + $0x50] sm:$0xff] }
  0x33   : > { %v278_v56 = vmul.f32 %v3211_v3, %v242_v21 }
  0x34   : > { %v3467_v60 = vmax.f32 %v321_v46, 0.0  ;;  %4451 = vst [vmem:[#allocation5_spill] sm:$0xff] %v3495_v5  ;;  %v258_v46 = vld [vmem:[%s3206_s29 + $0xb0] sm:$0xff] }
  0x35   : > { %1081 = vmatpush.bf16.msrb.mxu2 %v3076_v50  ;;  %1314 = vmatpush.bf16.msrb.mxu3 %v3036_v51  ;;  %v3449_v50 = vmax.f32 %v312_v12, 0.0  ;;  %v328_v51 = vadd.f32 %v3226_v14, %v292_v16  ;;  %v3072_v12 = vld [vmem:[%s4409_s1 + $0x148] sm:$0xff] }
  0x36   : > { %992 = vmatpush.bf16.msrb.mxu1 %v3068_v59  ;;  %1403 = vmatpush.bf16.msrb.mxu0 %v3044_v1  ;;  %v3465_v59 = vmax.f32 %v320_v45, 0.0  ;;  %v3484_v1 = vmax.f32 %v329_v52, 0.0  ;;  %v425_v11 = vrot.slane %v3467_v60, 7  ;;  %v3032_v16 = vld [vmem:[%s4409_s1 + $0x8] sm:$0xff]  ;;  %v251_v45 = vld [vmem:[%s3206_s29 + $0x78] sm:$0xff] }
  0x37   : > { %v412_v63 = vrot.slane %v3449_v50, 7  ;;  %v3482_v0 = vmax.f32 %v328_v51, 0.0  ;;  %v3064_v51 = vld [vmem:[%s4409_s1 + $0x108] sm:$0xff]  ;;  %v287_v21 = vmul.f32 %v3211_v3, %v251_v45  ;;  %v502_v45 = vrot.slane %v3248_v31, 1 }
  0x38   : > { %v424_v10 = vrot.slane %v3465_v59, 7  ;;  %v437_v20 = vrot.slane %v3484_v1, 7  ;;  %v3040_v52 = vld [vmem:[%s4409_s1 + $0x48] sm:$0xff] }
  0x39   : > { %1082 = vmatpush.bf16.msrb.mxu2 %v3075_v6  ;;  %1315 = vmatpush.bf16.msrb.mxu3 %v3035_v7  ;;  %v3499_v6 = vpack.c.bf16 %v3250_v32, %v3248_v31  ;;  %v3065_v7 = vld [vmem:[%s4409_s1 + $0x110] sm:$0xff]  ;;  %v436_v17 = vrot.slane %v3482_v0, 7  ;;  %v414_v25 = vsel %vm403_vm0, %v412_v63, %v413_v2 }
  0x3a   : > { %993 = vmatpush.bf16.msrb.mxu1 %v3067_v26  ;;  %1404 = vmatpush.bf16.msrb.mxu0 %v3043_v27  ;;  %v448_v26 = vrot.slane %v3493_v4, 7  ;;  %v449_v27 = vrot.slane %v3495_v5, 7  ;;  %v426_v55 = vsel %vm403_vm0, %v424_v10, %v425_v11  ;;  %v3543_v2 = vpack.c.bf16 %v414_v25, %v412_v63  ;;  %v3063_v63 = vld [vmem:[%s4409_s1 + $0x100] sm:$0xff] }
  0x3b   : > { %2458 = vmatmul.msk.bf16.gmra.mxu0 %vm3325_vm3, %v3428_v24  ;;  %2474 = vmatmul.msk.bf16.gmra.mxu1 %vm3325_vm3, %v3437_v42  ;;  %v314_v25 = vadd.f32 %v3226_v14, %v278_v56  ;;  %v3094_v56 = vld [vmem:[%s4409_s1 + $0x1f8] sm:$0xff] }
  0x3c   : > { %2490 = vmatmul.msk.bf16.gmra.mxu2 %vm3325_vm3, %v3447_v49  ;;  %2506 = vmatmul.msk.bf16.gmra.mxu3 %vm3325_vm3, %v3453_v53  ;;  %v450_v11 = vsel %vm403_vm0, %v448_v26, %v449_v27 }
  0x3d   : > { %1083 = vmatpush.bf16.msrb.mxu2 %v3074_v47  ;;  %1316 = vmatpush.bf16.msrb.mxu3 %v3034_v48  ;;  %v259_v47 = vld [vmem:[%s3206_s29 + $0xb8] sm:$0xff]  ;;  %v266_v48 = vld [vmem:[%s3206_s29 + $0xf0] sm:$0xff]  ;;  %v3565_v27 = vpack.c.bf16 %v450_v11, %v448_v26  ;;  %v3584_v31 = vmax.f32 %v314_v25, 0.0 }
  0x3e   : > { %994 = vmatpush.bf16.msrb.mxu1 %v3066_v57  ;;  %1405 = vmatpush.bf16.msrb.mxu0 %v3042_v58  ;;  %v279_v57 = vmul.f32 %v3211_v3, %v243_v22  ;;  %v267_v58 = vld [vmem:[%s3206_s29 + $0xf8] sm:$0xff]  ;;  %v3551_v22 = vpack.c.bf16 %v426_v55, %v424_v10  ;;  %v302_v53 = vmul.f32 %v3211_v3, %v266_v48 }
  0x3f   : > { %v303_v5 = vmul.f32 %v3211_v3, %v267_v58  ;;  %v3609_v58 = vpack.c.bf16 %v3349_v29, %v3347_v28  ;;  %v3102_v11 = vld [vmem:[%s4409_s1 + $0x238] sm:$0xff] }
  0x40   : > { %4452 = vst [vmem:[#allocation6_spill] sm:$0xff] %v3551_v22  ;;  %v315_v10 = vadd.f32 %v3226_v14, %v279_v57  ;;  %v3054_v57 = vld [vmem:[%s4409_s1 + $0xb8] sm:$0xff] }
  0x41   : > { %1084 = vmatpush.bf16.msrb.mxu2 %v3073_v61  ;;  %1317 = vmatpush.bf16.msrb.mxu3 %v3033_v62  ;;  %v3071_v61 = vld [vmem:[%s4409_s1 + $0x140] sm:$0xff] }
  0x42   : > { %995 = vmatpush.bf16.msrb.mxu1 %v3065_v7  ;;  %1406 = vmatpush.bf16.msrb.mxu0 %v3041_v9  ;;  %v3031_v62 = vld [vmem:[%s4409_s1] sm:$0xff]  ;;  %v438_v7 = vsel %vm403_vm0, %v436_v17, %v437_v20  ;;  %v286_v9 = vmul.f32 %v3211_v3, %v250_v23 }
  0x43   : > { %v3039_v20 = vld [vmem:[%s4409_s1 + $0x40] sm:$0xff]  ;;  %v3561_v23 = vpack.c.bf16 %v438_v7, %v436_v17 }
  0x45   : > { %1085 = vmatpush.bf16.msrb.mxu2 %v3072_v12  ;;  %1318 = vmatpush.bf16.msrb.mxu3 %v3032_v16  ;;  %v294_v12 = vmul.f32 %v3211_v3, %v258_v46  ;;  %v295_v16 = vmul.f32 %v3211_v3, %v259_v47  ;;  %v322_v3 = vadd.f32 %v3226_v14, %v286_v9  ;;  %v503_v46 = vrot.slane %v3250_v32, 1 }
  0x46   : > { %996 = vmatpush.bf16.msrb.mxu1 %v3064_v51  ;;  %1407 = vmatpush.bf16.msrb.mxu0 %v3040_v52  ;;  %v323_v47 = vadd.f32 %v3226_v14, %v287_v21  ;;  %v338_v51 = vadd.f32 %v3226_v14, %v302_v53  ;;  %v339_v52 = vadd.f32 %v3226_v14, %v303_v5  ;;  %v3086_v5 = vld [vmem:[%s4409_s1 + $0x1b8] sm:$0xff]  ;;  %v415_v21 = vrot.slane %v3584_v31, 7 }
  0x47   : > { %v330_v48 = vadd.f32 %v3226_v14, %v294_v12  ;;  %v331_v17 = vadd.f32 %v3226_v14, %v295_v16  ;;  %v504_v26 = vsel %vm499_vm4, %v502_v45, %v503_v46  ;;  %v3592_v14 = vmax.f32 %v315_v10, 0.0 }
  0x48   : > { %v3576_v55 = vpack.c.bf16 %v503_v46, %v504_v26  ;;  %v3594_v32 = vmax.f32 %v322_v3, 0.0  ;;  %v3596_v53 = vmax.f32 %v323_v47, 0.0  ;;  %v3615_v7 = vmax.f32 %v338_v51, 0.0 }
  0x49   : > { %1086 = vmatpush.bf16.msrb.mxu2 %v3071_v61  ;;  %1319 = vmatpush.bf16.msrb.mxu3 %v3031_v62  ;;  %v3611_v61 = vmax.f32 %v330_v48, 0.0  ;;  %v3613_v62 = vmax.f32 %v331_v17, 0.0  ;;  %v3617_v9 = vmax.f32 %v339_v52, 0.0  ;;  %v416_v12 = vrot.slane %v3592_v14, 7 }
  0x4a   : > { %997 = vmatpush.bf16.msrb.mxu1 %v3063_v63  ;;  %1408 = vmatpush.bf16.msrb.mxu0 %v3039_v20  ;;  %v427_v16 = vrot.slane %v3594_v32, 7  ;;  %v428_v63 = vrot.slane %v3596_v53, 7  ;;  %v693_v10 = vrot.slane %v3615_v7, 7  ;;  %v505_v52 = vrot.slane %v3347_v28, 1 }
  0x4b   : > { %2462 = vmatmul.msk.bf16.gmra.mxu0 %vm3325_vm3, %v3543_v2  ;;  %2478 = vmatmul.msk.bf16.gmra.mxu1 %vm3325_vm3, %v3551_v22  ;;  %v439_v20 = vrot.slane %v3611_v61, 7  ;;  %v440_v25 = vrot.slane %v3613_v62, 7  ;;  %v694_v3 = vrot.slane %v3617_v9, 7  ;;  %v417_v45 = vsel %vm403_vm0, %v415_v21, %v416_v12 }
  0x4c   : > { %2494 = vmatmul.msk.bf16.gmra.mxu2 %vm3325_vm3, %v3561_v23  ;;  %2510 = vmatmul.msk.bf16.gmra.mxu3 %vm3325_vm3, %v3565_v27  ;;  %v429_v46 = vsel %vm403_vm0, %v427_v16, %v428_v63  ;;  %v3634_v17 = vpack.c.bf16 %v417_v45, %v415_v21  ;;  %v506_v26 = vrot.slane %v3349_v29, 1  ;;  %v3661_v28 = vpack.c.bf16 %v3455_v54, %v3449_v50  ;;  %v3053_v45 = vld [vmem:[%s4409_s1 + $0xb0] sm:$0xff] }
  0x4d   : > { %1772 = vmatpush.bf16.msra.mxu2 %v3086_v5  ;;  %1861 = vmatpush.bf16.msra.mxu3 %v3094_v56  ;;  %v441_v47 = vsel %vm403_vm0, %v439_v20, %v440_v25  ;;  %v695_v48 = vsel %vm403_vm0, %v693_v10, %v694_v3  ;;  %v3636_v51 = vpack.c.bf16 %v429_v46, %v427_v16  ;;  %v4419_v29 = vmov 0.0   ;;  %v3101_v46 = vld [vmem:[%s4409_s1 + $0x230] sm:$0xff] }
  0x4e   : > { %1490 = vmatpush.bf16.msra.mxu1 %v3054_v57  ;;  %1950 = vmatpush.bf16.msra.mxu0 %v3102_v11  ;;  %4453 = vst [vmem:[#allocation7_spill] sm:$0xff] %v3634_v17  ;;  %v3640_v5 = vpack.c.bf16 %v441_v47, %v439_v20  ;;  %v3642_v56 = vpack.c.bf16 %v695_v48, %v693_v10  ;;  %v404_v21 = vrot.slane %v4419_v29, 7  ;;  %v508_v12 = vrot.slane %v3449_v50, 1  ;;  %v3085_v50 = vld [vmem:[%s4409_s1 + $0x1b0] sm:$0xff]  ;;  %v3052_v47 = vld [vmem:[%s4409_s1 + $0xa8] sm:$0xff] }
  0x4f   : > { %4454 = vst [vmem:[#allocation8_spill] sm:$0xff] %v3636_v51  ;;  %v507_v57 = vsel %vm499_vm4, %v505_v52, %v506_v26  ;;  %v509_v16 = vrot.slane %v3455_v54, 1  ;;  %v4418_v3 = vmov 0.0|0.0   ;;  %v3093_v54 = vld [vmem:[%s4409_s1 + $0x1f0] sm:$0xff]  ;;  %v3100_v48 = vld [vmem:[%s4409_s1 + $0x228] sm:$0xff]  ;;  %v511_v52 = vrot.slane %v3584_v31, 1 }
  0x50   : > { %4455 = vst [vmem:[#allocation9_spill] sm:$0xff] %v3642_v56  ;;  %v3645_v11 = vpack.c.bf16 %v506_v26, %v507_v57  ;;  %v3666_v63 = vpack.c.bf16 %v404_v21, %v404_v21  ;;  %v512_v26 = vrot.slane %v3592_v14, 1  ;;  %v3730_v21 = vpack.c.bf16 %v3592_v14, %v3584_v31 }
  0x51   : > { %v510_v25 = vsel %vm499_vm4, %v508_v12, %v509_v16  ;;  %1773 = vmatpush.bf16.msra.mxu2 %v3085_v50  ;;  %1862 = vmatpush.bf16.msra.mxu3 %v3093_v54  ;;  %v3747_v14 = vpack.c.bf16 %v3254_v34, %v3252_v33 }
  0x52   : > { %4456 = vst [vmem:[#allocation10_spill] sm:$0xff] %v3666_v63  ;;  %v3675_v10 = vpack.c.bf16 %v509_v16, %v510_v25  ;;  %1491 = vmatpush.bf16.msra.mxu1 %v3053_v45  ;;  %1951 = vmatpush.bf16.msra.mxu0 %v3101_v46  ;;  %v513_v57 = vsel %vm499_vm4, %v511_v52, %v512_v26  ;;  %v514_v16 = vrot.slane %v3252_v33, 1  ;;  %v515_v25 = vrot.slane %v3254_v34, 1  ;;  %v3083_v33 = vld [vmem:[%s4409_s1 + $0x1a0] sm:$0xff] }
  0x53   : > { %4459 = vst [vmem:[#allocation11_spill] sm:$0xff] %v3730_v21  ;;  %v3732_v12 = vpack.c.bf16 %v512_v26, %v513_v57  ;;  %v3091_v34 = vld [vmem:[%s4409_s1 + $0x1e0] sm:$0xff]  ;;  %v517_v26 = vrot.slane %v3357_v30, 1  ;;  %v518_v57 = vrot.slane %v3359_v35, 1 }
  0x54   : > { %v516_v31 = vsel %vm499_vm4, %v514_v16, %v515_v25  ;;  %4461 = vst [vmem:[#allocation13_spill] sm:$0xff] %v3747_v14  ;;  %v3099_v52 = vld [vmem:[%s4409_s1 + $0x220] sm:$0xff] }
  0x55   : > { %4460 = vst [vmem:[#allocation12_spill] sm:$0xff] %v3732_v12  ;;  %v3753_v45 = vpack.c.bf16 %v515_v25, %v516_v31  ;;  %v519_v16 = vsel %vm499_vm4, %v517_v26, %v518_v57  ;;  %v520_v26 = vrot.slane %v3465_v59, 1 }
  0x56   : > { %1492 = vmatpush.bf16.msra.mxu1 %v3052_v47  ;;  %1952 = vmatpush.bf16.msra.mxu0 %v3100_v48  ;;  %v3051_v48 = vld [vmem:[%s4409_s1 + $0xa0] sm:$0xff]  ;;  %v3798_v29 = vpack.c.bf16 %v518_v57, %v519_v16  ;;  %v521_v57 = vrot.slane %v3467_v60, 1 }
  0x57   : > { %4462 = vst [vmem:[#allocation14_spill] sm:$0xff] %v3753_v45 }
  0x58   : > { %4466 = vst [vmem:[#allocation18_spill] sm:$0xff] %v3798_v29  ;;  %v522_v16 = vsel %vm499_vm4, %v520_v26, %v521_v57 }
  0x5a   : > { %1493 = vmatpush.bf16.msra.mxu1 %v3051_v48  ;;  %1953 = vmatpush.bf16.msra.mxu0 %v3099_v52 }
  0x5b   : > { %2466 = vmatmul.msk.bf16.gmra.mxu0 %vm3325_vm3, %v3634_v17  ;;  %2482 = vmatmul.msk.bf16.gmra.mxu1 %vm3325_vm3, %v3636_v51 }
  0x5c   : > { %2498 = vmatmul.msk.bf16.gmra.mxu2 %vm3325_vm3, %v3640_v5  ;;  %2514 = vmatmul.msk.bf16.gmra.mxu3 %vm3325_vm3, %v3642_v56 }
  0x6b   : > { %998 = vmatmul.bf16.vlgmr.msrb.gmra.mxu1 %v3499_v6  ;;  %1409 = vmatmul.bf16.vlgmr.msrb.gmra.mxu0 %v4418_v3 }
  0x6c   : > { %2517 = vmatmul.msk.bf16.vlgmr.msrb.gmra.mxu2 %vm3670_vm5, %v3576_v55  ;;  %2662 = vmatmul.msk.bf16.vlgmr.msrb.gmra.mxu3 %vm3325_vm3, %v3666_v63 }
  0x7b   : > { %1003 = vmatmul.bf16.gmra.mxu1 %v3609_v58  ;;  %1414 = vmatmul.bf16.gmra.mxu0 %v3499_v6  ;;  %v3084_v6 = vld [vmem:[%s4409_s1 + $0x1a8] sm:$0xff] }
  0x7c   : > { %2520 = vmatmul.msk.bf16.gmra.mxu2 %vm3670_vm5, %v3645_v11  ;;  %2666 = vmatmul.msk.bf16.gmra.mxu3 %vm3325_vm3, %v3306_v8  ;;  %v3092_v8 = vld [vmem:[%s4409_s1 + $0x1e8] sm:$0xff] }
  0x7d   : > { %1774 = vmatpush.bf16.msra.mxu2 %v3084_v6  ;;  %1863 = vmatpush.bf16.msra.mxu3 %v3092_v8 }
  0x81   : > { %1775 = vmatpush.bf16.msra.mxu2 %v3083_v33  ;;  %1864 = vmatpush.bf16.msra.mxu3 %v3091_v34  ;;  %v3792_v33 = vpack.c.bf16 %v3359_v35, %v3357_v30 }
  0x83   : > { %4465 = vst [vmem:[#allocation17_spill] sm:$0xff] %v3792_v33 }
  0x8b   : > { %1008 = vmatmul.bf16.gmra.mxu1 %v3661_v28  ;;  %1419 = vmatmul.bf16.gmra.mxu0 %v3609_v58 }
  0x8c   : > { %2523 = vmatmul.msk.bf16.gmra.mxu2 %vm3670_vm5, %v3675_v10  ;;  %2670 = vmatmul.msk.bf16.gmra.mxu3 %vm3325_vm3, %v3428_v24 }
  0x9b   : > { %1013 = vmatmul.bf16.gmra.mxu1 %v3730_v21  ;;  %1424 = vmatmul.bf16.gmra.mxu0 %v3661_v28 }
  0x9c   : > { %2526 = vmatmul.msk.bf16.gmra.mxu2 %vm3670_vm5, %v3732_v12  ;;  %2674 = vmatmul.msk.bf16.gmra.mxu3 %vm3325_vm3, %v3543_v2 }
  0xa8   : > { %v3749_v50 = vpop.f32.mrf.mxu0  ;;  %v3751_v54 = vpop.f32.mrf.mxu1 }
  0xab   : > { %1018 = vmatmul.bf16.gmra.mxu1 %v3747_v14  ;;  %1429 = vmatmul.bf16.gmra.mxu0 %v3730_v21 }
  0xac   : > { %2529 = vmatmul.msk.bf16.gmra.mxu2 %vm3670_vm5, %v3753_v45  ;;  %2678 = vmatmul.msk.bf16.gmra.mxu3 %vm3325_vm3, %v3634_v17 }
  0xaf   : > { %v3769_v46 = vpop.f32.mrf.mxu2  ;;  %v3771_v6 = vpop.f32.mrf.mxu3 }
  0xb0   : > { %4463 = vst [vmem:[#allocation15_spill] sm:$0xff] %v3771_v6  ;;  %v3773_v8 = vpop.f32.mrf.mxu0  ;;  %v3775_v47 = vpop.f32.mrf.mxu1 }
  0xb7   : > { %v3786_v25 = vpop.f32.mrf.mxu2  ;;  %v3788_v31 = vpop.f32.mrf.mxu3 }
  0xb8   : > { %4464 = vst [vmem:[#allocation16_spill] sm:$0xff] %v3788_v31  ;;  %v3794_v34 = vpop.f32.mrf.mxu0  ;;  %v3796_v3 = vpop.f32.mrf.mxu1  ;;  %v3825_v31 = vpack.c.bf16 %v3467_v60, %v3465_v59  ;;  %v3082_v59 = vld [vmem:[%s4409_s1 + $0x198] sm:$0xff] }
  0xb9   : > { %v3090_v60 = vld [vmem:[%s4409_s1 + $0x1d8] sm:$0xff]  ;;  %1776 = vmatpush.bf16.msra.mxu2 %v3082_v59 }
  0xba   : > { %4471 = vst [vmem:[#allocation23_spill] sm:$0xff] %v3825_v31  ;;  %1865 = vmatpush.bf16.msra.mxu3 %v3090_v60  ;;  %v3098_v59 = vld [vmem:[%s4409_s1 + $0x218] sm:$0xff] }
  0xbb   : > { %1023 = vmatmul.bf16.gmra.mxu1 %v3792_v33  ;;  %1434 = vmatmul.bf16.gmra.mxu0 %v3747_v14 }
  0xbc   : > { %2532 = vmatmul.msk.bf16.gmra.mxu2 %vm3670_vm5, %v3798_v29  ;;  %2682 = vmatmul.msk.bf16.gmra.mxu3 %vm3325_vm3, %v3316_v13  ;;  %v3831_v29 = vpack.c.bf16 %v521_v57, %v522_v16  ;;  %v3870_v13 = vpack.c.bf16 %v3596_v53, %v3594_v32 }
  0xbd   : > { %1954 = vmatpush.bf16.msra.mxu0 %v3098_v59  ;;  %v527_v59 = vrot.slane %v3261_v37, 1 }
  0xbe   : > { %4472 = vst [vmem:[#allocation24_spill] sm:$0xff] %v3831_v29 }
  0xbf   : > { %v3808_v30 = vpop.f32.mrf.mxu2  ;;  %v3810_v35 = vpop.f32.mrf.mxu3  ;;  %4477 = vst [vmem:[#allocation29_spill] sm:$0xff] %v3870_v13 }
  0xc0   : > { %4467 = vst [vmem:[#allocation19_spill] sm:$0xff] %v3808_v30  ;;  %v3812_v48 = vpop.f32.mrf.mxu0  ;;  %v3814_v52 = vpop.f32.mrf.mxu1 }
  0xc1   : > { %4468 = vst [vmem:[#allocation20_spill] sm:$0xff] %v3810_v35 }
  0xc7   : > { %v3819_v63 = vpop.f32.mrf.mxu2  ;;  %v3821_v56 = vpop.f32.mrf.mxu3 }
  0xc8   : > { %4469 = vst [vmem:[#allocation21_spill] sm:$0xff] %v3819_v63  ;;  %v3827_v6 = vpop.f32.mrf.mxu0  ;;  %v3829_v35 = vpop.f32.mrf.mxu1 }
  0xc9   : > { %4470 = vst [vmem:[#allocation22_spill] sm:$0xff] %v3821_v56 }
  0xcb   : > { %1028 = vmatmul.bf16.gmra.mxu1 %v3825_v31  ;;  %1439 = vmatmul.bf16.gmra.mxu0 %v3792_v33  ;;  %v524_v33 = vrot.slane %v3596_v53, 1 }
  0xcc   : > { %2535 = vmatmul.msk.bf16.gmra.mxu2 %vm3670_vm5, %v3831_v29  ;;  %2686 = vmatmul.msk.bf16.gmra.mxu3 %vm3325_vm3, %v3437_v42  ;;  %v523_v29 = vrot.slane %v3594_v32, 1  ;;  %v3050_v42 = vld [vmem:[%s4409_s1 + $0x98] sm:$0xff] }
  0xcd   : > { %1494 = vmatpush.bf16.msra.mxu1 %v3050_v42 }
  0xce   : > { %v525_v60 = vsel %vm499_vm4, %v523_v29, %v524_v33 }
  0xcf   : > { %v3847_v26 = vpop.f32.mrf.mxu2  ;;  %v3849_v57 = vpop.f32.mrf.mxu3  ;;  %v3876_v21 = vpack.c.bf16 %v524_v33, %v525_v60  ;;  %v526_v33 = vrot.slane %v3259_v36, 1 }
  0xd0   : > { %4473 = vst [vmem:[#allocation25_spill] sm:$0xff] %v3847_v26  ;;  %v3851_v16 = vpop.f32.mrf.mxu0  ;;  %v3853_v56 = vpop.f32.mrf.mxu1 }
  0xd1   : > { %4474 = vst [vmem:[#allocation26_spill] sm:$0xff] %v3849_v57  ;;  %v528_v60 = vsel %vm499_vm4, %v526_v33, %v527_v59 }
  0xd2   : > { %4478 = vst [vmem:[#allocation30_spill] sm:$0xff] %v3876_v21 }
  0xd7   : > { %v3864_v57 = vpop.f32.mrf.mxu2  ;;  %v3866_v14 = vpop.f32.mrf.mxu3 }
  0xd8   : > { %4475 = vst [vmem:[#allocation27_spill] sm:$0xff] %v3864_v57  ;;  %v3872_v45 = vpop.f32.mrf.mxu0  ;;  %v3874_v26 = vpop.f32.mrf.mxu1 }
  0xd9   : > { %4476 = vst [vmem:[#allocation28_spill] sm:$0xff] %v3866_v14 }
  0xdb   : > { %1033 = vmatmul.bf16.gmra.mxu1 %v3870_v13  ;;  %1444 = vmatmul.bf16.gmra.mxu0 %v3825_v31  ;;  %v3903_v31 = vpack.c.bf16 %v3261_v37, %v3259_v36  ;;  %v3081_v36 = vld [vmem:[%s4409_s1 + $0x190] sm:$0xff] }
  0xdc   : > { %2538 = vmatmul.msk.bf16.gmra.mxu2 %vm3670_vm5, %v3876_v21  ;;  %2690 = vmatmul.msk.bf16.gmra.mxu3 %vm3325_vm3, %v3551_v22  ;;  %v3089_v37 = vld [vmem:[%s4409_s1 + $0x1d0] sm:$0xff] }
  0xdd   : > { %1777 = vmatpush.bf16.msra.mxu2 %v3081_v36  ;;  %1866 = vmatpush.bf16.msra.mxu3 %v3089_v37  ;;  %v3097_v36 = vld [vmem:[%s4409_s1 + $0x210] sm:$0xff] }
  0xde   : > { %1955 = vmatpush.bf16.msra.mxu0 %v3097_v36 }
  0xdf   : > { %v3886_v42 = vpop.f32.mrf.mxu2  ;;  %v3888_v32 = vpop.f32.mrf.mxu3 }
  0xe0   : > { %4479 = vst [vmem:[#allocation31_spill] sm:$0xff] %v3886_v42  ;;  %v3890_v53 = vpop.f32.mrf.mxu0  ;;  %v3892_v29 = vpop.f32.mrf.mxu1  ;;  %v3905_v42 = vpack.c.bf16 %v527_v59, %v528_v60 }
  0xe1   : > { %4480 = vst [vmem:[#allocation32_spill] sm:$0xff] %v3888_v32 }
  0xe2   : > { %4483 = vst [vmem:[#allocation35_spill] sm:$0xff] %v3905_v42 }
  0xe7   : > { %v3897_v14 = vpop.f32.mrf.mxu2  ;;  %v3899_v21 = vpop.f32.mrf.mxu3 }
  0xe8   : > { %4481 = vst [vmem:[#allocation33_spill] sm:$0xff] %v3897_v14  ;;  %v999_v22 = vpop.f32.mrf.mxu1  ;;  %v1410_v32 = vpop.f32.mrf.mxu0  ;;  %v3049_v14 = vld [vmem:[%s4409_s1 + $0x90] sm:$0xff] }
  0xe9   : > { %4482 = vst [vmem:[#allocation34_spill] sm:$0xff] %v3899_v21  ;;  %v1000_v57 = vadd.f32 %v999_v22, %v3749_v50  ;;  %1495 = vmatpush.bf16.msra.mxu1 %v3049_v14 }
  0xeb   : > { %1038 = vmatmul.bf16.gmra.mxu1 %v3903_v31  ;;  %1449 = vmatmul.bf16.gmra.mxu0 %v3870_v13  ;;  %v530_v13 = vrot.slane %v3369_v41, 1 }
  0xec   : > { %2541 = vmatmul.msk.bf16.gmra.mxu2 %vm3670_vm5, %v3905_v42  ;;  %2694 = vmatmul.msk.bf16.gmra.mxu3 %vm3325_vm3, %v3636_v51  ;;  %v529_v42 = vrot.slane %v3367_v40, 1 }
  0xee   : > { %v531_v37 = vsel %vm499_vm4, %v529_v42, %v530_v13  ;;  %v532_v42 = vrot.slane %v3482_v0, 1 }
  0xef   : > { %v1088_v22 = vpop.f32.mrf.mxu2  ;;  %v1321_v50 = vpop.f32.mrf.mxu3  ;;  %v3938_v12 = vpack.c.bf16 %v530_v13, %v531_v37 }
  0xf0   : > { %v1089_v33 = vadd.f32 %v1088_v22, %v1000_v57  ;;  %v1001_v59 = vpop.f32.mrf.mxu1  ;;  %v1412_v60 = vpop.f32.mrf.mxu0 }
  0xf1   : > { %v1002_v21 = vadd.f32 %v1001_v59, %v3773_v8  ;;  %v3936_v59 = vpack.c.bf16 %v3369_v41, %v3367_v40 }
  0xf2   : > { %v1322_v51 = vadd.f32 %v1321_v50, %v1089_v33 }
  0xf4   : > { %v3931_v57 = vadd.f32 %v1410_v32, %v1322_v51  ;;  %v533_v32 = vrot.slane %v3484_v1, 1 }
  0xf7   : > { %v1090_v8 = vpop.f32.mrf.mxu2  ;;  %v1323_v22 = vpop.f32.mrf.mxu3 }
  0xf8   : > { %v1091_v50 = vadd.f32 %v1090_v8, %v1002_v21  ;;  %v1004_v33 = vpop.f32.mrf.mxu1  ;;  %v1415_v17 = vpop.f32.mrf.mxu0  ;;  %v534_v8 = vsel %vm499_vm4, %v532_v42, %v533_v32 }
  0xf9   : > { %v1005_v63 = vadd.f32 %v1004_v33, %v3794_v34 }
  0xfa   : > { %v1324_v30 = vadd.f32 %v1323_v22, %v1091_v50 }
  0xfb   : > { %1043 = vmatmul.bf16.gmra.mxu1 %v3936_v59  ;;  %1454 = vmatmul.bf16.gmra.mxu0 %v3903_v31 }
  0xfc   : > { %2544 = vmatmul.msk.bf16.gmra.mxu2 %vm3670_vm5, %v3938_v12  ;;  %2698 = vmatmul.msk.bf16.gmra.mxu3 %vm3325_vm3, %v3318_v15  ;;  %v3949_v40 = vadd.f32 %v1412_v60, %v1324_v30  ;;  %v3959_v30 = vpack.c.bf16 %v3484_v1, %v3482_v0  ;;  %v3080_v0 = vld [vmem:[%s4409_s1 + $0x188] sm:$0xff] }
  0xfd   : > { %v3088_v1 = vld [vmem:[%s4409_s1 + $0x1c8] sm:$0xff]  ;;  %1778 = vmatpush.bf16.msra.mxu2 %v3080_v0 }
  0xfe   : > { %1867 = vmatpush.bf16.msra.mxu3 %v3088_v1 }
  0xff   : > { %v1093_v41 = vpop.f32.mrf.mxu2  ;;  %v1326_v13 = vpop.f32.mrf.mxu3 }
 0x100   : > { %v1094_v51 = vadd.f32 %v1093_v41, %v1005_v63  ;;  %v1006_v21 = vpop.f32.mrf.mxu1  ;;  %v1417_v14 = vpop.f32.mrf.mxu0  ;;  %v3961_v41 = vpack.c.bf16 %v533_v32, %v534_v8  ;;  %v536_v8 = vrot.slane %v3613_v62, 1 }
 0x101   : > { %v1007_v34 = vadd.f32 %v1006_v21, %v3812_v48 }
 0x102   : > { %v1327_v36 = vadd.f32 %v1326_v13, %v1094_v51 }
 0x104   : > { %v3954_v37 = vadd.f32 %v1415_v17, %v1327_v36  ;;  %v535_v36 = vrot.slane %v3611_v61, 1 }
 0x107   : > { %v1095_v22 = vpop.f32.mrf.mxu2  ;;  %v1328_v50 = vpop.f32.mrf.mxu3 }
 0x108   : > { %v1096_v63 = vadd.f32 %v1095_v22, %v1007_v34  ;;  %v1009_v60 = vpop.f32.mrf.mxu1  ;;  %v1420_v33 = vpop.f32.mrf.mxu0 }
 0x109   : > { %v1010_v48 = vadd.f32 %v1009_v60, %v3827_v6  ;;  %v537_v60 = vsel %vm499_vm4, %v535_v36, %v536_v8 }
 0x10a   : > { %v1329_v21 = vadd.f32 %v1328_v50, %v1096_v63  ;;  %v3048_v50 = vld [vmem:[%s4409_s1 + $0x88] sm:$0xff] }
 0x10b   : > { %1048 = vmatmul.bf16.gmra.mxu1 %v3959_v30  ;;  %1459 = vmatmul.bf16.gmra.mxu0 %v3936_v59 }
 0x10c   : > { %2547 = vmatmul.msk.bf16.gmra.mxu2 %vm3670_vm5, %v3961_v41  ;;  %2702 = vmatmul.msk.bf16.gmra.mxu3 %vm3325_vm3, %v3447_v49  ;;  %v3978_v17 = vadd.f32 %v1417_v14, %v1329_v21  ;;  %v3096_v14 = vld [vmem:[%s4409_s1 + $0x208] sm:$0xff]  ;;  %v3994_v21 = vpack.c.bf16 %v3613_v62, %v3611_v61 }
 0x10d   : > { %1496 = vmatpush.bf16.msra.mxu1 %v3048_v50  ;;  %1956 = vmatpush.bf16.msra.mxu0 %v3096_v14  ;;  %v539_v50 = vrot.slane %v3265_v39, 1 }
 0x10f   : > { %v1098_v6 = vpop.f32.mrf.mxu2  ;;  %v1331_v13 = vpop.f32.mrf.mxu3 }
 0x110   : > { %v1099_v51 = vadd.f32 %v1098_v6, %v1010_v48  ;;  %v1011_v34 = vpop.f32.mrf.mxu1  ;;  %v1422_v42 = vpop.f32.mrf.mxu0 }
 0x111   : > { %v1012_v32 = vadd.f32 %v1011_v34, %v3851_v16 }
 0x112   : > { %v1332_v22 = vadd.f32 %v1331_v13, %v1099_v51  ;;  %v3996_v13 = vpack.c.bf16 %v536_v8, %v537_v60 }
 0x114   : > { %v3989_v63 = vadd.f32 %v1420_v33, %v1332_v22  ;;  %v538_v22 = vrot.slane %v3263_v38, 1 }
 0x117   : > { %v1100_v16 = vpop.f32.mrf.mxu2  ;;  %v1333_v48 = vpop.f32.mrf.mxu3 }
 0x118   : > { %v1101_v0 = vadd.f32 %v1100_v16, %v1012_v32  ;;  %v1014_v1 = vpop.f32.mrf.mxu1  ;;  %v1425_v6 = vpop.f32.mrf.mxu0  ;;  %v540_v16 = vsel %vm499_vm4, %v538_v22, %v539_v50 }
 0x119   : > { %v1015_v51 = vadd.f32 %v1014_v1, %v3872_v45 }
 0x11a   : > { %v1334_v34 = vadd.f32 %v1333_v48, %v1101_v0 }
 0x11b   : > { %1053 = vmatmul.bf16.gmra.mxu1 %v3994_v21  ;;  %1464 = vmatmul.bf16.gmra.mxu0 %v3959_v30 }
 0x11c   : > { %2550 = vmatmul.msk.bf16.gmra.mxu2 %vm3670_vm5, %v3996_v13  ;;  %2706 = vmatmul.msk.bf16.gmra.mxu3 %vm3325_vm3, %v3561_v23  ;;  %v4007_v61 = vadd.f32 %v1422_v42, %v1334_v34  ;;  %v4017_v42 = vpack.c.bf16 %v3265_v39, %v3263_v38  ;;  %v3079_v38 = vld [vmem:[%s4409_s1 + $0x180] sm:$0xff] }
 0x11d   : > { %v3087_v39 = vld [vmem:[%s4409_s1 + $0x1c0] sm:$0xff]  ;;  %1779 = vmatpush.bf16.msra.mxu2 %v3079_v38 }
 0x11e   : > { %1868 = vmatpush.bf16.msra.mxu3 %v3087_v39  ;;  %v4052_v39 = vpack.c.bf16 %v3374_v44, %v3372_v43 }
 0x11f   : > { %v1103_v62 = vpop.f32.mrf.mxu2  ;;  %v1336_v33 = vpop.f32.mrf.mxu3 }
 0x120   : > { %v1104_v32 = vadd.f32 %v1103_v62, %v1015_v51  ;;  %v1016_v36 = vpop.f32.mrf.mxu1  ;;  %v1427_v45 = vpop.f32.mrf.mxu0  ;;  %v4019_v62 = vpack.c.bf16 %v539_v50, %v540_v16  ;;  %v542_v16 = vrot.slane %v3374_v44, 1 }
 0x121   : > { %v1017_v8 = vadd.f32 %v1016_v36, %v3890_v53 }
 0x122   : > { %v1337_v14 = vadd.f32 %v1336_v33, %v1104_v32 }
 0x124   : > { %v4012_v60 = vadd.f32 %v1425_v6, %v1337_v14  ;;  %v541_v14 = vrot.slane %v3372_v43, 1 }
 0x127   : > { %v1105_v48 = vpop.f32.mrf.mxu2  ;;  %v1338_v0 = vpop.f32.mrf.mxu3 }
 0x128   : > { %v1106_v1 = vadd.f32 %v1105_v48, %v1017_v8  ;;  %v1019_v51 = vpop.f32.mrf.mxu1  ;;  %v1430_v34 = vpop.f32.mrf.mxu0 }
 0x129   : > { %v1020_v33 = vadd.f32 %v1019_v51, %v3751_v54  ;;  %v3095_v54 = vld [vmem:[%s4409_s1 + $0x200] sm:$0xff] }
 0x12a   : > { %v1339_v53 = vadd.f32 %v1338_v0, %v1106_v1  ;;  %v3047_v0 = vld [vmem:[%s4409_s1 + $0x80] sm:$0xff]  ;;  %1957 = vmatpush.bf16.msra.mxu0 %v3095_v54  ;;  %v543_v1 = vsel %vm499_vm4, %v541_v14, %v542_v16 }
 0x12b   : > { %1058 = vmatmul.bf16.gmra.mxu1 %v4017_v42  ;;  %1469 = vmatmul.bf16.gmra.mxu0 %v3994_v21 }
 0x12c   : > { %2553 = vmatmul.msk.bf16.gmra.mxu2 %vm3670_vm5, %v4019_v62  ;;  %2710 = vmatmul.msk.bf16.gmra.mxu3 %vm3325_vm3, %v3640_v5  ;;  %v4035_v6 = vadd.f32 %v1427_v45, %v1339_v53 }
 0x12d   : > { %1497 = vmatpush.bf16.msra.mxu1 %v3047_v0  ;;  %v4486_v0 = vld [vmem:[#allocation5_spill] sm:$0xff] }
 0x12e   : > { %4484 = vst [vmem:[#allocation36_spill] sm:$0xff] %v4035_v6  ;;  %v545_v54 = vrot.slane %v4486_v0, 1 }
 0x12f   : > { %v1108_v32 = vpop.f32.mrf.mxu2  ;;  %v1341_v36 = vpop.f32.mrf.mxu3 }
 0x130   : > { %v1109_v8 = vadd.f32 %v1108_v32, %v1020_v33  ;;  %v1021_v22 = vpop.f32.mrf.mxu1  ;;  %v1432_v50 = vpop.f32.mrf.mxu0 }
 0x131   : > { %v1022_v51 = vadd.f32 %v1021_v22, %v3775_v47 }
 0x132   : > { %v1342_v48 = vadd.f32 %v1341_v36, %v1109_v8  ;;  %v4054_v8 = vpack.c.bf16 %v542_v16, %v543_v1 }
 0x134   : > { %v4046_v45 = vadd.f32 %v1430_v34, %v1342_v48  ;;  %v544_v48 = vrot.slane %v3493_v4, 1 }
 0x137   : > { %v1110_v53 = vpop.f32.mrf.mxu2  ;;  %v1343_v38 = vpop.f32.mrf.mxu3 }
 0x138   : > { %v1111_v33 = vadd.f32 %v1110_v53, %v1022_v51  ;;  %v1024_v32 = vpop.f32.mrf.mxu1  ;;  %v1435_v36 = vpop.f32.mrf.mxu0  ;;  %v546_v53 = vsel %vm499_vm4, %v544_v48, %v545_v54 }
 0x139   : > { %v1025_v44 = vadd.f32 %v1024_v32, %v3796_v3  ;;  %v4075_v3 = vpack.c.bf16 %v4486_v0, %v3493_v4 }
 0x13a   : > { %v1344_v6 = vadd.f32 %v1343_v38, %v1111_v33 }
 0x13b   : > { %1063 = vmatmul.bf16.gmra.mxu1 %v4052_v39  ;;  %1474 = vmatmul.bf16.gmra.mxu0 %v4017_v42 }
 0x13c   : > { %2556 = vmatmul.msk.bf16.gmra.mxu2 %vm3670_vm5, %v4054_v8  ;;  %2714 = vmatmul.msk.bf16.gmra.mxu3 %vm3325_vm3, %v3329_v19  ;;  %v4064_v43 = vadd.f32 %v1432_v50, %v1344_v6 }
 0x13e   : > { %4485 = vst [vmem:[#allocation37_spill] sm:$0xff] %v4064_v43 }
 0x13f   : > { %v1113_v47 = vpop.f32.mrf.mxu2  ;;  %v1346_v34 = vpop.f32.mrf.mxu3 }
 0x140   : > { %v1114_v22 = vadd.f32 %v1113_v47, %v1025_v44  ;;  %v1026_v14 = vpop.f32.mrf.mxu1  ;;  %v1437_v16 = vpop.f32.mrf.mxu0  ;;  %v4077_v47 = vpack.c.bf16 %v545_v54, %v546_v53  ;;  %v699_v54 = vrot.slane %v3615_v7, 1 }
 0x141   : > { %v1027_v38 = vadd.f32 %v1026_v14, %v3814_v52  ;;  %v4487_v52 = vld [vmem:[#allocation4_spill] sm:$0xff] }
 0x142   : > { %v1347_v1 = vadd.f32 %v1346_v34, %v1114_v22 }
 0x144   : > { %v4069_v51 = vadd.f32 %v1435_v36, %v1347_v1  ;;  %v700_v1 = vrot.slane %v3617_v9, 1 }
 0x147   : > { %v1115_v6 = vpop.f32.mrf.mxu2  ;;  %v1348_v50 = vpop.f32.mrf.mxu3 }
 0x148   : > { %v1116_v33 = vadd.f32 %v1115_v6, %v1027_v38  ;;  %v1029_v32 = vpop.f32.mrf.mxu1  ;;  %v1440_v44 = vpop.f32.mrf.mxu0  ;;  %v701_v6 = vsel %vm499_vm4, %v699_v54, %v700_v1 }
 0x149   : > { %v1030_v36 = vadd.f32 %v1029_v32, %v3829_v35  ;;  %v4098_v35 = vpack.c.bf16 %v3617_v9, %v3615_v7 }
 0x14a   : > { %v1349_v43 = vadd.f32 %v1348_v50, %v1116_v33 }
 0x14b   : > { %1068 = vmatmul.bf16.gmra.mxu1 %v4075_v3  ;;  %1479 = vmatmul.bf16.gmra.mxu0 %v4052_v39 }
 0x14c   : > { %2559 = vmatmul.msk.bf16.gmra.mxu2 %vm3670_vm5, %v4077_v47  ;;  %2718 = vmatmul.msk.bf16.gmra.mxu3 %vm3325_vm3, %v4487_v52  ;;  %v4087_v4 = vadd.f32 %v1437_v16, %v1349_v43 }
 0x14e   : > { %4488 = vst [vmem:[#allocation5_spill] sm:$0xff] %v4087_v4 }
 0x14f   : > { %v1118_v34 = vpop.f32.mrf.mxu2  ;;  %v1351_v22 = vpop.f32.mrf.mxu3 }
 0x150   : > { %v1119_v14 = vadd.f32 %v1118_v34, %v1030_v36  ;;  %v1031_v48 = vpop.f32.mrf.mxu1  ;;  %v1442_v0 = vpop.f32.mrf.mxu0  ;;  %v4100_v34 = vpack.c.bf16 %v700_v1, %v701_v6  ;;  %v4490_v1 = vmov 0.0  }
 0x151   : > { %v1032_v50 = vadd.f32 %v1031_v48, %v3853_v56 }
 0x152   : > { %v1352_v53 = vadd.f32 %v1351_v22, %v1119_v14 }
 0x154   : > { %v4092_v38 = vadd.f32 %v1440_v44, %v1352_v53  ;;  %v500_v53 = vrot.slane %v4490_v1, 1 }
 0x157   : > { %v1120_v43 = vpop.f32.mrf.mxu2  ;;  %v1353_v16 = vpop.f32.mrf.mxu3 }
 0x158   : > { %v1121_v33 = vadd.f32 %v1120_v43, %v1032_v50  ;;  %v1034_v32 = vpop.f32.mrf.mxu1  ;;  %v1445_v36 = vpop.f32.mrf.mxu0  ;;  %v4117_v43 = vpack.c.bf16 %v500_v53, %v500_v53 }
 0x159   : > { %v1035_v9 = vadd.f32 %v1034_v32, %v3874_v26 }
 0x15a   : > { %v1354_v4 = vadd.f32 %v1353_v16, %v1121_v33 }
 0x15b   : > { %1073 = vmatmul.bf16.gmra.mxu1 %v4098_v35  ;;  %1484 = vmatmul.bf16.gmra.mxu0 %v4075_v3 }
 0x15c   : > { %2562 = vmatmul.msk.bf16.gmra.mxu2 %vm3670_vm5, %v4100_v34  ;;  %2722 = vmatmul.msk.bf16.gmra.mxu3 %vm3325_vm3, %v3565_v27  ;;  %v4110_v7 = vadd.f32 %v1442_v0, %v1354_v4 }
 0x15e   : > { %4489 = vst [vmem:[#allocation4_spill] sm:$0xff] %v4110_v7 }
 0x15f   : > { %v1123_v56 = vpop.f32.mrf.mxu2  ;;  %v1356_v44 = vpop.f32.mrf.mxu3 }
 0x160   : > { %v1124_v22 = vadd.f32 %v1123_v56, %v1035_v9  ;;  %v1036_v14 = vpop.f32.mrf.mxu1  ;;  %v1447_v48 = vpop.f32.mrf.mxu0 }
 0x161   : > { %v1037_v50 = vadd.f32 %v1036_v14, %v3892_v29 }
 0x162   : > { %v1357_v54 = vadd.f32 %v1356_v44, %v1124_v22 }
 0x164   : > { %v4114_v6 = vadd.f32 %v1445_v36, %v1357_v54 }
 0x167   : > { %v1125_v16 = vpop.f32.mrf.mxu2  ;;  %v1358_v33 = vpop.f32.mrf.mxu3 }
 0x168   : > { %v1126_v4 = vadd.f32 %v1125_v16, %v1037_v50  ;;  %v1039_v0 = vpop.f32.mrf.mxu1  ;;  %v1450_v7 = vpop.f32.mrf.mxu0 }
 0x169   : > { %v1040_v32 = vadd.f32 %v1039_v0, %v3769_v46 }
 0x16a   : > { %v1359_v26 = vadd.f32 %v1358_v33, %v1126_v4 }
 0x16b   : > { %2725 = vmatmul.msk.bf16.vlgmr.msra.gmra.mxu1 %vm3670_vm5, %v4117_v43  ;;  %2981 = vmatmul.msk.bf16.vlgmr.msra.gmra.mxu0 %vm3670_vm5, %v3645_v11 }
 0x16c   : > { %2918 = vmatmul.msk.bf16.vlgmr.msra.gmra.mxu2 %vm3325_vm3, %v3428_v24  ;;  %1869 = vmatmul.bf16.vlgmr.msra.gmra.mxu3 %v3609_v58  ;;  %v4129_v29 = vadd.f32 %v1447_v48, %v1359_v26 }
 0x16f   : > { %v1128_v36 = vpop.f32.mrf.mxu2  ;;  %v1361_v9 = vpop.f32.mrf.mxu3 }
 0x170   : > { %v1129_v56 = vadd.f32 %v1128_v36, %v1040_v32  ;;  %v1041_v44 = vpop.f32.mrf.mxu1  ;;  %v1452_v22 = vpop.f32.mrf.mxu0 }
 0x171   : > { %v1042_v1 = vadd.f32 %v1041_v44, %v3786_v25  ;;  %v4491_v25 = vld [vmem:[#allocation19_spill] sm:$0xff] }
 0x172   : > { %v1362_v14 = vadd.f32 %v1361_v9, %v1129_v56  ;;  %v4492_v9 = vld [vmem:[#allocation21_spill] sm:$0xff] }
 0x174   : > { %v4132_v54 = vadd.f32 %v1450_v7, %v1362_v14 }
 0x177   : > { %v1130_v53 = vpop.f32.mrf.mxu2  ;;  %v1363_v50 = vpop.f32.mrf.mxu3 }
 0x178   : > { %v1131_v16 = vadd.f32 %v1130_v53, %v1042_v1  ;;  %v1044_v24 = vpop.f32.mrf.mxu1  ;;  %v1455_v33 = vpop.f32.mrf.mxu0 }
 0x179   : > { %v1045_v7 = vadd.f32 %v1044_v24, %v4491_v25 }
 0x17a   : > { %v1364_v58 = vadd.f32 %v1363_v50, %v1131_v16  ;;  %v4494_v50 = vld [vmem:[#allocation7_spill] sm:$0xff] }
 0x17b   : > { %2728 = vmatmul.msk.bf16.gmra.mxu1 %vm3670_vm5, %v3576_v55  ;;  %2984 = vmatmul.msk.bf16.gmra.mxu0 %vm3670_vm5, %v3675_v10  ;;  %v4495_v16 = vld [vmem:[#allocation11_spill] sm:$0xff] }
 0x17c   : > { %2922 = vmatmul.msk.bf16.gmra.mxu2 %vm3325_vm3, %v3543_v2  ;;  %1874 = vmatmul.bf16.gmra.mxu3 %v3661_v28  ;;  %v4145_v46 = vadd.f32 %v1452_v22, %v1364_v58  ;;  %v4493_v22 = vld [vmem:[#allocation12_spill] sm:$0xff] }
 0x17f   : > { %v1133_v48 = vpop.f32.mrf.mxu2  ;;  %v1366_v4 = vpop.f32.mrf.mxu3 }
 0x180   : > { %v1134_v0 = vadd.f32 %v1133_v48, %v1045_v7  ;;  %v1046_v26 = vpop.f32.mrf.mxu1  ;;  %v1457_v32 = vpop.f32.mrf.mxu0 }
 0x181   : > { %v1047_v56 = vadd.f32 %v1046_v26, %v4492_v9 }
 0x182   : > { %v1367_v55 = vadd.f32 %v1366_v4, %v1134_v0 }
 0x184   : > { %v4148_v36 = vadd.f32 %v1455_v33, %v1367_v55  ;;  %v4497_v33 = vld [vmem:[#allocation25_spill] sm:$0xff]  ;;  %v4499_v55 = vld [vmem:[#allocation27_spill] sm:$0xff] }
 0x187   : > { %v1135_v44 = vpop.f32.mrf.mxu2  ;;  %v1368_v14 = vpop.f32.mrf.mxu3 }
 0x188   : > { %v1136_v1 = vadd.f32 %v1135_v44, %v1047_v56  ;;  %v1049_v2 = vpop.f32.mrf.mxu1  ;;  %v1460_v53 = vpop.f32.mrf.mxu0 }
 0x189   : > { %v1050_v58 = vadd.f32 %v1049_v2, %v4497_v33  ;;  %v4501_v2 = vld [vmem:[#allocation2_spill] sm:$0xff]  ;;  %v4504_v33 = vld [vmem:[#allocation31_spill] sm:$0xff] }
 0x18a   : > { %v1369_v28 = vadd.f32 %v1368_v14, %v1136_v1 }
 0x18b   : > { %2731 = vmatmul.msk.bf16.gmra.mxu1 %vm3670_vm5, %v3645_v11  ;;  %2987 = vmatmul.msk.bf16.gmra.mxu0 %vm3670_vm5, %v4493_v22 }
 0x18c   : > { %2926 = vmatmul.msk.bf16.gmra.mxu2 %vm3325_vm3, %v4494_v50  ;;  %1879 = vmatmul.bf16.gmra.mxu3 %v4495_v16  ;;  %v4161_v24 = vadd.f32 %v1457_v32, %v1369_v28  ;;  %v4500_v32 = vld [vmem:[#allocation14_spill] sm:$0xff] }
 0x18e   : > { %4496 = vst [vmem:[#allocation19_spill] sm:$0xff] %v4161_v24 }
 0x18f   : > { %v1138_v25 = vpop.f32.mrf.mxu2  ;;  %v1371_v7 = vpop.f32.mrf.mxu3 }
 0x190   : > { %v1139_v48 = vadd.f32 %v1138_v25, %v1050_v58  ;;  %v1051_v4 = vpop.f32.mrf.mxu1  ;;  %v1462_v0 = vpop.f32.mrf.mxu0 }
 0x191   : > { %v1052_v9 = vadd.f32 %v1051_v4, %v4499_v55 }
 0x192   : > { %v1372_v11 = vadd.f32 %v1371_v7, %v1139_v48 }
 0x194   : > { %v4164_v26 = vadd.f32 %v1460_v53, %v1372_v11  ;;  %v4502_v53 = vld [vmem:[#allocation13_spill] sm:$0xff] }
 0x196   : > { %4498 = vst [vmem:[#allocation21_spill] sm:$0xff] %v4164_v26 }
 0x197   : > { %v1140_v56 = vpop.f32.mrf.mxu2  ;;  %v1373_v44 = vpop.f32.mrf.mxu3 }
 0x198   : > { %v1141_v14 = vadd.f32 %v1140_v56, %v1052_v9  ;;  %v1054_v1 = vpop.f32.mrf.mxu1  ;;  %v1465_v50 = vpop.f32.mrf.mxu0  ;;  %v4506_v9 = vld [vmem:[#allocation33_spill] sm:$0xff] }
 0x199   : > { %v1055_v58 = vadd.f32 %v1054_v1, %v4504_v33  ;;  %v4508_v1 = vld [vmem:[#allocation3_spill] sm:$0xff] }
 0x19a   : > { %v1374_v16 = vadd.f32 %v1373_v44, %v1141_v14  ;;  %v4511_v33 = vld [vmem:[#allocation15_spill] sm:$0xff] }
 0x19b   : > { %2734 = vmatmul.msk.bf16.gmra.mxu1 %vm3670_vm5, %v3675_v10  ;;  %2990 = vmatmul.msk.bf16.gmra.mxu0 %vm3670_vm5, %v4500_v32 }
 0x19c   : > { %2930 = vmatmul.msk.bf16.gmra.mxu2 %vm3325_vm3, %v4501_v2  ;;  %1884 = vmatmul.bf16.gmra.mxu3 %v4502_v53  ;;  %v4177_v28 = vadd.f32 %v1462_v0, %v1374_v16  ;;  %v4507_v0 = vld [vmem:[#allocation18_spill] sm:$0xff] }
 0x19e   : > { %4503 = vst [vmem:[#allocation12_spill] sm:$0xff] %v4177_v28 }
 0x19f   : > { %v1143_v25 = vpop.f32.mrf.mxu2  ;;  %v1376_v7 = vpop.f32.mrf.mxu3 }
 0x1a0   : > { %v1144_v48 = vadd.f32 %v1143_v25, %v1055_v58  ;;  %v1056_v4 = vpop.f32.mrf.mxu1  ;;  %v1467_v11 = vpop.f32.mrf.mxu0 }
 0x1a1   : > { %v1057_v56 = vadd.f32 %v1056_v4, %v4506_v9  ;;  %v4513_v9 = vld [vmem:[#allocation16_spill] sm:$0xff] }
 0x1a2   : > { %v1377_v10 = vadd.f32 %v1376_v7, %v1144_v48 }
 0x1a4   : > { %v4180_v55 = vadd.f32 %v1465_v50, %v1377_v10  ;;  %v4509_v50 = vld [vmem:[#allocation17_spill] sm:$0xff] }
 0x1a6   : > { %4505 = vst [vmem:[#allocation7_spill] sm:$0xff] %v4180_v55 }
 0x1a7   : > { %v1145_v44 = vpop.f32.mrf.mxu2  ;;  %v1378_v14 = vpop.f32.mrf.mxu3 }
 0x1a8   : > { %v1146_v26 = vadd.f32 %v1145_v44, %v1057_v56  ;;  %v1059_v2 = vpop.f32.mrf.mxu1  ;;  %v1470_v24 = vpop.f32.mrf.mxu0 }
 0x1a9   : > { %v1060_v58 = vadd.f32 %v1059_v2, %v4511_v33  ;;  %v4515_v2 = vld [vmem:[#allocation6_spill] sm:$0xff]  ;;  %v4518_v33 = vld [vmem:[#allocation20_spill] sm:$0xff] }
 0x1aa   : > { %v1379_v53 = vadd.f32 %v1378_v14, %v1146_v26 }
 0x1ab   : > { %2737 = vmatmul.msk.bf16.gmra.mxu1 %vm3670_vm5, %v4493_v22  ;;  %2993 = vmatmul.msk.bf16.gmra.mxu0 %vm3670_vm5, %v4507_v0 }
 0x1ac   : > { %2934 = vmatmul.msk.bf16.gmra.mxu2 %vm3325_vm3, %v4508_v1  ;;  %1889 = vmatmul.bf16.gmra.mxu3 %v4509_v50  ;;  %v4193_v16 = vadd.f32 %v1467_v11, %v1379_v53  ;;  %v4514_v11 = vld [vmem:[#allocation24_spill] sm:$0xff] }
 0x1ae   : > { %4510 = vst [vmem:[#allocation11_spill] sm:$0xff] %v4193_v16 }
 0x1af   : > { %v1148_v25 = vpop.f32.mrf.mxu2  ;;  %v1381_v26 = vpop.f32.mrf.mxu3 }
 0x1b0   : > { %v1149_v7 = vadd.f32 %v1148_v25, %v1060_v58  ;;  %v1061_v48 = vpop.f32.mrf.mxu1  ;;  %v1472_v4 = vpop.f32.mrf.mxu0 }
 0x1b1   : > { %v1062_v56 = vadd.f32 %v1061_v48, %v4513_v9  ;;  %v4520_v9 = vld [vmem:[#allocation22_spill] sm:$0xff] }
 0x1b2   : > { %v1382_v22 = vadd.f32 %v1381_v26, %v1149_v7 }
 0x1b4   : > { %v4196_v10 = vadd.f32 %v1470_v24, %v1382_v22  ;;  %v4516_v24 = vld [vmem:[#allocation23_spill] sm:$0xff] }
 0x1b6   : > { %4512 = vst [vmem:[#allocation25_spill] sm:$0xff] %v4196_v10 }
 0x1b7   : > { %v1150_v44 = vpop.f32.mrf.mxu2  ;;  %v1383_v14 = vpop.f32.mrf.mxu3 }
 0x1b8   : > { %v1151_v55 = vadd.f32 %v1150_v44, %v1062_v56  ;;  %v1064_v1 = vpop.f32.mrf.mxu1  ;;  %v1475_v28 = vpop.f32.mrf.mxu0 }
 0x1b9   : > { %v1065_v58 = vadd.f32 %v1064_v1, %v4518_v33  ;;  %v4522_v1 = vld [vmem:[#allocation8_spill] sm:$0xff]  ;;  %v4524_v33 = vld [vmem:[#allocation26_spill] sm:$0xff] }
 0x1ba   : > { %v1384_v50 = vadd.f32 %v1383_v14, %v1151_v55 }
 0x1bb   : > { %2740 = vmatmul.msk.bf16.gmra.mxu1 %vm3670_vm5, %v4500_v32  ;;  %2996 = vmatmul.msk.bf16.gmra.mxu0 %vm3670_vm5, %v4514_v11 }
 0x1bc   : > { %2938 = vmatmul.msk.bf16.gmra.mxu2 %vm3325_vm3, %v4515_v2  ;;  %1894 = vmatmul.bf16.gmra.mxu3 %v4516_v24  ;;  %v4209_v53 = vadd.f32 %v1472_v4, %v1384_v50  ;;  %v4521_v4 = vld [vmem:[#allocation30_spill] sm:$0xff] }
 0x1be   : > { %4517 = vst [vmem:[#allocation27_spill] sm:$0xff] %v4209_v53 }
 0x1bf   : > { %v1153_v25 = vpop.f32.mrf.mxu2  ;;  %v1386_v55 = vpop.f32.mrf.mxu3 }
 0x1c0   : > { %v1154_v26 = vadd.f32 %v1153_v25, %v1065_v58  ;;  %v1066_v7 = vpop.f32.mrf.mxu1  ;;  %v1477_v48 = vpop.f32.mrf.mxu0 }
 0x1c1   : > { %v1067_v56 = vadd.f32 %v1066_v7, %v4520_v9  ;;  %v4525_v9 = vld [vmem:[#allocation28_spill] sm:$0xff] }
 0x1c2   : > { %v1387_v32 = vadd.f32 %v1386_v55, %v1154_v26 }
 0x1c4   : > { %v4212_v22 = vadd.f32 %v1475_v28, %v1387_v32  ;;  %v4523_v28 = vld [vmem:[#allocation29_spill] sm:$0xff] }
 0x1c6   : > { %4519 = vst [vmem:[#allocation14_spill] sm:$0xff] %v4212_v22 }
 0x1c7   : > { %v1155_v44 = vpop.f32.mrf.mxu2  ;;  %v1388_v14 = vpop.f32.mrf.mxu3 }
 0x1c8   : > { %v1156_v10 = vadd.f32 %v1155_v44, %v1067_v56  ;;  %v1069_v2 = vpop.f32.mrf.mxu1  ;;  %v1480_v16 = vpop.f32.mrf.mxu0 }
 0x1c9   : > { %v1070_v58 = vadd.f32 %v1069_v2, %v4524_v33  ;;  %v4527_v2 = vld [vmem:[#allocation32_spill] sm:$0xff] }
 0x1ca   : > { %v1389_v24 = vadd.f32 %v1388_v14, %v1156_v10 }
 0x1cb   : > { %2743 = vmatmul.msk.bf16.gmra.mxu1 %vm3670_vm5, %v4507_v0  ;;  %2999 = vmatmul.msk.bf16.gmra.mxu0 %vm3670_vm5, %v4521_v4 }
 0x1cc   : > { %2942 = vmatmul.msk.bf16.gmra.mxu2 %vm3325_vm3, %v4522_v1  ;;  %1899 = vmatmul.bf16.gmra.mxu3 %v4523_v28  ;;  %v4225_v50 = vadd.f32 %v1477_v48, %v1389_v24  ;;  %v4526_v48 = vld [vmem:[#allocation35_spill] sm:$0xff] }
 0x1cf   : > { %v1158_v25 = vpop.f32.mrf.mxu2  ;;  %v1391_v10 = vpop.f32.mrf.mxu3 }
 0x1d0   : > { %v1159_v55 = vadd.f32 %v1158_v25, %v1070_v58  ;;  %v1071_v26 = vpop.f32.mrf.mxu1  ;;  %v1482_v7 = vpop.f32.mrf.mxu0 }
 0x1d1   : > { %v1072_v56 = vadd.f32 %v1071_v26, %v4525_v9  ;;  %v4528_v26 = vld [vmem:[#allocation34_spill] sm:$0xff] }
 0x1d2   : > { %v1392_v0 = vadd.f32 %v1391_v10, %v1159_v55 }
 0x1d4   : > { %v4228_v32 = vadd.f32 %v1480_v16, %v1392_v0 }
 0x1d7   : > { %v1160_v44 = vpop.f32.mrf.mxu2  ;;  %v1393_v14 = vpop.f32.mrf.mxu3 }
 0x1d8   : > { %v1161_v22 = vadd.f32 %v1160_v44, %v1072_v56  ;;  %v1074_v1 = vpop.f32.mrf.mxu1  ;;  %v1485_v53 = vpop.f32.mrf.mxu0 }
 0x1d9   : > { %v1075_v24 = vadd.f32 %v1074_v1, %v4527_v2 }
 0x1da   : > { %v1394_v28 = vadd.f32 %v1393_v14, %v1161_v22 }
 0x1db   : > { %2746 = vmatmul.msk.bf16.gmra.mxu1 %vm3670_vm5, %v4514_v11  ;;  %3002 = vmatmul.msk.bf16.gmra.mxu0 %vm3670_vm5, %v4526_v48 }
 0x1dc   : > { %2946 = vmatmul.msk.bf16.gmra.mxu2 %vm3325_vm3, %v3318_v15  ;;  %1904 = vmatmul.bf16.gmra.mxu3 %v3903_v31  ;;  %v4241_v16 = vadd.f32 %v1482_v7, %v1394_v28 }
 0x1df   : > { %v1163_v33 = vpop.f32.mrf.mxu2  ;;  %v1396_v22 = vpop.f32.mrf.mxu3 }
 0x1e0   : > { %v1164_v58 = vadd.f32 %v1163_v33, %v1075_v24  ;;  %v1076_v25 = vpop.f32.mrf.mxu1  ;;  %v1487_v10 = vpop.f32.mrf.mxu0 }
 0x1e1   : > { %v1077_v0 = vadd.f32 %v1076_v25, %v4528_v26 }
 0x1e2   : > { %v1397_v11 = vadd.f32 %v1396_v22, %v1164_v58 }
 0x1e4   : > { %v4244_v55 = vadd.f32 %v1485_v53, %v1397_v11 }
 0x1e7   : > { %v1165_v9 = vpop.f32.mrf.mxu2  ;;  %v1398_v56 = vpop.f32.mrf.mxu3 }
 0x1e8   : > { %v1166_v44 = vadd.f32 %v1165_v9, %v1077_v0  ;;  %v1499_v15 = vpop.f32.mrf.mxu1  ;;  %v1959_v31 = vpop.f32.mrf.mxu0 }
 0x1e9   : > { %v1500_v33 = vadd.f32 %v1499_v15, %v3931_v57 }
 0x1ea   : > { %v1399_v7 = vadd.f32 %v1398_v56, %v1166_v44 }
 0x1eb   : > { %2749 = vmatmul.msk.bf16.gmra.mxu1 %vm3670_vm5, %v4521_v4  ;;  %3005 = vmatmul.msk.bf16.gmra.mxu0 %vm3670_vm5, %v3938_v12 }
 0x1ec   : > { %2950 = vmatmul.msk.bf16.gmra.mxu2 %vm3325_vm3, %v3447_v49  ;;  %1909 = vmatmul.bf16.gmra.mxu3 %v3936_v59  ;;  %v4257_v53 = vadd.f32 %v1487_v10, %v1399_v7 }
 0x1ef   : > { %v1781_v14 = vpop.f32.mrf.mxu2  ;;  %v1870_v1 = vpop.f32.mrf.mxu3 }
 0x1f0   : > { %v1871_v28 = vadd.f32 %v1870_v1, %v1781_v14  ;;  %v1501_v2 = vpop.f32.mrf.mxu1  ;;  %v1961_v24 = vpop.f32.mrf.mxu0 }
 0x1f1   : > { %v1502_v11 = vadd.f32 %v1501_v2, %v3949_v40 }
 0x1f2   : > { %v1960_v4 = vadd.f32 %v1959_v31, %v1871_v28 }
 0x1f4   : > { %v2039_v49 = vadd.f32 %v1960_v4, %v1500_v33 }
 0x1f6   : > { %2071 = vst [vmem:[%s4265_s21] sm:$0xff] %v2039_v49  ;;  %v2140_v0 = vmul.f32 %v2039_v49, %v2039_v49 }
 0x1f7   : > { %v1783_v59 = vpop.f32.mrf.mxu2  ;;  %v1872_v22 = vpop.f32.mrf.mxu3 }
 0x1f8   : > { %v1873_v58 = vadd.f32 %v1872_v22, %v1783_v59  ;;  %v1504_v25 = vpop.f32.mrf.mxu1  ;;  %v1964_v10 = vpop.f32.mrf.mxu0 }
 0x1f9   : > { %v1505_v14 = vadd.f32 %v1504_v25, %v3954_v37 }
 0x1fa   : > { %v1962_v26 = vadd.f32 %v1961_v24, %v1873_v58 }
 0x1fb   : > { %2752 = vmatmul.msk.bf16.gmra.mxu1 %vm3670_vm5, %v4526_v48  ;;  %3008 = vmatmul.msk.bf16.gmra.mxu0 %vm3670_vm5, %v3961_v41 }
 0x1fc   : > { %v2040_v57 = vadd.f32 %v1962_v26, %v1502_v11  ;;  %2954 = vmatmul.msk.bf16.gmra.mxu2 %vm3325_vm3, %v3561_v23  ;;  %1914 = vmatmul.bf16.gmra.mxu3 %v3959_v30 }
 0x1fe   : > { %2072 = vst [vmem:[%s4265_s21 + $0x8] sm:$0xff] %v2040_v57  ;;  %v2103_v40 = vadd.f32 %v2040_v57, %v2039_v49  ;;  %v2141_v9 = vmul.f32 %v2040_v57, %v2040_v57 }
 0x1ff   : > { %v1786_v56 = vpop.f32.mrf.mxu2  ;;  %v1875_v44 = vpop.f32.mrf.mxu3 }
 0x200   : > { %v2172_v15 = vadd.f32 %v2141_v9, %v2140_v0  ;;  %v1876_v48 = vadd.f32 %v1875_v44, %v1786_v56  ;;  %v1506_v31 = vpop.f32.mrf.mxu1  ;;  %v1966_v7 = vpop.f32.mrf.mxu0 }
 0x201   : > { %v1507_v22 = vadd.f32 %v1506_v31, %v3978_v17 }
 0x202   : > { %v1965_v1 = vadd.f32 %v1964_v10, %v1876_v48 }
 0x204   : > { %v2041_v28 = vadd.f32 %v1965_v1, %v1505_v14 }
 0x206   : > { %2073 = vst [vmem:[%s4265_s21 + $0x10] sm:$0xff] %v2041_v28  ;;  %v2104_v2 = vadd.f32 %v2103_v40, %v2041_v28  ;;  %v2142_v23 = vmul.f32 %v2041_v28, %v2041_v28 }
 0x207   : > { %v1788_v24 = vpop.f32.mrf.mxu2  ;;  %v1877_v30 = vpop.f32.mrf.mxu3 }
 0x208   : > { %v2173_v33 = vadd.f32 %v2172_v15, %v2142_v23  ;;  %v1878_v4 = vadd.f32 %v1877_v30, %v1788_v24  ;;  %v1509_v49 = vpop.f32.mrf.mxu1  ;;  %v1969_v59 = vpop.f32.mrf.mxu0 }
 0x209   : > { %v1510_v40 = vadd.f32 %v1509_v49, %v3989_v63 }
 0x20a   : > { %v1967_v58 = vadd.f32 %v1966_v7, %v1878_v4 }
 0x20b   : > { %2755 = vmatmul.msk.bf16.gmra.mxu1 %vm3670_vm5, %v3938_v12  ;;  %3011 = vmatmul.msk.bf16.gmra.mxu0 %vm3670_vm5, %v3996_v13 }
 0x20c   : > { %v2042_v37 = vadd.f32 %v1967_v58, %v1507_v22  ;;  %2958 = vmatmul.msk.bf16.gmra.mxu2 %vm3325_vm3, %v3640_v5  ;;  %1919 = vmatmul.bf16.gmra.mxu3 %v3994_v21 }
 0x20e   : > { %2074 = vst [vmem:[%s4265_s21 + $0x18] sm:$0xff] %v2042_v37  ;;  %v2105_v25 = vadd.f32 %v2104_v2, %v2042_v37  ;;  %v2143_v17 = vmul.f32 %v2042_v37, %v2042_v37 }
 0x20f   : > { %v1791_v10 = vpop.f32.mrf.mxu2  ;;  %v1880_v11 = vpop.f32.mrf.mxu3 }
 0x210   : > { %v2174_v26 = vadd.f32 %v2173_v33, %v2143_v17  ;;  %v1881_v57 = vadd.f32 %v1880_v11, %v1791_v10  ;;  %v1511_v12 = vpop.f32.mrf.mxu1  ;;  %v1971_v0 = vpop.f32.mrf.mxu0 }
 0x211   : > { %v1512_v1 = vadd.f32 %v1511_v12, %v4007_v61 }
 0x212   : > { %v1970_v9 = vadd.f32 %v1969_v59, %v1881_v57 }
 0x214   : > { %v2043_v56 = vadd.f32 %v1970_v9, %v1510_v40 }
 0x216   : > { %2075 = vst [vmem:[%s4265_s21 + $0x20] sm:$0xff] %v2043_v56  ;;  %v2106_v44 = vadd.f32 %v2105_v25, %v2043_v56  ;;  %v2144_v15 = vmul.f32 %v2043_v56, %v2043_v56 }
 0x217   : > { %v1793_v5 = vpop.f32.mrf.mxu2  ;;  %v1882_v48 = vpop.f32.mrf.mxu3 }
 0x218   : > { %v2175_v21 = vadd.f32 %v2174_v26, %v2144_v15  ;;  %v1883_v31 = vadd.f32 %v1882_v48, %v1793_v5  ;;  %v1514_v7 = vpop.f32.mrf.mxu1  ;;  %v1974_v14 = vpop.f32.mrf.mxu0  ;;  %v4529_v26 = vld [vmem:[#allocation36_spill] sm:$0xff] }
 0x219   : > { %v1515_v49 = vadd.f32 %v1514_v7, %v4012_v60 }
 0x21a   : > { %v1972_v28 = vadd.f32 %v1971_v0, %v1883_v31 }
 0x21b   : > { %2758 = vmatmul.msk.bf16.gmra.mxu1 %vm3670_vm5, %v3961_v41  ;;  %3014 = vmatmul.msk.bf16.gmra.mxu0 %vm3670_vm5, %v4019_v62 }
 0x21c   : > { %v2044_v63 = vadd.f32 %v1972_v28, %v1512_v1  ;;  %2962 = vmatmul.msk.bf16.gmra.mxu2 %vm3325_vm3, %v3329_v19  ;;  %1924 = vmatmul.bf16.gmra.mxu3 %v4017_v42 }
 0x21e   : > { %2076 = vst [vmem:[%s4265_s21 + $0x28] sm:$0xff] %v2044_v63  ;;  %v2107_v2 = vadd.f32 %v2106_v44, %v2044_v63  ;;  %v2145_v61 = vmul.f32 %v2044_v63, %v2044_v63 }
 0x21f   : > { %v1796_v23 = vpop.f32.mrf.mxu2  ;;  %v1885_v24 = vpop.f32.mrf.mxu3 }
 0x220   : > { %v2176_v30 = vadd.f32 %v2175_v21, %v2145_v61  ;;  %v1886_v33 = vadd.f32 %v1885_v24, %v1796_v23  ;;  %v1516_v41 = vpop.f32.mrf.mxu1  ;;  %v1976_v4 = vpop.f32.mrf.mxu0  ;;  %v4530_v61 = vld [vmem:[#allocation37_spill] sm:$0xff] }
 0x221   : > { %v1517_v57 = vadd.f32 %v1516_v41, %v4529_v26 }
 0x222   : > { %v1975_v59 = vadd.f32 %v1974_v14, %v1886_v33 }
 0x224   : > { %v2045_v22 = vadd.f32 %v1975_v59, %v1515_v49 }
 0x226   : > { %2077 = vst [vmem:[%s4265_s21 + $0x30] sm:$0xff] %v2045_v22  ;;  %v2108_v58 = vadd.f32 %v2107_v2, %v2045_v22  ;;  %v2146_v37 = vmul.f32 %v2045_v22, %v2045_v22 }
 0x227   : > { %v1798_v19 = vpop.f32.mrf.mxu2  ;;  %v1887_v25 = vpop.f32.mrf.mxu3 }
 0x228   : > { %v2177_v42 = vadd.f32 %v2176_v30, %v2146_v37  ;;  %v1888_v17 = vadd.f32 %v1887_v25, %v1798_v19  ;;  %v1519_v10 = vpop.f32.mrf.mxu1  ;;  %v1979_v11 = vpop.f32.mrf.mxu0 }
 0x229   : > { %v1520_v48 = vadd.f32 %v1519_v10, %v4046_v45 }
 0x22a   : > { %v1977_v12 = vadd.f32 %v1976_v4, %v1888_v17 }
 0x22b   : > { %2761 = vmatmul.msk.bf16.gmra.mxu1 %vm3670_vm5, %v3996_v13  ;;  %3017 = vmatmul.msk.bf16.gmra.mxu0 %vm3670_vm5, %v4054_v8 }
 0x22c   : > { %v2046_v60 = vadd.f32 %v1977_v12, %v1517_v57  ;;  %2966 = vmatmul.msk.bf16.gmra.mxu2 %vm3325_vm3, %v4487_v52  ;;  %1929 = vmatmul.bf16.gmra.mxu3 %v4052_v39  ;;  %v4531_v57 = vld [vmem:[#allocation5_spill] sm:$0xff] }
 0x22e   : > { %2078 = vst [vmem:[%s4265_s21 + $0x38] sm:$0xff] %v2046_v60  ;;  %v2109_v0 = vadd.f32 %v2108_v58, %v2046_v60  ;;  %v2147_v40 = vmul.f32 %v2046_v60, %v2046_v60 }
 0x22f   : > { %v1801_v9 = vpop.f32.mrf.mxu2  ;;  %v1890_v56 = vpop.f32.mrf.mxu3 }
 0x230   : > { %v2178_v44 = vadd.f32 %v2177_v42, %v2147_v40  ;;  %v1891_v15 = vadd.f32 %v1890_v56, %v1801_v9  ;;  %v1521_v13 = vpop.f32.mrf.mxu1  ;;  %v1981_v5 = vpop.f32.mrf.mxu0 }
 0x231   : > { %v1522_v23 = vadd.f32 %v1521_v13, %v4530_v61 }
 0x232   : > { %v1980_v21 = vadd.f32 %v1979_v11, %v1891_v15 }
 0x234   : > { %v2047_v31 = vadd.f32 %v1980_v21, %v1520_v48 }
 0x236   : > { %2079 = vst [vmem:[%s4265_s21 + $0x40] sm:$0xff] %v2047_v31  ;;  %v2110_v7 = vadd.f32 %v2109_v0, %v2047_v31  ;;  %v2148_v14 = vmul.f32 %v2047_v31, %v2047_v31  ;;  %v4532_v0 = vld [vmem:[#allocation9_spill] sm:$0xff] }
 0x237   : > { %v1803_v52 = vpop.f32.mrf.mxu2  ;;  %v1892_v1 = vpop.f32.mrf.mxu3 }
 0x238   : > { %v2179_v39 = vadd.f32 %v2178_v44, %v2148_v14  ;;  %v1893_v28 = vadd.f32 %v1892_v1, %v1803_v52  ;;  %v1524_v63 = vpop.f32.mrf.mxu1  ;;  %v1984_v2 = vpop.f32.mrf.mxu0 }
 0x239   : > { %v1525_v58 = vadd.f32 %v1524_v63, %v4069_v51  ;;  %v4533_v63 = vld [vmem:[#allocation4_spill] sm:$0xff] }
 0x23a   : > { %v1982_v24 = vadd.f32 %v1981_v5, %v1893_v28 }
 0x23b   : > { %2764 = vmatmul.msk.bf16.gmra.mxu1 %vm3670_vm5, %v4019_v62  ;;  %3020 = vmatmul.msk.bf16.gmra.mxu0 %vm3670_vm5, %v4077_v47 }
 0x23c   : > { %v2048_v45 = vadd.f32 %v1982_v24, %v1522_v23  ;;  %2970 = vmatmul.msk.bf16.gmra.mxu2 %vm3325_vm3, %v3565_v27  ;;  %1934 = vmatmul.bf16.gmra.mxu3 %v4075_v3  ;;  %v4534_v23 = vld [vmem:[#allocation10_spill] sm:$0xff]  ;;  %v4535_v24 = vmov 0.0|0.0  }
 0x23e   : > { %2080 = vst [vmem:[%s4265_s21 + $0x48] sm:$0xff] %v2048_v45  ;;  %v2111_v30 = vadd.f32 %v2110_v7, %v2048_v45  ;;  %v2149_v33 = vmul.f32 %v2048_v45, %v2048_v45 }
 0x23f   : > { %v1806_v41 = vpop.f32.mrf.mxu2  ;;  %v1895_v4 = vpop.f32.mrf.mxu3 }
 0x240   : > { %v2180_v49 = vadd.f32 %v2179_v39, %v2149_v33  ;;  %v1896_v59 = vadd.f32 %v1895_v4, %v1806_v41  ;;  %v1526_v62 = vpop.f32.mrf.mxu1  ;;  %v1986_v22 = vpop.f32.mrf.mxu0 }
 0x241   : > { %v1527_v12 = vadd.f32 %v1526_v62, %v4531_v57 }
 0x242   : > { %v1985_v37 = vadd.f32 %v1984_v2, %v1896_v59 }
 0x244   : > { %v2049_v19 = vadd.f32 %v1985_v37, %v1525_v58 }
 0x246   : > { %2081 = vst [vmem:[%s4265_s21 + $0x50] sm:$0xff] %v2049_v19  ;;  %v2112_v25 = vadd.f32 %v2111_v30, %v2049_v19  ;;  %v2150_v42 = vmul.f32 %v2049_v19, %v2049_v19 }
 0x247   : > { %v1808_v27 = vpop.f32.mrf.mxu2  ;;  %v1897_v17 = vpop.f32.mrf.mxu3 }
 0x248   : > { %v2181_v3 = vadd.f32 %v2180_v49, %v2150_v42  ;;  %v1898_v10 = vadd.f32 %v1897_v17, %v1808_v27  ;;  %v1529_v11 = vpop.f32.mrf.mxu1  ;;  %v1989_v26 = vpop.f32.mrf.mxu0 }
 0x249   : > { %v1530_v48 = vadd.f32 %v1529_v11, %v4092_v38 }
 0x24a   : > { %v1987_v60 = vadd.f32 %v1986_v22, %v1898_v10 }
 0x24b   : > { %2767 = vmatmul.msk.bf16.gmra.mxu1 %vm3670_vm5, %v4054_v8  ;;  %3023 = vmatmul.msk.bf16.gmra.mxu0 %vm3670_vm5, %v4100_v34 }
 0x24c   : > { %v2050_v51 = vadd.f32 %v1987_v60, %v1527_v12  ;;  %2974 = vmatmul.msk.bf16.gmra.mxu2 %vm3325_vm3, %v4532_v0  ;;  %1939 = vmatmul.bf16.gmra.mxu3 %v4098_v35 }
 0x24e   : > { %2082 = vst [vmem:[%s4265_s21 + $0x58] sm:$0xff] %v2050_v51  ;;  %v2113_v40 = vadd.f32 %v2112_v25, %v2050_v51  ;;  %v2151_v9 = vmul.f32 %v2050_v51, %v2050_v51 }
 0x24f   : > { %v1811_v56 = vpop.f32.mrf.mxu2  ;;  %v1900_v44 = vpop.f32.mrf.mxu3 }
 0x250   : > { %v2182_v15 = vadd.f32 %v2181_v3, %v2151_v9  ;;  %v1901_v13 = vadd.f32 %v1900_v44, %v1811_v56  ;;  %v1531_v8 = vpop.f32.mrf.mxu1  ;;  %v1991_v5 = vpop.f32.mrf.mxu0 }
 0x251   : > { %v1532_v2 = vadd.f32 %v1531_v8, %v4533_v63 }
 0x252   : > { %v1990_v34 = vadd.f32 %v1989_v26, %v1901_v13 }
 0x254   : > { %v2051_v21 = vadd.f32 %v1990_v34, %v1530_v48 }
 0x256   : > { %2083 = vst [vmem:[%s4265_s21 + $0x60] sm:$0xff] %v2051_v21  ;;  %v2114_v31 = vadd.f32 %v2113_v40, %v2051_v21  ;;  %v2152_v7 = vmul.f32 %v2051_v21, %v2051_v21 }
 0x257   : > { %v1813_v14 = vpop.f32.mrf.mxu2  ;;  %v1902_v52 = vpop.f32.mrf.mxu3 }
 0x258   : > { %v2183_v35 = vadd.f32 %v2182_v15, %v2152_v7  ;;  %v1903_v1 = vadd.f32 %v1902_v52, %v1813_v14  ;;  %v1534_v39 = vpop.f32.mrf.mxu1  ;;  %v1994_v28 = vpop.f32.mrf.mxu0 }
 0x259   : > { %v1535_v20 = vadd.f32 %v1534_v39, %v4114_v6 }
 0x25a   : > { %v1992_v61 = vadd.f32 %v1991_v5, %v1903_v1 }
 0x25b   : > { %2770 = vmatmul.msk.bf16.gmra.mxu1 %vm3670_vm5, %v4077_v47  ;;  %3026 = vmatmul.msk.bf16.gmra.mxu0 %vm3670_vm5, %v4117_v43 }
 0x25c   : > { %v2052_v38 = vadd.f32 %v1992_v61, %v1532_v2  ;;  %2978 = vmatmul.msk.bf16.gmra.mxu2 %vm3325_vm3, %v4534_v23  ;;  %1944 = vmatmul.bf16.gmra.mxu3 %v4535_v24 }
 0x25e   : > { %2084 = vst [vmem:[%s4265_s21 + $0x68] sm:$0xff] %v2052_v38  ;;  %v2115_v45 = vadd.f32 %v2114_v31, %v2052_v38  ;;  %v2153_v30 = vmul.f32 %v2052_v38, %v2052_v38 }
 0x25f   : > { %v1816_v33 = vpop.f32.mrf.mxu2  ;;  %v1905_v41 = vpop.f32.mrf.mxu3 }
 0x260   : > { %v2184_v4 = vadd.f32 %v2183_v35, %v2153_v30  ;;  %v1906_v49 = vadd.f32 %v1905_v41, %v1816_v33  ;;  %v1536_v47 = vpop.f32.mrf.mxu1  ;;  %v1996_v59 = vpop.f32.mrf.mxu0 }
 0x261   : > { %v1537_v17 = vadd.f32 %v1536_v47, %v4129_v29 }
 0x262   : > { %v1995_v43 = vadd.f32 %v1994_v28, %v1906_v49  ;;  %v4536_v49 = vld [vmem:[#allocation19_spill] sm:$0xff] }
 0x264   : > { %v2053_v62 = vadd.f32 %v1995_v43, %v1535_v20 }
 0x266   : > { %2085 = vst [vmem:[%s4265_s21 + $0x70] sm:$0xff] %v2053_v62  ;;  %v2116_v22 = vadd.f32 %v2115_v45, %v2053_v62  ;;  %v2154_v18 = vmul.f32 %v2053_v62, %v2053_v62 }
 0x267   : > { %v1818_v58 = vpop.f32.mrf.mxu2  ;;  %v1907_v37 = vpop.f32.mrf.mxu3 }
 0x268   : > { %v2185_v19 = vadd.f32 %v2184_v4, %v2154_v18  ;;  %v1908_v25 = vadd.f32 %v1907_v37, %v1818_v58  ;;  %v1539_v42 = vpop.f32.mrf.mxu1  ;;  %v1999_v27 = vpop.f32.mrf.mxu0 }
 0x269   : > { %v1540_v40 = vadd.f32 %v1539_v42, %v4132_v54 }
 0x26a   : > { %v1997_v3 = vadd.f32 %v1996_v59, %v1908_v25  ;;  %v4537_v25 = vld [vmem:[#allocation21_spill] sm:$0xff] }
 0x26c   : > { %v2054_v10 = vadd.f32 %v1997_v3, %v1537_v17 }
 0x26e   : > { %2086 = vst [vmem:[%s4265_s21 + $0x78] sm:$0xff] %v2054_v10  ;;  %v2117_v11 = vadd.f32 %v2116_v22, %v2054_v10  ;;  %v2155_v26 = vmul.f32 %v2054_v10, %v2054_v10 }
 0x26f   : > { %v1821_v6 = vpop.f32.mrf.mxu2  ;;  %v1910_v57 = vpop.f32.mrf.mxu3 }
 0x270   : > { %v2186_v12 = vadd.f32 %v2185_v19, %v2155_v26  ;;  %v1911_v60 = vadd.f32 %v1910_v57, %v1821_v6  ;;  %v1541_v51 = vpop.f32.mrf.mxu1  ;;  %v2001_v0 = vpop.f32.mrf.mxu0 }
 0x271   : > { %v1542_v21 = vadd.f32 %v1541_v51, %v4145_v46  ;;  %v4538_v51 = vld [vmem:[#allocation12_spill] sm:$0xff] }
 0x272   : > { %v2000_v9 = vadd.f32 %v1999_v27, %v1911_v60 }
 0x274   : > { %v2055_v56 = vadd.f32 %v2000_v9, %v1540_v40 }
 0x276   : > { %2087 = vst [vmem:[%s4265_s21 + $0x80] sm:$0xff] %v2055_v56  ;;  %v2118_v44 = vadd.f32 %v2117_v11, %v2055_v56  ;;  %v2156_v15 = vmul.f32 %v2055_v56, %v2055_v56 }
 0x277   : > { %v1823_v29 = vpop.f32.mrf.mxu2  ;;  %v1912_v13 = vpop.f32.mrf.mxu3 }
 0x278   : > { %v2187_v8 = vadd.f32 %v2186_v12, %v2156_v15  ;;  %v1913_v5 = vadd.f32 %v1912_v13, %v1823_v29  ;;  %v1544_v48 = vpop.f32.mrf.mxu1  ;;  %v2004_v34 = vpop.f32.mrf.mxu0 }
 0x279   : > { %v1545_v2 = vadd.f32 %v1544_v48, %v4148_v36 }
 0x27a   : > { %v2002_v31 = vadd.f32 %v2001_v0, %v1913_v5 }
 0x27c   : > { %v2056_v7 = vadd.f32 %v2002_v31, %v1542_v21 }
 0x27e   : > { %2088 = vst [vmem:[%s4265_s21 + $0x88] sm:$0xff] %v2056_v7  ;;  %v2119_v14 = vadd.f32 %v2118_v44, %v2056_v7  ;;  %v2157_v52 = vmul.f32 %v2056_v7, %v2056_v7 }
 0x27f   : > { %v1826_v54 = vpop.f32.mrf.mxu2  ;;  %v1915_v35 = vpop.f32.mrf.mxu3 }
 0x280   : > { %v2188_v1 = vadd.f32 %v2187_v8, %v2157_v52  ;;  %v1916_v39 = vadd.f32 %v1915_v35, %v1826_v54  ;;  %v1546_v28 = vpop.f32.mrf.mxu1  ;;  %v2006_v63 = vpop.f32.mrf.mxu0 }
 0x281   : > { %v1547_v47 = vadd.f32 %v1546_v28, %v4536_v49 }
 0x282   : > { %v2005_v61 = vadd.f32 %v2004_v34, %v1916_v39  ;;  %v4539_v34 = vld [vmem:[#allocation7_spill] sm:$0xff] }
 0x284   : > { %v2057_v38 = vadd.f32 %v2005_v61, %v1545_v2  ;;  %v4540_v2 = vld [vmem:[#allocation11_spill] sm:$0xff] }
 0x286   : > { %2089 = vst [vmem:[%s4265_s21 + $0x90] sm:$0xff] %v2057_v38  ;;  %v2120_v23 = vadd.f32 %v2119_v14, %v2057_v38  ;;  %v2158_v24 = vmul.f32 %v2057_v38, %v2057_v38 }
 0x287   : > { %v1828_v46 = vpop.f32.mrf.mxu2  ;;  %v1917_v45 = vpop.f32.mrf.mxu3 }
 0x288   : > { %v2189_v30 = vadd.f32 %v2188_v1, %v2158_v24  ;;  %v1918_v33 = vadd.f32 %v1917_v45, %v1828_v46  ;;  %v1549_v41 = vpop.f32.mrf.mxu1  ;;  %v2009_v4 = vpop.f32.mrf.mxu0 }
 0x289   : > { %v1550_v42 = vadd.f32 %v1549_v41, %v4537_v25 }
 0x28a   : > { %v2007_v59 = vadd.f32 %v2006_v63, %v1918_v33 }
 0x28c   : > { %v2058_v20 = vadd.f32 %v2007_v59, %v1547_v47  ;;  %v4541_v47 = vld [vmem:[#allocation25_spill] sm:$0xff] }
 0x28e   : > { %2090 = vst [vmem:[%s4265_s21 + $0x98] sm:$0xff] %v2058_v20  ;;  %v2121_v43 = vadd.f32 %v2120_v23, %v2058_v20  ;;  %v2159_v62 = vmul.f32 %v2058_v20, %v2058_v20 }
 0x28f   : > { %v1831_v36 = vpop.f32.mrf.mxu2  ;;  %v1920_v22 = vpop.f32.mrf.mxu3 }
 0x290   : > { %v2190_v18 = vadd.f32 %v2189_v30, %v2159_v62  ;;  %v1921_v58 = vadd.f32 %v1920_v22, %v1831_v36  ;;  %v1551_v37 = vpop.f32.mrf.mxu1  ;;  %v2011_v19 = vpop.f32.mrf.mxu0 }
 0x291   : > { %v1552_v0 = vadd.f32 %v1551_v37, %v4538_v51 }
 0x292   : > { %v2010_v27 = vadd.f32 %v2009_v4, %v1921_v58 }
 0x294   : > { %v2059_v17 = vadd.f32 %v2010_v27, %v1550_v42  ;;  %v4542_v42 = vld [vmem:[#allocation27_spill] sm:$0xff] }
 0x296   : > { %2091 = vst [vmem:[%s4265_s21 + $0xa0] sm:$0xff] %v2059_v17  ;;  %v2122_v3 = vadd.f32 %v2121_v43, %v2059_v17  ;;  %v2160_v10 = vmul.f32 %v2059_v17, %v2059_v17 }
 0x297   : > { %v1833_v11 = vpop.f32.mrf.mxu2  ;;  %v1922_v26 = vpop.f32.mrf.mxu3 }
 0x298   : > { %v2191_v6 = vadd.f32 %v2190_v18, %v2160_v10  ;;  %v1923_v57 = vadd.f32 %v1922_v26, %v1833_v11  ;;  %v1554_v12 = vpop.f32.mrf.mxu1  ;;  %v2014_v60 = vpop.f32.mrf.mxu0 }
 0x299   : > { %v1555_v21 = vadd.f32 %v1554_v12, %v4539_v34 }
 0x29a   : > { %v2012_v40 = vadd.f32 %v2011_v19, %v1923_v57 }
 0x29c   : > { %v2060_v9 = vadd.f32 %v2012_v40, %v1552_v0  ;;  %v4543_v0 = vld [vmem:[#allocation14_spill] sm:$0xff] }
 0x29e   : > { %2092 = vst [vmem:[%s4265_s21 + $0xa8] sm:$0xff] %v2060_v9  ;;  %v2123_v56 = vadd.f32 %v2122_v3, %v2060_v9  ;;  %v2161_v44 = vmul.f32 %v2060_v9, %v2060_v9 }
 0x29f   : > { %v1836_v15 = vpop.f32.mrf.mxu2  ;;  %v1925_v29 = vpop.f32.mrf.mxu3 }
 0x2a0   : > { %v2192_v13 = vadd.f32 %v2191_v6, %v2161_v44  ;;  %v1926_v8 = vadd.f32 %v1925_v29, %v1836_v15  ;;  %v1556_v5 = vpop.f32.mrf.mxu1  ;;  %v2016_v48 = vpop.f32.mrf.mxu0 }
 0x2a1   : > { %v1557_v61 = vadd.f32 %v1556_v5, %v4540_v2 }
 0x2a2   : > { %v2015_v31 = vadd.f32 %v2014_v60, %v1926_v8 }
 0x2a4   : > { %v2061_v7 = vadd.f32 %v2015_v31, %v1555_v21 }
 0x2a6   : > { %2093 = vst [vmem:[%s4265_s21 + $0xb0] sm:$0xff] %v2061_v7  ;;  %v2124_v14 = vadd.f32 %v2123_v56, %v2061_v7  ;;  %v2162_v52 = vmul.f32 %v2061_v7, %v2061_v7 }
 0x2a7   : > { %v1838_v54 = vpop.f32.mrf.mxu2  ;;  %v1927_v35 = vpop.f32.mrf.mxu3 }
 0x2a8   : > { %v2193_v1 = vadd.f32 %v2192_v13, %v2162_v52  ;;  %v1928_v39 = vadd.f32 %v1927_v35, %v1838_v54  ;;  %v1559_v28 = vpop.f32.mrf.mxu1  ;;  %v2019_v63 = vpop.f32.mrf.mxu0 }
 0x2a9   : > { %v1560_v59 = vadd.f32 %v1559_v28, %v4541_v47 }
 0x2aa   : > { %v2017_v38 = vadd.f32 %v2016_v48, %v1928_v39 }
 0x2ac   : > { %v2062_v23 = vadd.f32 %v2017_v38, %v1557_v61 }
 0x2ae   : > { %2094 = vst [vmem:[%s4265_s21 + $0xb8] sm:$0xff] %v2062_v23  ;;  %v2125_v24 = vadd.f32 %v2124_v14, %v2062_v23  ;;  %v2163_v46 = vmul.f32 %v2062_v23, %v2062_v23 }
 0x2af   : > { %v1841_v45 = vpop.f32.mrf.mxu2  ;;  %v1930_v30 = vpop.f32.mrf.mxu3 }
 0x2b0   : > { %v2194_v33 = vadd.f32 %v2193_v1, %v2163_v46  ;;  %v1931_v41 = vadd.f32 %v1930_v30, %v1841_v45  ;;  %v1561_v4 = vpop.f32.mrf.mxu1  ;;  %v2021_v49 = vpop.f32.mrf.mxu0 }
 0x2b1   : > { %v1562_v27 = vadd.f32 %v1561_v4, %v4542_v42 }
 0x2b2   : > { %v2020_v20 = vadd.f32 %v2019_v63, %v1931_v41 }
 0x2b4   : > { %v2063_v43 = vadd.f32 %v2020_v20, %v1560_v59 }
 0x2b6   : > { %2095 = vst [vmem:[%s4265_s21 + $0xc0] sm:$0xff] %v2063_v43  ;;  %v2126_v62 = vadd.f32 %v2125_v24, %v2063_v43  ;;  %v2164_v36 = vmul.f32 %v2063_v43, %v2063_v43 }
 0x2b7   : > { %v1843_v22 = vpop.f32.mrf.mxu2  ;;  %v1932_v18 = vpop.f32.mrf.mxu3 }
 0x2b8   : > { %v2195_v58 = vadd.f32 %v2194_v33, %v2164_v36  ;;  %v1933_v37 = vadd.f32 %v1932_v18, %v1843_v22  ;;  %v1564_v19 = vpop.f32.mrf.mxu1  ;;  %v2024_v25 = vpop.f32.mrf.mxu0 }
 0x2b9   : > { %v1565_v40 = vadd.f32 %v1564_v19, %v4543_v0 }
 0x2ba   : > { %v2022_v17 = vadd.f32 %v2021_v49, %v1933_v37 }
 0x2bc   : > { %v2064_v3 = vadd.f32 %v2022_v17, %v1562_v27 }
 0x2be   : > { %2096 = vst [vmem:[%s4265_s21 + $0xc8] sm:$0xff] %v2064_v3  ;;  %v2127_v10 = vadd.f32 %v2126_v62, %v2064_v3  ;;  %v2165_v11 = vmul.f32 %v2064_v3, %v2064_v3 }
 0x2bf   : > { %v1846_v26 = vpop.f32.mrf.mxu2  ;;  %v1935_v6 = vpop.f32.mrf.mxu3 }
 0x2c0   : > { %v2196_v57 = vadd.f32 %v2195_v58, %v2165_v11  ;;  %v1936_v12 = vadd.f32 %v1935_v6, %v1846_v26  ;;  %v1566_v60 = vpop.f32.mrf.mxu1  ;;  %v2026_v51 = vpop.f32.mrf.mxu0 }
 0x2c1   : > { %v1567_v34 = vadd.f32 %v1566_v60, %v4225_v50 }
 0x2c2   : > { %v2025_v9 = vadd.f32 %v2024_v25, %v1936_v12 }
 0x2c4   : > { %v2065_v56 = vadd.f32 %v2025_v9, %v1565_v40 }
 0x2c6   : > { %2097 = vst [vmem:[%s4265_s21 + $0xd0] sm:$0xff] %v2065_v56  ;;  %v2128_v44 = vadd.f32 %v2127_v10, %v2065_v56  ;;  %v2166_v15 = vmul.f32 %v2065_v56, %v2065_v56 }
 0x2c7   : > { %v1848_v29 = vpop.f32.mrf.mxu2  ;;  %v1937_v13 = vpop.f32.mrf.mxu3 }
 0x2c8   : > { %v2197_v8 = vadd.f32 %v2196_v57, %v2166_v15  ;;  %v1938_v5 = vadd.f32 %v1937_v13, %v1848_v29  ;;  %v1569_v48 = vpop.f32.mrf.mxu1  ;;  %v2029_v31 = vpop.f32.mrf.mxu0 }
 0x2c9   : > { %v1570_v28 = vadd.f32 %v1569_v48, %v4228_v32 }
 0x2ca   : > { %v2027_v21 = vadd.f32 %v2026_v51, %v1938_v5 }
 0x2cc   : > { %v2066_v7 = vadd.f32 %v2027_v21, %v1567_v34 }
 0x2ce   : > { %2098 = vst [vmem:[%s4265_s21 + $0xd8] sm:$0xff] %v2066_v7  ;;  %v2129_v14 = vadd.f32 %v2128_v44, %v2066_v7  ;;  %v2167_v52 = vmul.f32 %v2066_v7, %v2066_v7 }
 0x2cf   : > { %v1851_v54 = vpop.f32.mrf.mxu2  ;;  %v1940_v35 = vpop.f32.mrf.mxu3 }
 0x2d0   : > { %v2198_v1 = vadd.f32 %v2197_v8, %v2167_v52  ;;  %v1941_v39 = vadd.f32 %v1940_v35, %v1851_v54  ;;  %v1571_v2 = vpop.f32.mrf.mxu1  ;;  %v2031_v38 = vpop.f32.mrf.mxu0 }
 0x2d1   : > { %v1572_v33 = vadd.f32 %v1571_v2, %v4241_v16 }
 0x2d2   : > { %v2030_v63 = vadd.f32 %v2029_v31, %v1941_v39 }
 0x2d4   : > { %v2067_v61 = vadd.f32 %v2030_v63, %v1570_v28 }
 0x2d6   : > { %2099 = vst [vmem:[%s4265_s21 + $0xe0] sm:$0xff] %v2067_v61  ;;  %v2130_v50 = vadd.f32 %v2129_v14, %v2067_v61  ;;  %v2168_v23 = vmul.f32 %v2067_v61, %v2067_v61 }
 0x2d7   : > { %v1853_v24 = vpop.f32.mrf.mxu2  ;;  %v1942_v46 = vpop.f32.mrf.mxu3 }
 0x2d8   : > { %v2199_v45 = vadd.f32 %v2198_v1, %v2168_v23  ;;  %v1943_v30 = vadd.f32 %v1942_v46, %v1853_v24  ;;  %v1574_v49 = vpop.f32.mrf.mxu1  ;;  %v2034_v59 = vpop.f32.mrf.mxu0 }
 0x2d9   : > { %v1575_v22 = vadd.f32 %v1574_v49, %v4244_v55 }
 0x2da   : > { %v2032_v41 = vadd.f32 %v2031_v38, %v1943_v30 }
 0x2dc   : > { %v2068_v4 = vadd.f32 %v2032_v41, %v1572_v33 }
 0x2de   : > { %2100 = vst [vmem:[%s4265_s21 + $0xe8] sm:$0xff] %v2068_v4  ;;  %v2131_v32 = vadd.f32 %v2130_v50, %v2068_v4  ;;  %v2169_v47 = vmul.f32 %v2068_v4, %v2068_v4 }
 0x2df   : > { %v1856_v20 = vpop.f32.mrf.mxu2  ;;  %v1945_v43 = vpop.f32.mrf.mxu3 }
 0x2e0   : > { %v2200_v62 = vadd.f32 %v2199_v45, %v2169_v47  ;;  %v1946_v36 = vadd.f32 %v1945_v43, %v1856_v20  ;;  %v1576_v16 = vpop.f32.mrf.mxu1  ;;  %v2036_v3 = vpop.f32.mrf.mxu0 }
 0x2e1   : > { %v1577_v10 = vadd.f32 %v1576_v16, %v4257_v53 }
 0x2e2   : > { %v2035_v18 = vadd.f32 %v2034_v59, %v1946_v36 }
 0x2e4   : > { %v2069_v58 = vadd.f32 %v2035_v18, %v1575_v22 }
 0x2e6   : > { %2101 = vst [vmem:[%s4265_s21 + $0xf0] sm:$0xff] %v2069_v58  ;;  %v2132_v37 = vadd.f32 %v2131_v32, %v2069_v58  ;;  %v2170_v19 = vmul.f32 %v2069_v58, %v2069_v58 }
 0x2e7   : > { %v1858_v25 = vpop.f32.mrf.mxu2  ;;  %v1947_v42 = vpop.f32.mrf.mxu3 }
 0x2e8   : > { %v2201_v27 = vadd.f32 %v2200_v62, %v2170_v19  ;;  %v1948_v17 = vadd.f32 %v1947_v42, %v1858_v25 }
 0x2ea   : > { %v2037_v11 = vadd.f32 %v2036_v3, %v1948_v17 }
 0x2ec   : > { %v2070_v26 = vadd.f32 %v2037_v11, %v1577_v10 }
 0x2ee   : > { %2102 = vst [vmem:[%s4265_s21 + $0xf8] sm:$0xff] %v2070_v26  ;;  %v2133_v6 = vadd.f32 %v2132_v37, %v2070_v26  ;;  %v2171_v57 = vmul.f32 %v2070_v26, %v2070_v26 }
 0x2f0   : > { %v2134_v55 = vrot.slane %v2133_v6, 4  ;;  %v2202_v12 = vadd.f32 %v2201_v27, %v2171_v57 }
 0x2f2   : > { %v2135_v60 = vadd.f32 %v2134_v55, %v2133_v6  ;;  %v2203_v51 = vrot.slane %v2202_v12, 4 }
 0x2f4   : > { %v2136_v0 = vrot.slane %v2135_v60, 2  ;;  %v2204_v40 = vadd.f32 %v2203_v51, %v2202_v12 }
 0x2f6   : > { %v2137_v9 = vadd.f32 %v2136_v0, %v2135_v60  ;;  %v2205_v56 = vrot.slane %v2204_v40, 2 }
 0x2f8   : > { %v2138_v44 = vrot.slane %v2137_v9, 1  ;;  %v2206_v15 = vadd.f32 %v2205_v56, %v2204_v40 }
 0x2fa   : > { %v2207_v29 = vrot.slane %v2206_v15, 1  ;;  %v2139_v53 = vadd.f32 %v2138_v44, %v2137_v9 }
 0x2fc   : > { %v2208_v13 = vadd.f32 %v2207_v29, %v2206_v15 }
 0x2fe   : > { %v2209_v8 = vsel %vm403_vm0, %v2139_v53, %v2208_v13 }
 0x2ff   : > { %2210 = vst [vmem:[%s235_s25] sm:$0x3] %v2209_v8 }
 0x300 PF: > { %s16_s18 = sadd.s32 1, %s3146_s18  }
 0x301   : > { %p13_p4 = scmp.ge.s32.totalorder %s16_s18, 4  }
 0x303   :  { %15 = sbr.rel (!%p13_p4) target bundleno = 1 (0x1), region = 80 }

</bundles_post_ra>
